<compile_context>
chip_gen: v5e
topology: v5e:2x2
jax: 0.10.0
libtpu: 0.0.40
codegen_flags: <defaults>
</compile_context>

<pallas_src>
import math
import functools

import jax
import jax.numpy as jnp
from jax.experimental import pallas as pl
from jax.experimental.pallas import tpu as pltpu


# ----------------------------------------------------------------------------
# In-kernel helpers
# ----------------------------------------------------------------------------
def _layer_norm(x, a, b, eps):
    # Matches the spec's LayerNorm: torch .std() is unbiased (divide by n-1),
    # and eps is added to std (not to variance).  Kept entirely in f32.
    n = x.shape[-1]
    mean = jnp.mean(x, axis=-1, keepdims=True)
    c = x - mean
    var = jnp.sum(c * c, axis=-1, keepdims=True) * (1.0 / (n - 1))
    return a * (c / (jnp.sqrt(var) + eps)) + b


# ----------------------------------------------------------------------------
# Fused SA kernel: one grid step = TB batch elements (TB*S rows per matmul)
# ----------------------------------------------------------------------------
def _sa_kernel(x_ref, mask_ref,
               wqkv_ref, bqkv_ref, wm_ref, bm_ref,
               w1_ref, b1_ref, w2_ref, b2_ref,
               ln1a_ref, ln1b_ref, ln2a_ref, ln2b_ref,
               out_ref, *, tb, s_len, n_head, eps):
    h = x_ref.shape[-1]
    dh = h // n_head
    rows = tb * s_len

    # (TB, S, H) -> (TB*S, H): leading-dim merge only (layout preserving).
    x = x_ref[...].reshape(rows, h)                              # f32

    # ---- fused QKV projection: bf16 operands, f32 accumulation on the MXU ----
    # 1/sqrt(dh) is already folded into the Q columns of wqkv/bqkv (pack_params).
    qkv = jnp.dot(x.astype(jnp.bfloat16), wqkv_ref[...],
                  preferred_element_type=jnp.float32) + bqkv_ref[...]   # (R, 3H) f32

    # Additive key-mask bias, computed ONCE (hoisted out of the head loop).
    mask = mask_ref[...]                                         # (TB, 1, S) int32
    bias = jnp.where(mask != 0, jnp.float32(-1e9), jnp.float32(0.0))  # (TB, 1, S)

    # ---- per-head attention, batched over the TB batches; merge folded in ----
    # NOTE: at toy H=64 the per-head lane slices are not 128-aligned; at
    # realistic H (dh a multiple of 128) they are free static slices.
    # TODO(synk): switch to lax.fori_loop over heads + flash-style S tiling once
    # n_head / S grow (static unroll keeps every head's SxS buffers live).
    merged = jnp.zeros((rows, h), jnp.float32)
    for hd in range(n_head):
        lo = hd * dh
        qh = qkv[:, lo:lo + dh].reshape(tb, s_len, dh).astype(jnp.bfloat16)
        kh = qkv[:, h + lo:h + lo + dh].reshape(tb, s_len, dh).astype(jnp.bfloat16)
        vh = qkv[:, 2 * h + lo:2 * h + lo + dh].reshape(tb, s_len, dh).astype(jnp.bfloat16)

        # (TB,S,dh) x (TB,S,dh) -> (TB,S,S), contracting dh, batched over TB.
        scores = jnp.einsum('bqd,bkd->bqk', qh, kh,
                            preferred_element_type=jnp.float32)
        scores = scores + bias                                   # mask (f32 add)
        scores = scores - jnp.max(scores, axis=-1, keepdims=True)
        p = jnp.exp(scores)                                      # f32
        p = p * pl.reciprocal(jnp.sum(p, axis=-1, keepdims=True), approx=True)

        pv = jnp.einsum('bqk,bkd->bqd', p.astype(jnp.bfloat16), vh,
                        preferred_element_type=jnp.float32)      # (TB, S, dh)

        # Fold the merge projection: no (R, H) lane-concat of n_head narrow slabs.
        merged = merged + jnp.dot(pv.reshape(rows, dh).astype(jnp.bfloat16),
                                  wm_ref[lo:lo + dh, :],
                                  preferred_element_type=jnp.float32)
    merged = merged + bm_ref[...]

    # ---- residual + LayerNorm1 (f32 elementwise) ----
    y1 = _layer_norm(x + merged, ln1a_ref[...], ln1b_ref[...], eps)

    # ---- FFN (Linear -> ReLU -> [dropout=id] -> Linear) + residual + LayerNorm2 ----
    hmid = jnp.dot(y1.astype(jnp.bfloat16), w1_ref[...],
                   preferred_element_type=jnp.float32) + b1_ref[...]
    hmid = jnp.maximum(hmid, 0.0)
    ff = jnp.dot(hmid.astype(jnp.bfloat16), w2_ref[...],
                 preferred_element_type=jnp.float32) + b2_ref[...]
    y2 = _layer_norm(y1 + ff, ln2a_ref[...], ln2b_ref[...], eps)

    # TODO(synk): for H < 128 this store's last dim is not lane-dense; flatten the
    # I/O blocks to (TB, S*H) (wrapper-side reshape) or pad H to 128 if the
    # epilogue ever shows up as store-bound.  Realistic H (multiple of 128) is fine.
    out_ref[...] = y2.reshape(tb, s_len, h)


# ----------------------------------------------------------------------------
# Wrapper
# ----------------------------------------------------------------------------
def _choose_tb(b, s, target_rows=256, max_rows=2048):
    """Batch elements per grid step.  Prefer the smallest tile that already
    fills the MXU M dimension (>=256 rows on v6e/v7x) so the grid keeps >=2
    steps for megacore / v7x's two TensorCores; otherwise take the largest
    affordable divisor of B."""
    divs = [d for d in range(1, b + 1) if b % d == 0]
    for d in divs:
        if d * s >= target_rows:
            return d
    affordable = [d for d in divs if d * s <= max_rows]
    return affordable[-1] if affordable else 1


def _vmem_budget_bytes(weights, tb, s, h, ff_dim):
    """Explicit VMEM budget: single-buffered weights + per-step activations +
    double-buffered I/O blocks, 2x headroom, capped below v7x's 64 MiB."""
    wbytes = sum(int(math.prod(w.shape)) * w.dtype.itemsize for w in weights)
    rows = tb * s
    act = 4 * rows * (h + 3 * h + 4 * h + 2 * ff_dim) + 4 * 4 * tb * s * s
    io = 2 * 2 * 4 * rows * h + 2 * 4 * tb * s
    budget = 2 * (wbytes + act) + io + (4 << 20)
    return int(min(max(budget, 16 << 20), 48 << 20))


def sa_forward(packed, y, y_mask, *, n_head, eps=1e-6, tb=None):
    """y: (B, S, H) f32; y_mask: (B, 1, 1, S) int (nonzero = masked key)."""
    b, s, h = y.shape
    ff_dim = packed["w1"].shape[1]
    if tb is None:
        tb = _choose_tb(b, s)
    assert b % tb == 0
    grid = (b // tb,)

    mask3 = y_mask.reshape(b, 1, s).astype(jnp.int32)

    weight_names = ["wqkv", "bqkv", "wm", "bm", "w1", "b1", "w2", "b2",
                    "ln1a", "ln1b", "ln2a", "ln2b"]
    weights = [packed[n] for n in weight_names]

    kernel = functools.partial(_sa_kernel, tb=tb, s_len=s, n_head=n_head, eps=eps)

    def build(single_buffer_weights):
        def wspec(a):
            zeros = (0,) * a.ndim
            idx = lambda i, _z=zeros: _z
            if single_buffer_weights:
                # Weight blocks never change across the grid -> single buffer.
                return pl.BlockSpec(a.shape, idx, pipeline_mode=pl.Buffered(1))
            return pl.BlockSpec(a.shape, idx)

        return pl.pallas_call(
            kernel,
            out_shape=jax.ShapeDtypeStruct((b, s, h), jnp.float32),
            grid=grid,
            in_specs=[pl.BlockSpec((tb, s, h), lambda i: (i, 0, 0)),
                      pl.BlockSpec((tb, 1, s), lambda i: (i, 0, 0))]
                     + [wspec(w) for w in weights],
            out_specs=pl.BlockSpec((tb, s, h), lambda i: (i, 0, 0)),
            compiler_params=pltpu.CompilerParams(
                dimension_semantics=("parallel",),
                vmem_limit_bytes=_vmem_budget_bytes(weights, tb, s, h, ff_dim)),
        )

    try:
        out = build(True)(y, mask3, *weights)
    except Exception:
        # Fallback if this JAX build rejects single buffering (Buffered(1)).
        out = build(False)(y, mask3, *weights)
    return out


# ----------------------------------------------------------------------------
# Parameter construction (torch nn.Linear convention: W is (out, in))
# ----------------------------------------------------------------------------
def init_params(key, hidden, ff_dim):
    ks = jax.random.split(key, 12)
    bh = 1.0 / math.sqrt(hidden)
    bf = 1.0 / math.sqrt(ff_dim)

    def lin(kw, kb, out_d, in_d, bound):
        w = jax.random.uniform(kw, (out_d, in_d), jnp.float32, -bound, bound)
        b = jax.random.uniform(kb, (out_d,), jnp.float32, -bound, bound)
        return w, b

    return {
        "linear_q": lin(ks[0], ks[1], hidden, hidden, bh),
        "linear_k": lin(ks[2], ks[3], hidden, hidden, bh),
        "linear_v": lin(ks[4], ks[5], hidden, hidden, bh),
        "linear_merge": lin(ks[6], ks[7], hidden, hidden, bh),
        "ffn_fc": lin(ks[8], ks[9], ff_dim, hidden, bh),
        "ffn_out": lin(ks[10], ks[11], hidden, ff_dim, bf),
        "norm1": (jnp.ones((hidden,), jnp.float32), jnp.zeros((hidden,), jnp.float32)),
        "norm2": (jnp.ones((hidden,), jnp.float32), jnp.zeros((hidden,), jnp.float32)),
    }


def pack_params(p, n_head):
    """Pre-transpose / fuse / fold-scale weights into the kernel layout.
    Matmul weights are cast to bf16 (MXU-native); biases / LN params stay f32."""
    wq, bq = p["linear_q"]
    wk, bk = p["linear_k"]
    wv, bv = p["linear_v"]
    wm, bm = p["linear_merge"]
    w1, b1 = p["ffn_fc"]
    w2, b2 = p["ffn_out"]
    h = wq.shape[0]
    scale = 1.0 / math.sqrt(h // n_head)
    # Fold the attention 1/sqrt(dh) scale into the Q projection (weight + bias).
    wqkv = jnp.concatenate([wq.T * scale, wk.T, wv.T], axis=1)        # (H, 3H)
    bqkv = jnp.concatenate([bq * scale, bk, bv]).reshape(1, -1)       # (1, 3H)
    return {
        "wqkv": wqkv.astype(jnp.bfloat16),
        "bqkv": bqkv.astype(jnp.float32),
        "wm": wm.T.astype(jnp.bfloat16), "bm": bm.reshape(1, -1).astype(jnp.float32),
        "w1": w1.T.astype(jnp.bfloat16), "b1": b1.reshape(1, -1).astype(jnp.float32),
        "w2": w2.T.astype(jnp.bfloat16), "b2": b2.reshape(1, -1).astype(jnp.float32),
        "ln1a": p["norm1"][0].reshape(1, -1), "ln1b": p["norm1"][1].reshape(1, -1),
        "ln2a": p["norm2"][0].reshape(1, -1), "ln2b": p["norm2"][1].reshape(1, -1),
    }


# ----------------------------------------------------------------------------
# Pure-JAX f32 reference (mirrors the PyTorch module in eval mode)
# ----------------------------------------------------------------------------
def sa_ref(p, y, mask, *, n_head, eps=1e-6):
    b, s, h = y.shape
    dh = h // n_head

    def linear(name, x):
        w, bias = p[name]
        return x @ w.T + bias

    def layer_norm(x, a, bb):
        n = x.shape[-1]
        mean = x.mean(-1, keepdims=True)
        var = jnp.sum((x - mean) ** 2, -1, keepdims=True) / (n - 1)
        return a * (x - mean) / (jnp.sqrt(var) + eps) + bb

    q = linear("linear_q", y).reshape(b, s, n_head, dh).transpose(0, 2, 1, 3)
    k = linear("linear_k", y).reshape(b, s, n_head, dh).transpose(0, 2, 1, 3)
    v = linear("linear_v", y).reshape(b, s, n_head, dh).transpose(0, 2, 1, 3)
    scores = jnp.einsum("bhqd,bhkd->bhqk", q, k) / math.sqrt(dh)
    scores = jnp.where(mask != 0, -1e9, scores)
    att = jax.nn.softmax(scores, axis=-1)
    atted = jnp.einsum("bhqk,bhkd->bhqd", att, v).transpose(0, 2, 1, 3).reshape(b, s, h)
    atted = linear("linear_merge", atted)

    y1 = layer_norm(y + atted, *p["norm1"])
    hmid = jnp.maximum(linear("ffn_fc", y1), 0.0)
    ff = linear("ffn_out", hmid)
    return layer_norm(y1 + ff, *p["norm2"])


# ----------------------------------------------------------------------------
if __name__ == "__main__":
    B, S, H, N_HEAD, FF_DIM = 2, 8, 64, 8, 256

    key = jax.random.PRNGKey(0)
    kp, ky, km = jax.random.split(key, 3)

    params = init_params(kp, H, FF_DIM)
    y = jax.random.normal(ky, (B, S, H), jnp.float32)
    # nonzero entries are masked (scores -> -1e9), same as masked_fill(mask, -1e9)
    y_mask = (jax.random.uniform(km, (B, 1, 1, S)) > 0.8).astype(jnp.int32)

    packed = pack_params(params, n_head=N_HEAD)
    out = sa_forward(packed, y, y_mask, n_head=N_HEAD)
    out = jax.block_until_ready(out)

    ref = sa_ref(params, y, y_mask, n_head=N_HEAD)
    # Tolerance covers bf16 MXU operands (f32 accumulation) + the EUP
    # approx-reciprocal in the softmax; reference is full f32.
    err = float(jnp.max(jnp.abs(out - ref)))
    assert jnp.allclose(out, ref, atol=6e-2, rtol=6e-2), err

    print("KERNEL_OK")
</pallas_src>

<mosaic_0001>
module attributes {stable_mosaic.version = 11 : i64} {
  func.func @_sa_kernel(%arg0: i32, %arg1: memref<2x8x64xf32, #tpu.memory_space<vmem>>, %arg2: memref<2x1x8xi32, #tpu.memory_space<vmem>>, %arg3: memref<64x192xbf16, #tpu.memory_space<vmem>>, %arg4: memref<1x192xf32, #tpu.memory_space<vmem>>, %arg5: memref<64x64xbf16, #tpu.memory_space<vmem>>, %arg6: memref<1x64xf32, #tpu.memory_space<vmem>>, %arg7: memref<64x256xbf16, #tpu.memory_space<vmem>>, %arg8: memref<1x256xf32, #tpu.memory_space<vmem>>, %arg9: memref<256x64xbf16, #tpu.memory_space<vmem>>, %arg10: memref<1x64xf32, #tpu.memory_space<vmem>>, %arg11: memref<1x64xf32, #tpu.memory_space<vmem>>, %arg12: memref<1x64xf32, #tpu.memory_space<vmem>>, %arg13: memref<1x64xf32, #tpu.memory_space<vmem>>, %arg14: memref<1x64xf32, #tpu.memory_space<vmem>>, %arg15: memref<2x8x64xf32, #tpu.memory_space<vmem>>) attributes {dimension_semantics = [#tpu.dimension_semantics<parallel>], iteration_bounds = array<i64: 1>, scalar_prefetch = 0 : i64, scratch_operands = 0 : i64, tpu.core_type = #tpu.core_type<tc>, window_params = [{transform_indices = @transform_0, window_bounds = array<i64: 2, 8, 64>}, {transform_indices = @transform_1, window_bounds = array<i64: 2, 1, 8>}, {pipeline_mode = #tpu.pipeline_mode<synchronous>, transform_indices = @transform_2, window_bounds = array<i64: 64, 192>}, {pipeline_mode = #tpu.pipeline_mode<synchronous>, transform_indices = @transform_3, window_bounds = array<i64: 1, 192>}, {pipeline_mode = #tpu.pipeline_mode<synchronous>, transform_indices = @transform_4, window_bounds = array<i64: 64, 64>}, {pipeline_mode = #tpu.pipeline_mode<synchronous>, transform_indices = @transform_5, window_bounds = array<i64: 1, 64>}, {pipeline_mode = #tpu.pipeline_mode<synchronous>, transform_indices = @transform_6, window_bounds = array<i64: 64, 256>}, {pipeline_mode = #tpu.pipeline_mode<synchronous>, transform_indices = @transform_7, window_bounds = array<i64: 1, 256>}, {pipeline_mode = #tpu.pipeline_mode<synchronous>, transform_indices = @transform_8, window_bounds = array<i64: 256, 64>}, {pipeline_mode = #tpu.pipeline_mode<synchronous>, transform_indices = @transform_9, window_bounds = array<i64: 1, 64>}, {pipeline_mode = #tpu.pipeline_mode<synchronous>, transform_indices = @transform_10, window_bounds = array<i64: 1, 64>}, {pipeline_mode = #tpu.pipeline_mode<synchronous>, transform_indices = @transform_11, window_bounds = array<i64: 1, 64>}, {pipeline_mode = #tpu.pipeline_mode<synchronous>, transform_indices = @transform_12, window_bounds = array<i64: 1, 64>}, {pipeline_mode = #tpu.pipeline_mode<synchronous>, transform_indices = @transform_13, window_bounds = array<i64: 1, 64>}, {transform_indices = @transform_14, window_bounds = array<i64: 2, 8, 64>}]} {
    %c0 = arith.constant 0 : index
    %c0_0 = arith.constant 0 : index
    %c0_1 = arith.constant 0 : index
    %0 = vector.load %arg1[%c0, %c0_0, %c0_1] : memref<2x8x64xf32, #tpu.memory_space<vmem>>, vector<2x8x64xf32>
    %1 = vector.shape_cast %0 : vector<2x8x64xf32> to vector<16x64xf32>
    %2 = arith.truncf %1 : vector<16x64xf32> to vector<16x64xbf16>
    %c0_2 = arith.constant 0 : index
    %c0_3 = arith.constant 0 : index
    %3 = vector.load %arg3[%c0_2, %c0_3] : memref<64x192xbf16, #tpu.memory_space<vmem>>, vector<64x192xbf16>
    %cst = arith.constant dense<0.000000e+00> : vector<16x192xf32>
    %4 = tpu.matmul %2, %3, %cst {dimension_numbers = #tpu.dot_dimension_numbers<[1], [0], [0], [1], [0, 0, 1, 1], [], []>} : vector<16x64xbf16>, vector<64x192xbf16>, vector<16x192xf32> -> vector<16x192xf32>
    %c0_4 = arith.constant 0 : index
    %c0_5 = arith.constant 0 : index
    %5 = vector.load %arg4[%c0_4, %c0_5] : memref<1x192xf32, #tpu.memory_space<vmem>>, vector<1x192xf32>
    %6 = vector.broadcast %5 : vector<1x192xf32> to vector<16x192xf32>
    %7 = arith.addf %4, %6 : vector<16x192xf32>
    %c0_6 = arith.constant 0 : index
    %c0_7 = arith.constant 0 : index
    %c0_8 = arith.constant 0 : index
    %8 = vector.load %arg2[%c0_6, %c0_7, %c0_8] : memref<2x1x8xi32, #tpu.memory_space<vmem>>, vector<2x1x8xi32>
    %c0_i32 = arith.constant 0 : i32
    %9 = vector.broadcast %c0_i32 : i32 to vector<2x1x8xi32>
    %10 = arith.cmpi ne, %8, %9 : vector<2x1x8xi32>
    %cst_9 = arith.constant -1.000000e+09 : f32
    %cst_10 = arith.constant 0.000000e+00 : f32
    %11 = vector.broadcast %cst_9 : f32 to vector<2x1x8xf32>
    %12 = vector.broadcast %cst_10 : f32 to vector<2x1x8xf32>
    %13 = arith.select %10, %11, %12 : vector<2x1x8xi1>, vector<2x1x8xf32>
    %cst_11 = arith.constant 0.000000e+00 : f32
    %14 = vector.broadcast %cst_11 : f32 to vector<16x64xf32>
    %15 = vector.extract_strided_slice %7 {offsets = [0, 0], sizes = [16, 8], strides = [1, 1]} : vector<16x192xf32> to vector<16x8xf32>
    %16 = vector.shape_cast %15 : vector<16x8xf32> to vector<2x8x8xf32>
    %17 = arith.truncf %16 : vector<2x8x8xf32> to vector<2x8x8xbf16>
    %18 = vector.extract_strided_slice %7 {offsets = [0, 64], sizes = [16, 8], strides = [1, 1]} : vector<16x192xf32> to vector<16x8xf32>
    %19 = vector.shape_cast %18 : vector<16x8xf32> to vector<2x8x8xf32>
    %20 = arith.truncf %19 : vector<2x8x8xf32> to vector<2x8x8xbf16>
    %21 = vector.extract_strided_slice %7 {offsets = [0, 128], sizes = [16, 8], strides = [1, 1]} : vector<16x192xf32> to vector<16x8xf32>
    %22 = vector.shape_cast %21 : vector<16x8xf32> to vector<2x8x8xf32>
    %23 = arith.truncf %22 : vector<2x8x8xf32> to vector<2x8x8xbf16>
    "tpu.trace_start"() <{level = 10 : i32, message = "bqd,bkd->bqk"}> : () -> ()
    %cst_12 = arith.constant dense<0.000000e+00> : vector<2x8x8xf32>
    %24 = tpu.matmul %17, %20, %cst_12 {dimension_numbers = #tpu.dot_dimension_numbers<[2], [2], [1], [1], [0, 0, 0, 1, 1, 1], [0], [0]>} : vector<2x8x8xbf16>, vector<2x8x8xbf16>, vector<2x8x8xf32> -> vector<2x8x8xf32>
    "tpu.trace_stop"() : () -> ()
    %25 = vector.broadcast %13 : vector<2x1x8xf32> to vector<2x8x8xf32>
    %26 = arith.addf %24, %25 : vector<2x8x8xf32>
    %cst_13 = arith.constant dense<0xFF800000> : vector<2x8xf32>
    %27 = vector.multi_reduction <maximumf>, %26, %cst_13 [2] : vector<2x8x8xf32> to vector<2x8xf32>
    %28 = vector.shape_cast %27 : vector<2x8xf32> to vector<2x8x1xf32>
    %29 = vector.broadcast %28 : vector<2x8x1xf32> to vector<2x8x8xf32>
    %30 = arith.subf %26, %29 : vector<2x8x8xf32>
    %31 = math.exp %30 : vector<2x8x8xf32>
    %cst_14 = arith.constant dense<0.000000e+00> : vector<2x8xf32>
    %32 = vector.multi_reduction <add>, %31, %cst_14 [2] : vector<2x8x8xf32> to vector<2x8xf32>
    %33 = vector.shape_cast %32 : vector<2x8xf32> to vector<2x8x1xf32>
    %34 = tpu.reciprocal %33 {approx = true} : vector<2x8x1xf32> -> vector<2x8x1xf32>
    %35 = vector.broadcast %34 : vector<2x8x1xf32> to vector<2x8x8xf32>
    %36 = arith.mulf %31, %35 : vector<2x8x8xf32>
    %37 = arith.truncf %36 : vector<2x8x8xf32> to vector<2x8x8xbf16>
    "tpu.trace_start"() <{level = 10 : i32, message = "bqk,bkd->bqd"}> : () -> ()
    %cst_15 = arith.constant dense<0.000000e+00> : vector<2x8x8xf32>
    %38 = tpu.matmul %37, %23, %cst_15 {dimension_numbers = #tpu.dot_dimension_numbers<[2], [1], [1], [2], [0, 0, 0, 1, 1, 2], [0], [0]>} : vector<2x8x8xbf16>, vector<2x8x8xbf16>, vector<2x8x8xf32> -> vector<2x8x8xf32>
    "tpu.trace_stop"() : () -> ()
    %39 = vector.shape_cast %38 : vector<2x8x8xf32> to vector<16x8xf32>
    %40 = arith.truncf %39 : vector<16x8xf32> to vector<16x8xbf16>
    %c0_16 = arith.constant 0 : index
    %c0_17 = arith.constant 0 : index
    %41 = vector.load %arg5[%c0_16, %c0_17] : memref<64x64xbf16, #tpu.memory_space<vmem>>, vector<8x64xbf16>
    %cst_18 = arith.constant dense<0.000000e+00> : vector<16x64xf32>
    %42 = tpu.matmul %40, %41, %cst_18 {dimension_numbers = #tpu.dot_dimension_numbers<[1], [0], [0], [1], [0, 0, 1, 1], [], []>} : vector<16x8xbf16>, vector<8x64xbf16>, vector<16x64xf32> -> vector<16x64xf32>
    %43 = arith.addf %14, %42 : vector<16x64xf32>
    %44 = vector.extract_strided_slice %7 {offsets = [0, 8], sizes = [16, 8], strides = [1, 1]} : vector<16x192xf32> to vector<16x8xf32>
    %45 = vector.shape_cast %44 : vector<16x8xf32> to vector<2x8x8xf32>
    %46 = arith.truncf %45 : vector<2x8x8xf32> to vector<2x8x8xbf16>
    %47 = vector.extract_strided_slice %7 {offsets = [0, 72], sizes = [16, 8], strides = [1, 1]} : vector<16x192xf32> to vector<16x8xf32>
    %48 = vector.shape_cast %47 : vector<16x8xf32> to vector<2x8x8xf32>
    %49 = arith.truncf %48 : vector<2x8x8xf32> to vector<2x8x8xbf16>
    %50 = vector.extract_strided_slice %7 {offsets = [0, 136], sizes = [16, 8], strides = [1, 1]} : vector<16x192xf32> to vector<16x8xf32>
    %51 = vector.shape_cast %50 : vector<16x8xf32> to vector<2x8x8xf32>
    %52 = arith.truncf %51 : vector<2x8x8xf32> to vector<2x8x8xbf16>
    "tpu.trace_start"() <{level = 10 : i32, message = "bqd,bkd->bqk"}> : () -> ()
    %cst_19 = arith.constant dense<0.000000e+00> : vector<2x8x8xf32>
    %53 = tpu.matmul %46, %49, %cst_19 {dimension_numbers = #tpu.dot_dimension_numbers<[2], [2], [1], [1], [0, 0, 0, 1, 1, 1], [0], [0]>} : vector<2x8x8xbf16>, vector<2x8x8xbf16>, vector<2x8x8xf32> -> vector<2x8x8xf32>
    "tpu.trace_stop"() : () -> ()
    %54 = vector.broadcast %13 : vector<2x1x8xf32> to vector<2x8x8xf32>
    %55 = arith.addf %53, %54 : vector<2x8x8xf32>
    %cst_20 = arith.constant dense<0xFF800000> : vector<2x8xf32>
    %56 = vector.multi_reduction <maximumf>, %55, %cst_20 [2] : vector<2x8x8xf32> to vector<2x8xf32>
    %57 = vector.shape_cast %56 : vector<2x8xf32> to vector<2x8x1xf32>
    %58 = vector.broadcast %57 : vector<2x8x1xf32> to vector<2x8x8xf32>
    %59 = arith.subf %55, %58 : vector<2x8x8xf32>
    %60 = math.exp %59 : vector<2x8x8xf32>
    %cst_21 = arith.constant dense<0.000000e+00> : vector<2x8xf32>
    %61 = vector.multi_reduction <add>, %60, %cst_21 [2] : vector<2x8x8xf32> to vector<2x8xf32>
    %62 = vector.shape_cast %61 : vector<2x8xf32> to vector<2x8x1xf32>
    %63 = tpu.reciprocal %62 {approx = true} : vector<2x8x1xf32> -> vector<2x8x1xf32>
    %64 = vector.broadcast %63 : vector<2x8x1xf32> to vector<2x8x8xf32>
    %65 = arith.mulf %60, %64 : vector<2x8x8xf32>
    %66 = arith.truncf %65 : vector<2x8x8xf32> to vector<2x8x8xbf16>
    "tpu.trace_start"() <{level = 10 : i32, message = "bqk,bkd->bqd"}> : () -> ()
    %cst_22 = arith.constant dense<0.000000e+00> : vector<2x8x8xf32>
    %67 = tpu.matmul %66, %52, %cst_22 {dimension_numbers = #tpu.dot_dimension_numbers<[2], [1], [1], [2], [0, 0, 0, 1, 1, 2], [0], [0]>} : vector<2x8x8xbf16>, vector<2x8x8xbf16>, vector<2x8x8xf32> -> vector<2x8x8xf32>
    "tpu.trace_stop"() : () -> ()
    %68 = vector.shape_cast %67 : vector<2x8x8xf32> to vector<16x8xf32>
    %69 = arith.truncf %68 : vector<16x8xf32> to vector<16x8xbf16>
    %c8 = arith.constant 8 : index
    %c0_23 = arith.constant 0 : index
    %70 = vector.load %arg5[%c8, %c0_23] : memref<64x64xbf16, #tpu.memory_space<vmem>>, vector<8x64xbf16>
    %cst_24 = arith.constant dense<0.000000e+00> : vector<16x64xf32>
    %71 = tpu.matmul %69, %70, %cst_24 {dimension_numbers = #tpu.dot_dimension_numbers<[1], [0], [0], [1], [0, 0, 1, 1], [], []>} : vector<16x8xbf16>, vector<8x64xbf16>, vector<16x64xf32> -> vector<16x64xf32>
    %72 = arith.addf %43, %71 : vector<16x64xf32>
    %73 = vector.extract_strided_slice %7 {offsets = [0, 16], sizes = [16, 8], strides = [1, 1]} : vector<16x192xf32> to vector<16x8xf32>
    %74 = vector.shape_cast %73 : vector<16x8xf32> to vector<2x8x8xf32>
    %75 = arith.truncf %74 : vector<2x8x8xf32> to vector<2x8x8xbf16>
    %76 = vector.extract_strided_slice %7 {offsets = [0, 80], sizes = [16, 8], strides = [1, 1]} : vector<16x192xf32> to vector<16x8xf32>
    %77 = vector.shape_cast %76 : vector<16x8xf32> to vector<2x8x8xf32>
    %78 = arith.truncf %77 : vector<2x8x8xf32> to vector<2x8x8xbf16>
    %79 = vector.extract_strided_slice %7 {offsets = [0, 144], sizes = [16, 8], strides = [1, 1]} : vector<16x192xf32> to vector<16x8xf32>
    %80 = vector.shape_cast %79 : vector<16x8xf32> to vector<2x8x8xf32>
    %81 = arith.truncf %80 : vector<2x8x8xf32> to vector<2x8x8xbf16>
    "tpu.trace_start"() <{level = 10 : i32, message = "bqd,bkd->bqk"}> : () -> ()
    %cst_25 = arith.constant dense<0.000000e+00> : vector<2x8x8xf32>
    %82 = tpu.matmul %75, %78, %cst_25 {dimension_numbers = #tpu.dot_dimension_numbers<[2], [2], [1], [1], [0, 0, 0, 1, 1, 1], [0], [0]>} : vector<2x8x8xbf16>, vector<2x8x8xbf16>, vector<2x8x8xf32> -> vector<2x8x8xf32>
    "tpu.trace_stop"() : () -> ()
    %83 = vector.broadcast %13 : vector<2x1x8xf32> to vector<2x8x8xf32>
    %84 = arith.addf %82, %83 : vector<2x8x8xf32>
    %cst_26 = arith.constant dense<0xFF800000> : vector<2x8xf32>
    %85 = vector.multi_reduction <maximumf>, %84, %cst_26 [2] : vector<2x8x8xf32> to vector<2x8xf32>
    %86 = vector.shape_cast %85 : vector<2x8xf32> to vector<2x8x1xf32>
    %87 = vector.broadcast %86 : vector<2x8x1xf32> to vector<2x8x8xf32>
    %88 = arith.subf %84, %87 : vector<2x8x8xf32>
    %89 = math.exp %88 : vector<2x8x8xf32>
    %cst_27 = arith.constant dense<0.000000e+00> : vector<2x8xf32>
    %90 = vector.multi_reduction <add>, %89, %cst_27 [2] : vector<2x8x8xf32> to vector<2x8xf32>
    %91 = vector.shape_cast %90 : vector<2x8xf32> to vector<2x8x1xf32>
    %92 = tpu.reciprocal %91 {approx = true} : vector<2x8x1xf32> -> vector<2x8x1xf32>
    %93 = vector.broadcast %92 : vector<2x8x1xf32> to vector<2x8x8xf32>
    %94 = arith.mulf %89, %93 : vector<2x8x8xf32>
    %95 = arith.truncf %94 : vector<2x8x8xf32> to vector<2x8x8xbf16>
    "tpu.trace_start"() <{level = 10 : i32, message = "bqk,bkd->bqd"}> : () -> ()
    %cst_28 = arith.constant dense<0.000000e+00> : vector<2x8x8xf32>
    %96 = tpu.matmul %95, %81, %cst_28 {dimension_numbers = #tpu.dot_dimension_numbers<[2], [1], [1], [2], [0, 0, 0, 1, 1, 2], [0], [0]>} : vector<2x8x8xbf16>, vector<2x8x8xbf16>, vector<2x8x8xf32> -> vector<2x8x8xf32>
    "tpu.trace_stop"() : () -> ()
    %97 = vector.shape_cast %96 : vector<2x8x8xf32> to vector<16x8xf32>
    %98 = arith.truncf %97 : vector<16x8xf32> to vector<16x8xbf16>
    %c16 = arith.constant 16 : index
    %c0_29 = arith.constant 0 : index
    %99 = vector.load %arg5[%c16, %c0_29] : memref<64x64xbf16, #tpu.memory_space<vmem>>, vector<8x64xbf16>
    %cst_30 = arith.constant dense<0.000000e+00> : vector<16x64xf32>
    %100 = tpu.matmul %98, %99, %cst_30 {dimension_numbers = #tpu.dot_dimension_numbers<[1], [0], [0], [1], [0, 0, 1, 1], [], []>} : vector<16x8xbf16>, vector<8x64xbf16>, vector<16x64xf32> -> vector<16x64xf32>
    %101 = arith.addf %72, %100 : vector<16x64xf32>
    %102 = vector.extract_strided_slice %7 {offsets = [0, 24], sizes = [16, 8], strides = [1, 1]} : vector<16x192xf32> to vector<16x8xf32>
    %103 = vector.shape_cast %102 : vector<16x8xf32> to vector<2x8x8xf32>
    %104 = arith.truncf %103 : vector<2x8x8xf32> to vector<2x8x8xbf16>
    %105 = vector.extract_strided_slice %7 {offsets = [0, 88], sizes = [16, 8], strides = [1, 1]} : vector<16x192xf32> to vector<16x8xf32>
    %106 = vector.shape_cast %105 : vector<16x8xf32> to vector<2x8x8xf32>
    %107 = arith.truncf %106 : vector<2x8x8xf32> to vector<2x8x8xbf16>
    %108 = vector.extract_strided_slice %7 {offsets = [0, 152], sizes = [16, 8], strides = [1, 1]} : vector<16x192xf32> to vector<16x8xf32>
    %109 = vector.shape_cast %108 : vector<16x8xf32> to vector<2x8x8xf32>
    %110 = arith.truncf %109 : vector<2x8x8xf32> to vector<2x8x8xbf16>
    "tpu.trace_start"() <{level = 10 : i32, message = "bqd,bkd->bqk"}> : () -> ()
    %cst_31 = arith.constant dense<0.000000e+00> : vector<2x8x8xf32>
    %111 = tpu.matmul %104, %107, %cst_31 {dimension_numbers = #tpu.dot_dimension_numbers<[2], [2], [1], [1], [0, 0, 0, 1, 1, 1], [0], [0]>} : vector<2x8x8xbf16>, vector<2x8x8xbf16>, vector<2x8x8xf32> -> vector<2x8x8xf32>
    "tpu.trace_stop"() : () -> ()
    %112 = vector.broadcast %13 : vector<2x1x8xf32> to vector<2x8x8xf32>
    %113 = arith.addf %111, %112 : vector<2x8x8xf32>
    %cst_32 = arith.constant dense<0xFF800000> : vector<2x8xf32>
    %114 = vector.multi_reduction <maximumf>, %113, %cst_32 [2] : vector<2x8x8xf32> to vector<2x8xf32>
    %115 = vector.shape_cast %114 : vector<2x8xf32> to vector<2x8x1xf32>
    %116 = vector.broadcast %115 : vector<2x8x1xf32> to vector<2x8x8xf32>
    %117 = arith.subf %113, %116 : vector<2x8x8xf32>
    %118 = math.exp %117 : vector<2x8x8xf32>
    %cst_33 = arith.constant dense<0.000000e+00> : vector<2x8xf32>
    %119 = vector.multi_reduction <add>, %118, %cst_33 [2] : vector<2x8x8xf32> to vector<2x8xf32>
    %120 = vector.shape_cast %119 : vector<2x8xf32> to vector<2x8x1xf32>
    %121 = tpu.reciprocal %120 {approx = true} : vector<2x8x1xf32> -> vector<2x8x1xf32>
    %122 = vector.broadcast %121 : vector<2x8x1xf32> to vector<2x8x8xf32>
    %123 = arith.mulf %118, %122 : vector<2x8x8xf32>
    %124 = arith.truncf %123 : vector<2x8x8xf32> to vector<2x8x8xbf16>
    "tpu.trace_start"() <{level = 10 : i32, message = "bqk,bkd->bqd"}> : () -> ()
    %cst_34 = arith.constant dense<0.000000e+00> : vector<2x8x8xf32>
    %125 = tpu.matmul %124, %110, %cst_34 {dimension_numbers = #tpu.dot_dimension_numbers<[2], [1], [1], [2], [0, 0, 0, 1, 1, 2], [0], [0]>} : vector<2x8x8xbf16>, vector<2x8x8xbf16>, vector<2x8x8xf32> -> vector<2x8x8xf32>
    "tpu.trace_stop"() : () -> ()
    %126 = vector.shape_cast %125 : vector<2x8x8xf32> to vector<16x8xf32>
    %127 = arith.truncf %126 : vector<16x8xf32> to vector<16x8xbf16>
    %c24 = arith.constant 24 : index
    %c0_35 = arith.constant 0 : index
    %128 = vector.load %arg5[%c24, %c0_35] : memref<64x64xbf16, #tpu.memory_space<vmem>>, vector<8x64xbf16>
    %cst_36 = arith.constant dense<0.000000e+00> : vector<16x64xf32>
    %129 = tpu.matmul %127, %128, %cst_36 {dimension_numbers = #tpu.dot_dimension_numbers<[1], [0], [0], [1], [0, 0, 1, 1], [], []>} : vector<16x8xbf16>, vector<8x64xbf16>, vector<16x64xf32> -> vector<16x64xf32>
    %130 = arith.addf %101, %129 : vector<16x64xf32>
    %131 = vector.extract_strided_slice %7 {offsets = [0, 32], sizes = [16, 8], strides = [1, 1]} : vector<16x192xf32> to vector<16x8xf32>
    %132 = vector.shape_cast %131 : vector<16x8xf32> to vector<2x8x8xf32>
    %133 = arith.truncf %132 : vector<2x8x8xf32> to vector<2x8x8xbf16>
    %134 = vector.extract_strided_slice %7 {offsets = [0, 96], sizes = [16, 8], strides = [1, 1]} : vector<16x192xf32> to vector<16x8xf32>
    %135 = vector.shape_cast %134 : vector<16x8xf32> to vector<2x8x8xf32>
    %136 = arith.truncf %135 : vector<2x8x8xf32> to vector<2x8x8xbf16>
    %137 = vector.extract_strided_slice %7 {offsets = [0, 160], sizes = [16, 8], strides = [1, 1]} : vector<16x192xf32> to vector<16x8xf32>
    %138 = vector.shape_cast %137 : vector<16x8xf32> to vector<2x8x8xf32>
    %139 = arith.truncf %138 : vector<2x8x8xf32> to vector<2x8x8xbf16>
    "tpu.trace_start"() <{level = 10 : i32, message = "bqd,bkd->bqk"}> : () -> ()
    %cst_37 = arith.constant dense<0.000000e+00> : vector<2x8x8xf32>
    %140 = tpu.matmul %133, %136, %cst_37 {dimension_numbers = #tpu.dot_dimension_numbers<[2], [2], [1], [1], [0, 0, 0, 1, 1, 1], [0], [0]>} : vector<2x8x8xbf16>, vector<2x8x8xbf16>, vector<2x8x8xf32> -> vector<2x8x8xf32>
    "tpu.trace_stop"() : () -> ()
    %141 = vector.broadcast %13 : vector<2x1x8xf32> to vector<2x8x8xf32>
    %142 = arith.addf %140, %141 : vector<2x8x8xf32>
    %cst_38 = arith.constant dense<0xFF800000> : vector<2x8xf32>
    %143 = vector.multi_reduction <maximumf>, %142, %cst_38 [2] : vector<2x8x8xf32> to vector<2x8xf32>
    %144 = vector.shape_cast %143 : vector<2x8xf32> to vector<2x8x1xf32>
    %145 = vector.broadcast %144 : vector<2x8x1xf32> to vector<2x8x8xf32>
    %146 = arith.subf %142, %145 : vector<2x8x8xf32>
    %147 = math.exp %146 : vector<2x8x8xf32>
    %cst_39 = arith.constant dense<0.000000e+00> : vector<2x8xf32>
    %148 = vector.multi_reduction <add>, %147, %cst_39 [2] : vector<2x8x8xf32> to vector<2x8xf32>
    %149 = vector.shape_cast %148 : vector<2x8xf32> to vector<2x8x1xf32>
    %150 = tpu.reciprocal %149 {approx = true} : vector<2x8x1xf32> -> vector<2x8x1xf32>
    %151 = vector.broadcast %150 : vector<2x8x1xf32> to vector<2x8x8xf32>
    %152 = arith.mulf %147, %151 : vector<2x8x8xf32>
    %153 = arith.truncf %152 : vector<2x8x8xf32> to vector<2x8x8xbf16>
    "tpu.trace_start"() <{level = 10 : i32, message = "bqk,bkd->bqd"}> : () -> ()
    %cst_40 = arith.constant dense<0.000000e+00> : vector<2x8x8xf32>
    %154 = tpu.matmul %153, %139, %cst_40 {dimension_numbers = #tpu.dot_dimension_numbers<[2], [1], [1], [2], [0, 0, 0, 1, 1, 2], [0], [0]>} : vector<2x8x8xbf16>, vector<2x8x8xbf16>, vector<2x8x8xf32> -> vector<2x8x8xf32>
    "tpu.trace_stop"() : () -> ()
    %155 = vector.shape_cast %154 : vector<2x8x8xf32> to vector<16x8xf32>
    %156 = arith.truncf %155 : vector<16x8xf32> to vector<16x8xbf16>
    %c32 = arith.constant 32 : index
    %c0_41 = arith.constant 0 : index
    %157 = vector.load %arg5[%c32, %c0_41] : memref<64x64xbf16, #tpu.memory_space<vmem>>, vector<8x64xbf16>
    %cst_42 = arith.constant dense<0.000000e+00> : vector<16x64xf32>
    %158 = tpu.matmul %156, %157, %cst_42 {dimension_numbers = #tpu.dot_dimension_numbers<[1], [0], [0], [1], [0, 0, 1, 1], [], []>} : vector<16x8xbf16>, vector<8x64xbf16>, vector<16x64xf32> -> vector<16x64xf32>
    %159 = arith.addf %130, %158 : vector<16x64xf32>
    %160 = vector.extract_strided_slice %7 {offsets = [0, 40], sizes = [16, 8], strides = [1, 1]} : vector<16x192xf32> to vector<16x8xf32>
    %161 = vector.shape_cast %160 : vector<16x8xf32> to vector<2x8x8xf32>
    %162 = arith.truncf %161 : vector<2x8x8xf32> to vector<2x8x8xbf16>
    %163 = vector.extract_strided_slice %7 {offsets = [0, 104], sizes = [16, 8], strides = [1, 1]} : vector<16x192xf32> to vector<16x8xf32>
    %164 = vector.shape_cast %163 : vector<16x8xf32> to vector<2x8x8xf32>
    %165 = arith.truncf %164 : vector<2x8x8xf32> to vector<2x8x8xbf16>
    %166 = vector.extract_strided_slice %7 {offsets = [0, 168], sizes = [16, 8], strides = [1, 1]} : vector<16x192xf32> to vector<16x8xf32>
    %167 = vector.shape_cast %166 : vector<16x8xf32> to vector<2x8x8xf32>
    %168 = arith.truncf %167 : vector<2x8x8xf32> to vector<2x8x8xbf16>
    "tpu.trace_start"() <{level = 10 : i32, message = "bqd,bkd->bqk"}> : () -> ()
    %cst_43 = arith.constant dense<0.000000e+00> : vector<2x8x8xf32>
    %169 = tpu.matmul %162, %165, %cst_43 {dimension_numbers = #tpu.dot_dimension_numbers<[2], [2], [1], [1], [0, 0, 0, 1, 1, 1], [0], [0]>} : vector<2x8x8xbf16>, vector<2x8x8xbf16>, vector<2x8x8xf32> -> vector<2x8x8xf32>
    "tpu.trace_stop"() : () -> ()
    %170 = vector.broadcast %13 : vector<2x1x8xf32> to vector<2x8x8xf32>
    %171 = arith.addf %169, %170 : vector<2x8x8xf32>
    %cst_44 = arith.constant dense<0xFF800000> : vector<2x8xf32>
    %172 = vector.multi_reduction <maximumf>, %171, %cst_44 [2] : vector<2x8x8xf32> to vector<2x8xf32>
    %173 = vector.shape_cast %172 : vector<2x8xf32> to vector<2x8x1xf32>
    %174 = vector.broadcast %173 : vector<2x8x1xf32> to vector<2x8x8xf32>
    %175 = arith.subf %171, %174 : vector<2x8x8xf32>
    %176 = math.exp %175 : vector<2x8x8xf32>
    %cst_45 = arith.constant dense<0.000000e+00> : vector<2x8xf32>
    %177 = vector.multi_reduction <add>, %176, %cst_45 [2] : vector<2x8x8xf32> to vector<2x8xf32>
    %178 = vector.shape_cast %177 : vector<2x8xf32> to vector<2x8x1xf32>
    %179 = tpu.reciprocal %178 {approx = true} : vector<2x8x1xf32> -> vector<2x8x1xf32>
    %180 = vector.broadcast %179 : vector<2x8x1xf32> to vector<2x8x8xf32>
    %181 = arith.mulf %176, %180 : vector<2x8x8xf32>
    %182 = arith.truncf %181 : vector<2x8x8xf32> to vector<2x8x8xbf16>
    "tpu.trace_start"() <{level = 10 : i32, message = "bqk,bkd->bqd"}> : () -> ()
    %cst_46 = arith.constant dense<0.000000e+00> : vector<2x8x8xf32>
    %183 = tpu.matmul %182, %168, %cst_46 {dimension_numbers = #tpu.dot_dimension_numbers<[2], [1], [1], [2], [0, 0, 0, 1, 1, 2], [0], [0]>} : vector<2x8x8xbf16>, vector<2x8x8xbf16>, vector<2x8x8xf32> -> vector<2x8x8xf32>
    "tpu.trace_stop"() : () -> ()
    %184 = vector.shape_cast %183 : vector<2x8x8xf32> to vector<16x8xf32>
    %185 = arith.truncf %184 : vector<16x8xf32> to vector<16x8xbf16>
    %c40 = arith.constant 40 : index
    %c0_47 = arith.constant 0 : index
    %186 = vector.load %arg5[%c40, %c0_47] : memref<64x64xbf16, #tpu.memory_space<vmem>>, vector<8x64xbf16>
    %cst_48 = arith.constant dense<0.000000e+00> : vector<16x64xf32>
    %187 = tpu.matmul %185, %186, %cst_48 {dimension_numbers = #tpu.dot_dimension_numbers<[1], [0], [0], [1], [0, 0, 1, 1], [], []>} : vector<16x8xbf16>, vector<8x64xbf16>, vector<16x64xf32> -> vector<16x64xf32>
    %188 = arith.addf %159, %187 : vector<16x64xf32>
    %189 = vector.extract_strided_slice %7 {offsets = [0, 48], sizes = [16, 8], strides = [1, 1]} : vector<16x192xf32> to vector<16x8xf32>
    %190 = vector.shape_cast %189 : vector<16x8xf32> to vector<2x8x8xf32>
    %191 = arith.truncf %190 : vector<2x8x8xf32> to vector<2x8x8xbf16>
    %192 = vector.extract_strided_slice %7 {offsets = [0, 112], sizes = [16, 8], strides = [1, 1]} : vector<16x192xf32> to vector<16x8xf32>
    %193 = vector.shape_cast %192 : vector<16x8xf32> to vector<2x8x8xf32>
    %194 = arith.truncf %193 : vector<2x8x8xf32> to vector<2x8x8xbf16>
    %195 = vector.extract_strided_slice %7 {offsets = [0, 176], sizes = [16, 8], strides = [1, 1]} : vector<16x192xf32> to vector<16x8xf32>
    %196 = vector.shape_cast %195 : vector<16x8xf32> to vector<2x8x8xf32>
    %197 = arith.truncf %196 : vector<2x8x8xf32> to vector<2x8x8xbf16>
    "tpu.trace_start"() <{level = 10 : i32, message = "bqd,bkd->bqk"}> : () -> ()
    %cst_49 = arith.constant dense<0.000000e+00> : vector<2x8x8xf32>
    %198 = tpu.matmul %191, %194, %cst_49 {dimension_numbers = #tpu.dot_dimension_numbers<[2], [2], [1], [1], [0, 0, 0, 1, 1, 1], [0], [0]>} : vector<2x8x8xbf16>, vector<2x8x8xbf16>, vector<2x8x8xf32> -> vector<2x8x8xf32>
    "tpu.trace_stop"() : () -> ()
    %199 = vector.broadcast %13 : vector<2x1x8xf32> to vector<2x8x8xf32>
    %200 = arith.addf %198, %199 : vector<2x8x8xf32>
    %cst_50 = arith.constant dense<0xFF800000> : vector<2x8xf32>
    %201 = vector.multi_reduction <maximumf>, %200, %cst_50 [2] : vector<2x8x8xf32> to vector<2x8xf32>
    %202 = vector.shape_cast %201 : vector<2x8xf32> to vector<2x8x1xf32>
    %203 = vector.broadcast %202 : vector<2x8x1xf32> to vector<2x8x8xf32>
    %204 = arith.subf %200, %203 : vector<2x8x8xf32>
    %205 = math.exp %204 : vector<2x8x8xf32>
    %cst_51 = arith.constant dense<0.000000e+00> : vector<2x8xf32>
    %206 = vector.multi_reduction <add>, %205, %cst_51 [2] : vector<2x8x8xf32> to vector<2x8xf32>
    %207 = vector.shape_cast %206 : vector<2x8xf32> to vector<2x8x1xf32>
    %208 = tpu.reciprocal %207 {approx = true} : vector<2x8x1xf32> -> vector<2x8x1xf32>
    %209 = vector.broadcast %208 : vector<2x8x1xf32> to vector<2x8x8xf32>
    %210 = arith.mulf %205, %209 : vector<2x8x8xf32>
    %211 = arith.truncf %210 : vector<2x8x8xf32> to vector<2x8x8xbf16>
    "tpu.trace_start"() <{level = 10 : i32, message = "bqk,bkd->bqd"}> : () -> ()
    %cst_52 = arith.constant dense<0.000000e+00> : vector<2x8x8xf32>
    %212 = tpu.matmul %211, %197, %cst_52 {dimension_numbers = #tpu.dot_dimension_numbers<[2], [1], [1], [2], [0, 0, 0, 1, 1, 2], [0], [0]>} : vector<2x8x8xbf16>, vector<2x8x8xbf16>, vector<2x8x8xf32> -> vector<2x8x8xf32>
    "tpu.trace_stop"() : () -> ()
    %213 = vector.shape_cast %212 : vector<2x8x8xf32> to vector<16x8xf32>
    %214 = arith.truncf %213 : vector<16x8xf32> to vector<16x8xbf16>
    %c48 = arith.constant 48 : index
    %c0_53 = arith.constant 0 : index
    %215 = vector.load %arg5[%c48, %c0_53] : memref<64x64xbf16, #tpu.memory_space<vmem>>, vector<8x64xbf16>
    %cst_54 = arith.constant dense<0.000000e+00> : vector<16x64xf32>
    %216 = tpu.matmul %214, %215, %cst_54 {dimension_numbers = #tpu.dot_dimension_numbers<[1], [0], [0], [1], [0, 0, 1, 1], [], []>} : vector<16x8xbf16>, vector<8x64xbf16>, vector<16x64xf32> -> vector<16x64xf32>
    %217 = arith.addf %188, %216 : vector<16x64xf32>
    %218 = vector.extract_strided_slice %7 {offsets = [0, 56], sizes = [16, 8], strides = [1, 1]} : vector<16x192xf32> to vector<16x8xf32>
    %219 = vector.shape_cast %218 : vector<16x8xf32> to vector<2x8x8xf32>
    %220 = arith.truncf %219 : vector<2x8x8xf32> to vector<2x8x8xbf16>
    %221 = vector.extract_strided_slice %7 {offsets = [0, 120], sizes = [16, 8], strides = [1, 1]} : vector<16x192xf32> to vector<16x8xf32>
    %222 = vector.shape_cast %221 : vector<16x8xf32> to vector<2x8x8xf32>
    %223 = arith.truncf %222 : vector<2x8x8xf32> to vector<2x8x8xbf16>
    %224 = vector.extract_strided_slice %7 {offsets = [0, 184], sizes = [16, 8], strides = [1, 1]} : vector<16x192xf32> to vector<16x8xf32>
    %225 = vector.shape_cast %224 : vector<16x8xf32> to vector<2x8x8xf32>
    %226 = arith.truncf %225 : vector<2x8x8xf32> to vector<2x8x8xbf16>
    "tpu.trace_start"() <{level = 10 : i32, message = "bqd,bkd->bqk"}> : () -> ()
    %cst_55 = arith.constant dense<0.000000e+00> : vector<2x8x8xf32>
    %227 = tpu.matmul %220, %223, %cst_55 {dimension_numbers = #tpu.dot_dimension_numbers<[2], [2], [1], [1], [0, 0, 0, 1, 1, 1], [0], [0]>} : vector<2x8x8xbf16>, vector<2x8x8xbf16>, vector<2x8x8xf32> -> vector<2x8x8xf32>
    "tpu.trace_stop"() : () -> ()
    %228 = vector.broadcast %13 : vector<2x1x8xf32> to vector<2x8x8xf32>
    %229 = arith.addf %227, %228 : vector<2x8x8xf32>
    %cst_56 = arith.constant dense<0xFF800000> : vector<2x8xf32>
    %230 = vector.multi_reduction <maximumf>, %229, %cst_56 [2] : vector<2x8x8xf32> to vector<2x8xf32>
    %231 = vector.shape_cast %230 : vector<2x8xf32> to vector<2x8x1xf32>
    %232 = vector.broadcast %231 : vector<2x8x1xf32> to vector<2x8x8xf32>
    %233 = arith.subf %229, %232 : vector<2x8x8xf32>
    %234 = math.exp %233 : vector<2x8x8xf32>
    %cst_57 = arith.constant dense<0.000000e+00> : vector<2x8xf32>
    %235 = vector.multi_reduction <add>, %234, %cst_57 [2] : vector<2x8x8xf32> to vector<2x8xf32>
    %236 = vector.shape_cast %235 : vector<2x8xf32> to vector<2x8x1xf32>
    %237 = tpu.reciprocal %236 {approx = true} : vector<2x8x1xf32> -> vector<2x8x1xf32>
    %238 = vector.broadcast %237 : vector<2x8x1xf32> to vector<2x8x8xf32>
    %239 = arith.mulf %234, %238 : vector<2x8x8xf32>
    %240 = arith.truncf %239 : vector<2x8x8xf32> to vector<2x8x8xbf16>
    "tpu.trace_start"() <{level = 10 : i32, message = "bqk,bkd->bqd"}> : () -> ()
    %cst_58 = arith.constant dense<0.000000e+00> : vector<2x8x8xf32>
    %241 = tpu.matmul %240, %226, %cst_58 {dimension_numbers = #tpu.dot_dimension_numbers<[2], [1], [1], [2], [0, 0, 0, 1, 1, 2], [0], [0]>} : vector<2x8x8xbf16>, vector<2x8x8xbf16>, vector<2x8x8xf32> -> vector<2x8x8xf32>
    "tpu.trace_stop"() : () -> ()
    %242 = vector.shape_cast %241 : vector<2x8x8xf32> to vector<16x8xf32>
    %243 = arith.truncf %242 : vector<16x8xf32> to vector<16x8xbf16>
    %c56 = arith.constant 56 : index
    %c0_59 = arith.constant 0 : index
    %244 = vector.load %arg5[%c56, %c0_59] : memref<64x64xbf16, #tpu.memory_space<vmem>>, vector<8x64xbf16>
    %cst_60 = arith.constant dense<0.000000e+00> : vector<16x64xf32>
    %245 = tpu.matmul %243, %244, %cst_60 {dimension_numbers = #tpu.dot_dimension_numbers<[1], [0], [0], [1], [0, 0, 1, 1], [], []>} : vector<16x8xbf16>, vector<8x64xbf16>, vector<16x64xf32> -> vector<16x64xf32>
    %246 = arith.addf %217, %245 : vector<16x64xf32>
    %c0_61 = arith.constant 0 : index
    %c0_62 = arith.constant 0 : index
    %247 = vector.load %arg6[%c0_61, %c0_62] : memref<1x64xf32, #tpu.memory_space<vmem>>, vector<1x64xf32>
    %248 = vector.broadcast %247 : vector<1x64xf32> to vector<16x64xf32>
    %249 = arith.addf %246, %248 : vector<16x64xf32>
    %250 = arith.addf %1, %249 : vector<16x64xf32>
    %c0_63 = arith.constant 0 : index
    %c0_64 = arith.constant 0 : index
    %251 = vector.load %arg11[%c0_63, %c0_64] : memref<1x64xf32, #tpu.memory_space<vmem>>, vector<1x64xf32>
    %c0_65 = arith.constant 0 : index
    %c0_66 = arith.constant 0 : index
    %252 = vector.load %arg12[%c0_65, %c0_66] : memref<1x64xf32, #tpu.memory_space<vmem>>, vector<1x64xf32>
    %cst_67 = arith.constant dense<0.000000e+00> : vector<16xf32>
    %253 = vector.multi_reduction <add>, %250, %cst_67 [1] : vector<16x64xf32> to vector<16xf32>
    %254 = vector.shape_cast %253 : vector<16xf32> to vector<16x1xf32>
    %cst_68 = arith.constant 6.400000e+01 : f32
    %255 = vector.broadcast %cst_68 : f32 to vector<16x1xf32>
    %256 = arith.divf %254, %255 : vector<16x1xf32>
    %257 = vector.broadcast %256 : vector<16x1xf32> to vector<16x64xf32>
    %258 = arith.subf %250, %257 : vector<16x64xf32>
    %259 = arith.mulf %258, %258 : vector<16x64xf32>
    %cst_69 = arith.constant dense<0.000000e+00> : vector<16xf32>
    %260 = vector.multi_reduction <add>, %259, %cst_69 [1] : vector<16x64xf32> to vector<16xf32>
    %261 = vector.shape_cast %260 : vector<16xf32> to vector<16x1xf32>
    %cst_70 = arith.constant 0.0158730168 : f32
    %262 = vector.broadcast %cst_70 : f32 to vector<16x1xf32>
    %263 = arith.mulf %261, %262 : vector<16x1xf32>
    %264 = math.sqrt %263 : vector<16x1xf32>
    %cst_71 = arith.constant 9.99999997E-7 : f32
    %265 = vector.broadcast %cst_71 : f32 to vector<16x1xf32>
    %266 = arith.addf %264, %265 : vector<16x1xf32>
    %267 = vector.broadcast %266 : vector<16x1xf32> to vector<16x64xf32>
    %268 = arith.divf %258, %267 : vector<16x64xf32>
    %269 = vector.broadcast %251 : vector<1x64xf32> to vector<16x64xf32>
    %270 = arith.mulf %269, %268 : vector<16x64xf32>
    %271 = vector.broadcast %252 : vector<1x64xf32> to vector<16x64xf32>
    %272 = arith.addf %270, %271 : vector<16x64xf32>
    %273 = arith.truncf %272 : vector<16x64xf32> to vector<16x64xbf16>
    %c0_72 = arith.constant 0 : index
    %c0_73 = arith.constant 0 : index
    %274 = vector.load %arg7[%c0_72, %c0_73] : memref<64x256xbf16, #tpu.memory_space<vmem>>, vector<64x256xbf16>
    %cst_74 = arith.constant dense<0.000000e+00> : vector<16x256xf32>
    %275 = tpu.matmul %273, %274, %cst_74 {dimension_numbers = #tpu.dot_dimension_numbers<[1], [0], [0], [1], [0, 0, 1, 1], [], []>} : vector<16x64xbf16>, vector<64x256xbf16>, vector<16x256xf32> -> vector<16x256xf32>
    %c0_75 = arith.constant 0 : index
    %c0_76 = arith.constant 0 : index
    %276 = vector.load %arg8[%c0_75, %c0_76] : memref<1x256xf32, #tpu.memory_space<vmem>>, vector<1x256xf32>
    %277 = vector.broadcast %276 : vector<1x256xf32> to vector<16x256xf32>
    %278 = arith.addf %275, %277 : vector<16x256xf32>
    %cst_77 = arith.constant 0.000000e+00 : f32
    %279 = vector.broadcast %cst_77 : f32 to vector<16x256xf32>
    %280 = arith.maximumf %278, %279 : vector<16x256xf32>
    %281 = arith.truncf %280 : vector<16x256xf32> to vector<16x256xbf16>
    %c0_78 = arith.constant 0 : index
    %c0_79 = arith.constant 0 : index
    %282 = vector.load %arg9[%c0_78, %c0_79] : memref<256x64xbf16, #tpu.memory_space<vmem>>, vector<256x64xbf16>
    %cst_80 = arith.constant dense<0.000000e+00> : vector<16x64xf32>
    %283 = tpu.matmul %281, %282, %cst_80 {dimension_numbers = #tpu.dot_dimension_numbers<[1], [0], [0], [1], [0, 0, 1, 1], [], []>} : vector<16x256xbf16>, vector<256x64xbf16>, vector<16x64xf32> -> vector<16x64xf32>
    %c0_81 = arith.constant 0 : index
    %c0_82 = arith.constant 0 : index
    %284 = vector.load %arg10[%c0_81, %c0_82] : memref<1x64xf32, #tpu.memory_space<vmem>>, vector<1x64xf32>
    %285 = vector.broadcast %284 : vector<1x64xf32> to vector<16x64xf32>
    %286 = arith.addf %283, %285 : vector<16x64xf32>
    %287 = arith.addf %272, %286 : vector<16x64xf32>
    %c0_83 = arith.constant 0 : index
    %c0_84 = arith.constant 0 : index
    %288 = vector.load %arg13[%c0_83, %c0_84] : memref<1x64xf32, #tpu.memory_space<vmem>>, vector<1x64xf32>
    %c0_85 = arith.constant 0 : index
    %c0_86 = arith.constant 0 : index
    %289 = vector.load %arg14[%c0_85, %c0_86] : memref<1x64xf32, #tpu.memory_space<vmem>>, vector<1x64xf32>
    %cst_87 = arith.constant dense<0.000000e+00> : vector<16xf32>
    %290 = vector.multi_reduction <add>, %287, %cst_87 [1] : vector<16x64xf32> to vector<16xf32>
    %291 = vector.shape_cast %290 : vector<16xf32> to vector<16x1xf32>
    %cst_88 = arith.constant 6.400000e+01 : f32
    %292 = vector.broadcast %cst_88 : f32 to vector<16x1xf32>
    %293 = arith.divf %291, %292 : vector<16x1xf32>
    %294 = vector.broadcast %293 : vector<16x1xf32> to vector<16x64xf32>
    %295 = arith.subf %287, %294 : vector<16x64xf32>
    %296 = arith.mulf %295, %295 : vector<16x64xf32>
    %cst_89 = arith.constant dense<0.000000e+00> : vector<16xf32>
    %297 = vector.multi_reduction <add>, %296, %cst_89 [1] : vector<16x64xf32> to vector<16xf32>
    %298 = vector.shape_cast %297 : vector<16xf32> to vector<16x1xf32>
    %cst_90 = arith.constant 0.0158730168 : f32
    %299 = vector.broadcast %cst_90 : f32 to vector<16x1xf32>
    %300 = arith.mulf %298, %299 : vector<16x1xf32>
    %301 = math.sqrt %300 : vector<16x1xf32>
    %cst_91 = arith.constant 9.99999997E-7 : f32
    %302 = vector.broadcast %cst_91 : f32 to vector<16x1xf32>
    %303 = arith.addf %301, %302 : vector<16x1xf32>
    %304 = vector.broadcast %303 : vector<16x1xf32> to vector<16x64xf32>
    %305 = arith.divf %295, %304 : vector<16x64xf32>
    %306 = vector.broadcast %288 : vector<1x64xf32> to vector<16x64xf32>
    %307 = arith.mulf %306, %305 : vector<16x64xf32>
    %308 = vector.broadcast %289 : vector<1x64xf32> to vector<16x64xf32>
    %309 = arith.addf %307, %308 : vector<16x64xf32>
    %310 = vector.shape_cast %309 : vector<16x64xf32> to vector<2x8x64xf32>
    %c0_92 = arith.constant 0 : index
    %c0_93 = arith.constant 0 : index
    %c0_94 = arith.constant 0 : index
    %311 = vector.load %arg15[%c0_92, %c0_93, %c0_94] : memref<2x8x64xf32, #tpu.memory_space<vmem>>, vector<2x8x64xf32>
    tpu.vector_store %arg15[%c0_92, %c0_93, %c0_94], %310 {strides = array<i32>} : memref<2x8x64xf32, #tpu.memory_space<vmem>>, vector<2x8x64xf32>,
    return
  }
  func.func @transform_0(%arg0: i32) -> (i32, i32, i32) {
    %c0_i32 = arith.constant 0 : i32
    %c0_i32_0 = arith.constant 0 : i32
    %c0_i32_1 = arith.constant 0 : i32
    return %arg0, %c0_i32, %c0_i32_0 : i32, i32, i32
  }
  func.func @transform_1(%arg0: i32) -> (i32, i32, i32) {
    %c0_i32 = arith.constant 0 : i32
    %c0_i32_0 = arith.constant 0 : i32
    %c0_i32_1 = arith.constant 0 : i32
    return %arg0, %c0_i32, %c0_i32_0 : i32, i32, i32
  }
  func.func @transform_2(%arg0: i32) -> (i32, i32) {
    %c0_i32 = arith.constant 0 : i32
    %c0_i32_0 = arith.constant 0 : i32
    %c0_i32_1 = arith.constant 0 : i32
    return %c0_i32, %c0_i32_0 : i32, i32
  }
  func.func @transform_3(%arg0: i32) -> (i32, i32) {
    %c0_i32 = arith.constant 0 : i32
    %c0_i32_0 = arith.constant 0 : i32
    %c0_i32_1 = arith.constant 0 : i32
    return %c0_i32, %c0_i32_0 : i32, i32
  }
  func.func @transform_4(%arg0: i32) -> (i32, i32) {
    %c0_i32 = arith.constant 0 : i32
    %c0_i32_0 = arith.constant 0 : i32
    %c0_i32_1 = arith.constant 0 : i32
    return %c0_i32, %c0_i32_0 : i32, i32
  }
  func.func @transform_5(%arg0: i32) -> (i32, i32) {
    %c0_i32 = arith.constant 0 : i32
    %c0_i32_0 = arith.constant 0 : i32
    %c0_i32_1 = arith.constant 0 : i32
    return %c0_i32, %c0_i32_0 : i32, i32
  }
  func.func @transform_6(%arg0: i32) -> (i32, i32) {
    %c0_i32 = arith.constant 0 : i32
    %c0_i32_0 = arith.constant 0 : i32
    %c0_i32_1 = arith.constant 0 : i32
    return %c0_i32, %c0_i32_0 : i32, i32
  }
  func.func @transform_7(%arg0: i32) -> (i32, i32) {
    %c0_i32 = arith.constant 0 : i32
    %c0_i32_0 = arith.constant 0 : i32
    %c0_i32_1 = arith.constant 0 : i32
    return %c0_i32, %c0_i32_0 : i32, i32
  }
  func.func @transform_8(%arg0: i32) -> (i32, i32) {
    %c0_i32 = arith.constant 0 : i32
    %c0_i32_0 = arith.constant 0 : i32
    %c0_i32_1 = arith.constant 0 : i32
    return %c0_i32, %c0_i32_0 : i32, i32
  }
  func.func @transform_9(%arg0: i32) -> (i32, i32) {
    %c0_i32 = arith.constant 0 : i32
    %c0_i32_0 = arith.constant 0 : i32
    %c0_i32_1 = arith.constant 0 : i32
    return %c0_i32, %c0_i32_0 : i32, i32
  }
  func.func @transform_10(%arg0: i32) -> (i32, i32) {
    %c0_i32 = arith.constant 0 : i32
    %c0_i32_0 = arith.constant 0 : i32
    %c0_i32_1 = arith.constant 0 : i32
    return %c0_i32, %c0_i32_0 : i32, i32
  }
  func.func @transform_11(%arg0: i32) -> (i32, i32) {
    %c0_i32 = arith.constant 0 : i32
    %c0_i32_0 = arith.constant 0 : i32
    %c0_i32_1 = arith.constant 0 : i32
    return %c0_i32, %c0_i32_0 : i32, i32
  }
  func.func @transform_12(%arg0: i32) -> (i32, i32) {
    %c0_i32 = arith.constant 0 : i32
    %c0_i32_0 = arith.constant 0 : i32
    %c0_i32_1 = arith.constant 0 : i32
    return %c0_i32, %c0_i32_0 : i32, i32
  }
  func.func @transform_13(%arg0: i32) -> (i32, i32) {
    %c0_i32 = arith.constant 0 : i32
    %c0_i32_0 = arith.constant 0 : i32
    %c0_i32_1 = arith.constant 0 : i32
    return %c0_i32, %c0_i32_0 : i32, i32
  }
  func.func @transform_14(%arg0: i32) -> (i32, i32, i32) {
    %c0_i32 = arith.constant 0 : i32
    %c0_i32_0 = arith.constant 0 : i32
    %c0_i32_1 = arith.constant 0 : i32
    return %arg0, %c0_i32, %c0_i32_0 : i32, i32, i32
  }
}

module attributes {stable_mosaic.version = 11 : i64} {
  func.func @_sa_kernel(%arg0: i32, %arg1: memref<2x8x64xf32, #tpu.memory_space<vmem>>, %arg2: memref<2x1x8xi32, #tpu.memory_space<vmem>>, %arg3: memref<64x192xbf16, #tpu.memory_space<vmem>>, %arg4: memref<1x192xf32, #tpu.memory_space<vmem>>, %arg5: memref<64x64xbf16, #tpu.memory_space<vmem>>, %arg6: memref<1x64xf32, #tpu.memory_space<vmem>>, %arg7: memref<64x256xbf16, #tpu.memory_space<vmem>>, %arg8: memref<1x256xf32, #tpu.memory_space<vmem>>, %arg9: memref<256x64xbf16, #tpu.memory_space<vmem>>, %arg10: memref<1x64xf32, #tpu.memory_space<vmem>>, %arg11: memref<1x64xf32, #tpu.memory_space<vmem>>, %arg12: memref<1x64xf32, #tpu.memory_space<vmem>>, %arg13: memref<1x64xf32, #tpu.memory_space<vmem>>, %arg14: memref<1x64xf32, #tpu.memory_space<vmem>>, %arg15: memref<2x8x64xf32, #tpu.memory_space<vmem>>) attributes {dimension_semantics = [#tpu.dimension_semantics<parallel>], iteration_bounds = array<i64: 1>, scalar_prefetch = 0 : i64, scratch_operands = 0 : i64, tpu.core_type = #tpu.core_type<tc>, window_params = [{transform_indices = @transform_0, window_bounds = array<i64: 2, 8, 64>}, {transform_indices = @transform_1, window_bounds = array<i64: 2, 1, 8>}, {pipeline_mode = #tpu.pipeline_mode<synchronous>, transform_indices = @transform_2, window_bounds = array<i64: 64, 192>}, {pipeline_mode = #tpu.pipeline_mode<synchronous>, transform_indices = @transform_3, window_bounds = array<i64: 1, 192>}, {pipeline_mode = #tpu.pipeline_mode<synchronous>, transform_indices = @transform_4, window_bounds = array<i64: 64, 64>}, {pipeline_mode = #tpu.pipeline_mode<synchronous>, transform_indices = @transform_5, window_bounds = array<i64: 1, 64>}, {pipeline_mode = #tpu.pipeline_mode<synchronous>, transform_indices = @transform_6, window_bounds = array<i64: 64, 256>}, {pipeline_mode = #tpu.pipeline_mode<synchronous>, transform_indices = @transform_7, window_bounds = array<i64: 1, 256>}, {pipeline_mode = #tpu.pipeline_mode<synchronous>, transform_indices = @transform_8, window_bounds = array<i64: 256, 64>}, {pipeline_mode = #tpu.pipeline_mode<synchronous>, transform_indices = @transform_9, window_bounds = array<i64: 1, 64>}, {pipeline_mode = #tpu.pipeline_mode<synchronous>, transform_indices = @transform_10, window_bounds = array<i64: 1, 64>}, {pipeline_mode = #tpu.pipeline_mode<synchronous>, transform_indices = @transform_11, window_bounds = array<i64: 1, 64>}, {pipeline_mode = #tpu.pipeline_mode<synchronous>, transform_indices = @transform_12, window_bounds = array<i64: 1, 64>}, {pipeline_mode = #tpu.pipeline_mode<synchronous>, transform_indices = @transform_13, window_bounds = array<i64: 1, 64>}, {transform_indices = @transform_14, window_bounds = array<i64: 2, 8, 64>}]} {
    %c0 = arith.constant 0 : index
    %c0_0 = arith.constant 0 : index
    %c0_1 = arith.constant 0 : index
    %0 = vector.load %arg1[%c0, %c0_0, %c0_1] : memref<2x8x64xf32, #tpu.memory_space<vmem>>, vector<2x8x64xf32>
    %1 = vector.shape_cast %0 : vector<2x8x64xf32> to vector<16x64xf32>
    %2 = arith.truncf %1 : vector<16x64xf32> to vector<16x64xbf16>
    %c0_2 = arith.constant 0 : index
    %c0_3 = arith.constant 0 : index
    %3 = vector.load %arg3[%c0_2, %c0_3] : memref<64x192xbf16, #tpu.memory_space<vmem>>, vector<64x192xbf16>
    %cst = arith.constant dense<0.000000e+00> : vector<16x192xf32>
    %4 = tpu.matmul %2, %3, %cst {dimension_numbers = #tpu.dot_dimension_numbers<[1], [0], [0], [1], [0, 0, 1, 1], [], []>} : vector<16x64xbf16>, vector<64x192xbf16>, vector<16x192xf32> -> vector<16x192xf32>
    %c0_4 = arith.constant 0 : index
    %c0_5 = arith.constant 0 : index
    %5 = vector.load %arg4[%c0_4, %c0_5] : memref<1x192xf32, #tpu.memory_space<vmem>>, vector<1x192xf32>
    %6 = vector.broadcast %5 : vector<1x192xf32> to vector<16x192xf32>
    %7 = arith.addf %4, %6 : vector<16x192xf32>
    %c0_6 = arith.constant 0 : index
    %c0_7 = arith.constant 0 : index
    %c0_8 = arith.constant 0 : index
    %8 = vector.load %arg2[%c0_6, %c0_7, %c0_8] : memref<2x1x8xi32, #tpu.memory_space<vmem>>, vector<2x1x8xi32>
    %c0_i32 = arith.constant 0 : i32
    %9 = vector.broadcast %c0_i32 : i32 to vector<2x1x8xi32>
    %10 = arith.cmpi ne, %8, %9 : vector<2x1x8xi32>
    %cst_9 = arith.constant -1.000000e+09 : f32
    %cst_10 = arith.constant 0.000000e+00 : f32
    %11 = vector.broadcast %cst_9 : f32 to vector<2x1x8xf32>
    %12 = vector.broadcast %cst_10 : f32 to vector<2x1x8xf32>
    %13 = arith.select %10, %11, %12 : vector<2x1x8xi1>, vector<2x1x8xf32>
    %cst_11 = arith.constant 0.000000e+00 : f32
    %14 = vector.broadcast %cst_11 : f32 to vector<16x64xf32>
    %15 = vector.extract_strided_slice %7 {offsets = [0, 0], sizes = [16, 8], strides = [1, 1]} : vector<16x192xf32> to vector<16x8xf32>
    %16 = vector.shape_cast %15 : vector<16x8xf32> to vector<2x8x8xf32>
    %17 = arith.truncf %16 : vector<2x8x8xf32> to vector<2x8x8xbf16>
    %18 = vector.extract_strided_slice %7 {offsets = [0, 64], sizes = [16, 8], strides = [1, 1]} : vector<16x192xf32> to vector<16x8xf32>
    %19 = vector.shape_cast %18 : vector<16x8xf32> to vector<2x8x8xf32>
    %20 = arith.truncf %19 : vector<2x8x8xf32> to vector<2x8x8xbf16>
    %21 = vector.extract_strided_slice %7 {offsets = [0, 128], sizes = [16, 8], strides = [1, 1]} : vector<16x192xf32> to vector<16x8xf32>
    %22 = vector.shape_cast %21 : vector<16x8xf32> to vector<2x8x8xf32>
    %23 = arith.truncf %22 : vector<2x8x8xf32> to vector<2x8x8xbf16>
    "tpu.trace_start"() <{level = 10 : i32, message = "bqd,bkd->bqk"}> : () -> ()
    %cst_12 = arith.constant dense<0.000000e+00> : vector<2x8x8xf32>
    %24 = tpu.matmul %17, %20, %cst_12 {dimension_numbers = #tpu.dot_dimension_numbers<[2], [2], [1], [1], [0, 0, 0, 1, 1, 1], [0], [0]>} : vector<2x8x8xbf16>, vector<2x8x8xbf16>, vector<2x8x8xf32> -> vector<2x8x8xf32>
    "tpu.trace_stop"() : () -> ()
    %25 = vector.broadcast %13 : vector<2x1x8xf32> to vector<2x8x8xf32>
    %26 = arith.addf %24, %25 : vector<2x8x8xf32>
    %cst_13 = arith.constant dense<0xFF800000> : vector<2x8xf32>
    %27 = vector.multi_reduction <maximumf>, %26, %cst_13 [2] : vector<2x8x8xf32> to vector<2x8xf32>
    %28 = vector.shape_cast %27 : vector<2x8xf32> to vector<2x8x1xf32>
    %29 = vector.broadcast %28 : vector<2x8x1xf32> to vector<2x8x8xf32>
    %30 = arith.subf %26, %29 : vector<2x8x8xf32>
    %31 = math.exp %30 : vector<2x8x8xf32>
    %cst_14 = arith.constant dense<0.000000e+00> : vector<2x8xf32>
    %32 = vector.multi_reduction <add>, %31, %cst_14 [2] : vector<2x8x8xf32> to vector<2x8xf32>
    %33 = vector.shape_cast %32 : vector<2x8xf32> to vector<2x8x1xf32>
    %34 = tpu.reciprocal %33 {approx = true} : vector<2x8x1xf32> -> vector<2x8x1xf32>
    %35 = vector.broadcast %34 : vector<2x8x1xf32> to vector<2x8x8xf32>
    %36 = arith.mulf %31, %35 : vector<2x8x8xf32>
    %37 = arith.truncf %36 : vector<2x8x8xf32> to vector<2x8x8xbf16>
    "tpu.trace_start"() <{level = 10 : i32, message = "bqk,bkd->bqd"}> : () -> ()
    %cst_15 = arith.constant dense<0.000000e+00> : vector<2x8x8xf32>
    %38 = tpu.matmul %37, %23, %cst_15 {dimension_numbers = #tpu.dot_dimension_numbers<[2], [1], [1], [2], [0, 0, 0, 1, 1, 2], [0], [0]>} : vector<2x8x8xbf16>, vector<2x8x8xbf16>, vector<2x8x8xf32> -> vector<2x8x8xf32>
    "tpu.trace_stop"() : () -> ()
    %39 = vector.shape_cast %38 : vector<2x8x8xf32> to vector<16x8xf32>
    %40 = arith.truncf %39 : vector<16x8xf32> to vector<16x8xbf16>
    %c0_16 = arith.constant 0 : index
    %c0_17 = arith.constant 0 : index
    %41 = vector.load %arg5[%c0_16, %c0_17] : memref<64x64xbf16, #tpu.memory_space<vmem>>, vector<8x64xbf16>
    %cst_18 = arith.constant dense<0.000000e+00> : vector<16x64xf32>
    %42 = tpu.matmul %40, %41, %cst_18 {dimension_numbers = #tpu.dot_dimension_numbers<[1], [0], [0], [1], [0, 0, 1, 1], [], []>} : vector<16x8xbf16>, vector<8x64xbf16>, vector<16x64xf32> -> vector<16x64xf32>
    %43 = arith.addf %14, %42 : vector<16x64xf32>
    %44 = vector.extract_strided_slice %7 {offsets = [0, 8], sizes = [16, 8], strides = [1, 1]} : vector<16x192xf32> to vector<16x8xf32>
    %45 = vector.shape_cast %44 : vector<16x8xf32> to vector<2x8x8xf32>
    %46 = arith.truncf %45 : vector<2x8x8xf32> to vector<2x8x8xbf16>
    %47 = vector.extract_strided_slice %7 {offsets = [0, 72], sizes = [16, 8], strides = [1, 1]} : vector<16x192xf32> to vector<16x8xf32>
    %48 = vector.shape_cast %47 : vector<16x8xf32> to vector<2x8x8xf32>
    %49 = arith.truncf %48 : vector<2x8x8xf32> to vector<2x8x8xbf16>
    %50 = vector.extract_strided_slice %7 {offsets = [0, 136], sizes = [16, 8], strides = [1, 1]} : vector<16x192xf32> to vector<16x8xf32>
    %51 = vector.shape_cast %50 : vector<16x8xf32> to vector<2x8x8xf32>
    %52 = arith.truncf %51 : vector<2x8x8xf32> to vector<2x8x8xbf16>
    "tpu.trace_start"() <{level = 10 : i32, message = "bqd,bkd->bqk"}> : () -> ()
    %cst_19 = arith.constant dense<0.000000e+00> : vector<2x8x8xf32>
    %53 = tpu.matmul %46, %49, %cst_19 {dimension_numbers = #tpu.dot_dimension_numbers<[2], [2], [1], [1], [0, 0, 0, 1, 1, 1], [0], [0]>} : vector<2x8x8xbf16>, vector<2x8x8xbf16>, vector<2x8x8xf32> -> vector<2x8x8xf32>
    "tpu.trace_stop"() : () -> ()
    %54 = vector.broadcast %13 : vector<2x1x8xf32> to vector<2x8x8xf32>
    %55 = arith.addf %53, %54 : vector<2x8x8xf32>
    %cst_20 = arith.constant dense<0xFF800000> : vector<2x8xf32>
    %56 = vector.multi_reduction <maximumf>, %55, %cst_20 [2] : vector<2x8x8xf32> to vector<2x8xf32>
    %57 = vector.shape_cast %56 : vector<2x8xf32> to vector<2x8x1xf32>
    %58 = vector.broadcast %57 : vector<2x8x1xf32> to vector<2x8x8xf32>
    %59 = arith.subf %55, %58 : vector<2x8x8xf32>
    %60 = math.exp %59 : vector<2x8x8xf32>
    %cst_21 = arith.constant dense<0.000000e+00> : vector<2x8xf32>
    %61 = vector.multi_reduction <add>, %60, %cst_21 [2] : vector<2x8x8xf32> to vector<2x8xf32>
    %62 = vector.shape_cast %61 : vector<2x8xf32> to vector<2x8x1xf32>
    %63 = tpu.reciprocal %62 {approx = true} : vector<2x8x1xf32> -> vector<2x8x1xf32>
    %64 = vector.broadcast %63 : vector<2x8x1xf32> to vector<2x8x8xf32>
    %65 = arith.mulf %60, %64 : vector<2x8x8xf32>
    %66 = arith.truncf %65 : vector<2x8x8xf32> to vector<2x8x8xbf16>
    "tpu.trace_start"() <{level = 10 : i32, message = "bqk,bkd->bqd"}> : () -> ()
    %cst_22 = arith.constant dense<0.000000e+00> : vector<2x8x8xf32>
    %67 = tpu.matmul %66, %52, %cst_22 {dimension_numbers = #tpu.dot_dimension_numbers<[2], [1], [1], [2], [0, 0, 0, 1, 1, 2], [0], [0]>} : vector<2x8x8xbf16>, vector<2x8x8xbf16>, vector<2x8x8xf32> -> vector<2x8x8xf32>
    "tpu.trace_stop"() : () -> ()
    %68 = vector.shape_cast %67 : vector<2x8x8xf32> to vector<16x8xf32>
    %69 = arith.truncf %68 : vector<16x8xf32> to vector<16x8xbf16>
    %c8 = arith.constant 8 : index
    %c0_23 = arith.constant 0 : index
    %70 = vector.load %arg5[%c8, %c0_23] : memref<64x64xbf16, #tpu.memory_space<vmem>>, vector<8x64xbf16>
    %cst_24 = arith.constant dense<0.000000e+00> : vector<16x64xf32>
    %71 = tpu.matmul %69, %70, %cst_24 {dimension_numbers = #tpu.dot_dimension_numbers<[1], [0], [0], [1], [0, 0, 1, 1], [], []>} : vector<16x8xbf16>, vector<8x64xbf16>, vector<16x64xf32> -> vector<16x64xf32>
    %72 = arith.addf %43, %71 : vector<16x64xf32>
    %73 = vector.extract_strided_slice %7 {offsets = [0, 16], sizes = [16, 8], strides = [1, 1]} : vector<16x192xf32> to vector<16x8xf32>
    %74 = vector.shape_cast %73 : vector<16x8xf32> to vector<2x8x8xf32>
    %75 = arith.truncf %74 : vector<2x8x8xf32> to vector<2x8x8xbf16>
    %76 = vector.extract_strided_slice %7 {offsets = [0, 80], sizes = [16, 8], strides = [1, 1]} : vector<16x192xf32> to vector<16x8xf32>
    %77 = vector.shape_cast %76 : vector<16x8xf32> to vector<2x8x8xf32>
    %78 = arith.truncf %77 : vector<2x8x8xf32> to vector<2x8x8xbf16>
    %79 = vector.extract_strided_slice %7 {offsets = [0, 144], sizes = [16, 8], strides = [1, 1]} : vector<16x192xf32> to vector<16x8xf32>
    %80 = vector.shape_cast %79 : vector<16x8xf32> to vector<2x8x8xf32>
    %81 = arith.truncf %80 : vector<2x8x8xf32> to vector<2x8x8xbf16>
    "tpu.trace_start"() <{level = 10 : i32, message = "bqd,bkd->bqk"}> : () -> ()
    %cst_25 = arith.constant dense<0.000000e+00> : vector<2x8x8xf32>
    %82 = tpu.matmul %75, %78, %cst_25 {dimension_numbers = #tpu.dot_dimension_numbers<[2], [2], [1], [1], [0, 0, 0, 1, 1, 1], [0], [0]>} : vector<2x8x8xbf16>, vector<2x8x8xbf16>, vector<2x8x8xf32> -> vector<2x8x8xf32>
    "tpu.trace_stop"() : () -> ()
    %83 = vector.broadcast %13 : vector<2x1x8xf32> to vector<2x8x8xf32>
    %84 = arith.addf %82, %83 : vector<2x8x8xf32>
    %cst_26 = arith.constant dense<0xFF800000> : vector<2x8xf32>
    %85 = vector.multi_reduction <maximumf>, %84, %cst_26 [2] : vector<2x8x8xf32> to vector<2x8xf32>
    %86 = vector.shape_cast %85 : vector<2x8xf32> to vector<2x8x1xf32>
    %87 = vector.broadcast %86 : vector<2x8x1xf32> to vector<2x8x8xf32>
    %88 = arith.subf %84, %87 : vector<2x8x8xf32>
    %89 = math.exp %88 : vector<2x8x8xf32>
    %cst_27 = arith.constant dense<0.000000e+00> : vector<2x8xf32>
    %90 = vector.multi_reduction <add>, %89, %cst_27 [2] : vector<2x8x8xf32> to vector<2x8xf32>
    %91 = vector.shape_cast %90 : vector<2x8xf32> to vector<2x8x1xf32>
    %92 = tpu.reciprocal %91 {approx = true} : vector<2x8x1xf32> -> vector<2x8x1xf32>
    %93 = vector.broadcast %92 : vector<2x8x1xf32> to vector<2x8x8xf32>
    %94 = arith.mulf %89, %93 : vector<2x8x8xf32>
    %95 = arith.truncf %94 : vector<2x8x8xf32> to vector<2x8x8xbf16>
    "tpu.trace_start"() <{level = 10 : i32, message = "bqk,bkd->bqd"}> : () -> ()
    %cst_28 = arith.constant dense<0.000000e+00> : vector<2x8x8xf32>
    %96 = tpu.matmul %95, %81, %cst_28 {dimension_numbers = #tpu.dot_dimension_numbers<[2], [1], [1], [2], [0, 0, 0, 1, 1, 2], [0], [0]>} : vector<2x8x8xbf16>, vector<2x8x8xbf16>, vector<2x8x8xf32> -> vector<2x8x8xf32>
    "tpu.trace_stop"() : () -> ()
    %97 = vector.shape_cast %96 : vector<2x8x8xf32> to vector<16x8xf32>
    %98 = arith.truncf %97 : vector<16x8xf32> to vector<16x8xbf16>
    %c16 = arith.constant 16 : index
    %c0_29 = arith.constant 0 : index
    %99 = vector.load %arg5[%c16, %c0_29] : memref<64x64xbf16, #tpu.memory_space<vmem>>, vector<8x64xbf16>
    %cst_30 = arith.constant dense<0.000000e+00> : vector<16x64xf32>
    %100 = tpu.matmul %98, %99, %cst_30 {dimension_numbers = #tpu.dot_dimension_numbers<[1], [0], [0], [1], [0, 0, 1, 1], [], []>} : vector<16x8xbf16>, vector<8x64xbf16>, vector<16x64xf32> -> vector<16x64xf32>
    %101 = arith.addf %72, %100 : vector<16x64xf32>
    %102 = vector.extract_strided_slice %7 {offsets = [0, 24], sizes = [16, 8], strides = [1, 1]} : vector<16x192xf32> to vector<16x8xf32>
    %103 = vector.shape_cast %102 : vector<16x8xf32> to vector<2x8x8xf32>
    %104 = arith.truncf %103 : vector<2x8x8xf32> to vector<2x8x8xbf16>
    %105 = vector.extract_strided_slice %7 {offsets = [0, 88], sizes = [16, 8], strides = [1, 1]} : vector<16x192xf32> to vector<16x8xf32>
    %106 = vector.shape_cast %105 : vector<16x8xf32> to vector<2x8x8xf32>
    %107 = arith.truncf %106 : vector<2x8x8xf32> to vector<2x8x8xbf16>
    %108 = vector.extract_strided_slice %7 {offsets = [0, 152], sizes = [16, 8], strides = [1, 1]} : vector<16x192xf32> to vector<16x8xf32>
    %109 = vector.shape_cast %108 : vector<16x8xf32> to vector<2x8x8xf32>
    %110 = arith.truncf %109 : vector<2x8x8xf32> to vector<2x8x8xbf16>
    "tpu.trace_start"() <{level = 10 : i32, message = "bqd,bkd->bqk"}> : () -> ()
    %cst_31 = arith.constant dense<0.000000e+00> : vector<2x8x8xf32>
    %111 = tpu.matmul %104, %107, %cst_31 {dimension_numbers = #tpu.dot_dimension_numbers<[2], [2], [1], [1], [0, 0, 0, 1, 1, 1], [0], [0]>} : vector<2x8x8xbf16>, vector<2x8x8xbf16>, vector<2x8x8xf32> -> vector<2x8x8xf32>
    "tpu.trace_stop"() : () -> ()
    %112 = vector.broadcast %13 : vector<2x1x8xf32> to vector<2x8x8xf32>
    %113 = arith.addf %111, %112 : vector<2x8x8xf32>
    %cst_32 = arith.constant dense<0xFF800000> : vector<2x8xf32>
    %114 = vector.multi_reduction <maximumf>, %113, %cst_32 [2] : vector<2x8x8xf32> to vector<2x8xf32>
    %115 = vector.shape_cast %114 : vector<2x8xf32> to vector<2x8x1xf32>
    %116 = vector.broadcast %115 : vector<2x8x1xf32> to vector<2x8x8xf32>
    %117 = arith.subf %113, %116 : vector<2x8x8xf32>
    %118 = math.exp %117 : vector<2x8x8xf32>
    %cst_33 = arith.constant dense<0.000000e+00> : vector<2x8xf32>
    %119 = vector.multi_reduction <add>, %118, %cst_33 [2] : vector<2x8x8xf32> to vector<2x8xf32>
    %120 = vector.shape_cast %119 : vector<2x8xf32> to vector<2x8x1xf32>
    %121 = tpu.reciprocal %120 {approx = true} : vector<2x8x1xf32> -> vector<2x8x1xf32>
    %122 = vector.broadcast %121 : vector<2x8x1xf32> to vector<2x8x8xf32>
    %123 = arith.mulf %118, %122 : vector<2x8x8xf32>
    %124 = arith.truncf %123 : vector<2x8x8xf32> to vector<2x8x8xbf16>
    "tpu.trace_start"() <{level = 10 : i32, message = "bqk,bkd->bqd"}> : () -> ()
    %cst_34 = arith.constant dense<0.000000e+00> : vector<2x8x8xf32>
    %125 = tpu.matmul %124, %110, %cst_34 {dimension_numbers = #tpu.dot_dimension_numbers<[2], [1], [1], [2], [0, 0, 0, 1, 1, 2], [0], [0]>} : vector<2x8x8xbf16>, vector<2x8x8xbf16>, vector<2x8x8xf32> -> vector<2x8x8xf32>
    "tpu.trace_stop"() : () -> ()
    %126 = vector.shape_cast %125 : vector<2x8x8xf32> to vector<16x8xf32>
    %127 = arith.truncf %126 : vector<16x8xf32> to vector<16x8xbf16>
    %c24 = arith.constant 24 : index
    %c0_35 = arith.constant 0 : index
    %128 = vector.load %arg5[%c24, %c0_35] : memref<64x64xbf16, #tpu.memory_space<vmem>>, vector<8x64xbf16>
    %cst_36 = arith.constant dense<0.000000e+00> : vector<16x64xf32>
    %129 = tpu.matmul %127, %128, %cst_36 {dimension_numbers = #tpu.dot_dimension_numbers<[1], [0], [0], [1], [0, 0, 1, 1], [], []>} : vector<16x8xbf16>, vector<8x64xbf16>, vector<16x64xf32> -> vector<16x64xf32>
    %130 = arith.addf %101, %129 : vector<16x64xf32>
    %131 = vector.extract_strided_slice %7 {offsets = [0, 32], sizes = [16, 8], strides = [1, 1]} : vector<16x192xf32> to vector<16x8xf32>
    %132 = vector.shape_cast %131 : vector<16x8xf32> to vector<2x8x8xf32>
    %133 = arith.truncf %132 : vector<2x8x8xf32> to vector<2x8x8xbf16>
    %134 = vector.extract_strided_slice %7 {offsets = [0, 96], sizes = [16, 8], strides = [1, 1]} : vector<16x192xf32> to vector<16x8xf32>
    %135 = vector.shape_cast %134 : vector<16x8xf32> to vector<2x8x8xf32>
    %136 = arith.truncf %135 : vector<2x8x8xf32> to vector<2x8x8xbf16>
    %137 = vector.extract_strided_slice %7 {offsets = [0, 160], sizes = [16, 8], strides = [1, 1]} : vector<16x192xf32> to vector<16x8xf32>
    %138 = vector.shape_cast %137 : vector<16x8xf32> to vector<2x8x8xf32>
    %139 = arith.truncf %138 : vector<2x8x8xf32> to vector<2x8x8xbf16>
    "tpu.trace_start"() <{level = 10 : i32, message = "bqd,bkd->bqk"}> : () -> ()
    %cst_37 = arith.constant dense<0.000000e+00> : vector<2x8x8xf32>
    %140 = tpu.matmul %133, %136, %cst_37 {dimension_numbers = #tpu.dot_dimension_numbers<[2], [2], [1], [1], [0, 0, 0, 1, 1, 1], [0], [0]>} : vector<2x8x8xbf16>, vector<2x8x8xbf16>, vector<2x8x8xf32> -> vector<2x8x8xf32>
    "tpu.trace_stop"() : () -> ()
    %141 = vector.broadcast %13 : vector<2x1x8xf32> to vector<2x8x8xf32>
    %142 = arith.addf %140, %141 : vector<2x8x8xf32>
    %cst_38 = arith.constant dense<0xFF800000> : vector<2x8xf32>
    %143 = vector.multi_reduction <maximumf>, %142, %cst_38 [2] : vector<2x8x8xf32> to vector<2x8xf32>
    %144 = vector.shape_cast %143 : vector<2x8xf32> to vector<2x8x1xf32>
    %145 = vector.broadcast %144 : vector<2x8x1xf32> to vector<2x8x8xf32>
    %146 = arith.subf %142, %145 : vector<2x8x8xf32>
    %147 = math.exp %146 : vector<2x8x8xf32>
    %cst_39 = arith.constant dense<0.000000e+00> : vector<2x8xf32>
    %148 = vector.multi_reduction <add>, %147, %cst_39 [2] : vector<2x8x8xf32> to vector<2x8xf32>
    %149 = vector.shape_cast %148 : vector<2x8xf32> to vector<2x8x1xf32>
    %150 = tpu.reciprocal %149 {approx = true} : vector<2x8x1xf32> -> vector<2x8x1xf32>
    %151 = vector.broadcast %150 : vector<2x8x1xf32> to vector<2x8x8xf32>
    %152 = arith.mulf %147, %151 : vector<2x8x8xf32>
    %153 = arith.truncf %152 : vector<2x8x8xf32> to vector<2x8x8xbf16>
    "tpu.trace_start"() <{level = 10 : i32, message = "bqk,bkd->bqd"}> : () -> ()
    %cst_40 = arith.constant dense<0.000000e+00> : vector<2x8x8xf32>
    %154 = tpu.matmul %153, %139, %cst_40 {dimension_numbers = #tpu.dot_dimension_numbers<[2], [1], [1], [2], [0, 0, 0, 1, 1, 2], [0], [0]>} : vector<2x8x8xbf16>, vector<2x8x8xbf16>, vector<2x8x8xf32> -> vector<2x8x8xf32>
    "tpu.trace_stop"() : () -> ()
    %155 = vector.shape_cast %154 : vector<2x8x8xf32> to vector<16x8xf32>
    %156 = arith.truncf %155 : vector<16x8xf32> to vector<16x8xbf16>
    %c32 = arith.constant 32 : index
    %c0_41 = arith.constant 0 : index
    %157 = vector.load %arg5[%c32, %c0_41] : memref<64x64xbf16, #tpu.memory_space<vmem>>, vector<8x64xbf16>
    %cst_42 = arith.constant dense<0.000000e+00> : vector<16x64xf32>
    %158 = tpu.matmul %156, %157, %cst_42 {dimension_numbers = #tpu.dot_dimension_numbers<[1], [0], [0], [1], [0, 0, 1, 1], [], []>} : vector<16x8xbf16>, vector<8x64xbf16>, vector<16x64xf32> -> vector<16x64xf32>
    %159 = arith.addf %130, %158 : vector<16x64xf32>
    %160 = vector.extract_strided_slice %7 {offsets = [0, 40], sizes = [16, 8], strides = [1, 1]} : vector<16x192xf32> to vector<16x8xf32>
    %161 = vector.shape_cast %160 : vector<16x8xf32> to vector<2x8x8xf32>
    %162 = arith.truncf %161 : vector<2x8x8xf32> to vector<2x8x8xbf16>
    %163 = vector.extract_strided_slice %7 {offsets = [0, 104], sizes = [16, 8], strides = [1, 1]} : vector<16x192xf32> to vector<16x8xf32>
    %164 = vector.shape_cast %163 : vector<16x8xf32> to vector<2x8x8xf32>
    %165 = arith.truncf %164 : vector<2x8x8xf32> to vector<2x8x8xbf16>
    %166 = vector.extract_strided_slice %7 {offsets = [0, 168], sizes = [16, 8], strides = [1, 1]} : vector<16x192xf32> to vector<16x8xf32>
    %167 = vector.shape_cast %166 : vector<16x8xf32> to vector<2x8x8xf32>
    %168 = arith.truncf %167 : vector<2x8x8xf32> to vector<2x8x8xbf16>
    "tpu.trace_start"() <{level = 10 : i32, message = "bqd,bkd->bqk"}> : () -> ()
    %cst_43 = arith.constant dense<0.000000e+00> : vector<2x8x8xf32>
    %169 = tpu.matmul %162, %165, %cst_43 {dimension_numbers = #tpu.dot_dimension_numbers<[2], [2], [1], [1], [0, 0, 0, 1, 1, 1], [0], [0]>} : vector<2x8x8xbf16>, vector<2x8x8xbf16>, vector<2x8x8xf32> -> vector<2x8x8xf32>
    "tpu.trace_stop"() : () -> ()
    %170 = vector.broadcast %13 : vector<2x1x8xf32> to vector<2x8x8xf32>
    %171 = arith.addf %169, %170 : vector<2x8x8xf32>
    %cst_44 = arith.constant dense<0xFF800000> : vector<2x8xf32>
    %172 = vector.multi_reduction <maximumf>, %171, %cst_44 [2] : vector<2x8x8xf32> to vector<2x8xf32>
    %173 = vector.shape_cast %172 : vector<2x8xf32> to vector<2x8x1xf32>
    %174 = vector.broadcast %173 : vector<2x8x1xf32> to vector<2x8x8xf32>
    %175 = arith.subf %171, %174 : vector<2x8x8xf32>
    %176 = math.exp %175 : vector<2x8x8xf32>
    %cst_45 = arith.constant dense<0.000000e+00> : vector<2x8xf32>
    %177 = vector.multi_reduction <add>, %176, %cst_45 [2] : vector<2x8x8xf32> to vector<2x8xf32>
    %178 = vector.shape_cast %177 : vector<2x8xf32> to vector<2x8x1xf32>
    %179 = tpu.reciprocal %178 {approx = true} : vector<2x8x1xf32> -> vector<2x8x1xf32>
    %180 = vector.broadcast %179 : vector<2x8x1xf32> to vector<2x8x8xf32>
    %181 = arith.mulf %176, %180 : vector<2x8x8xf32>
    %182 = arith.truncf %181 : vector<2x8x8xf32> to vector<2x8x8xbf16>
    "tpu.trace_start"() <{level = 10 : i32, message = "bqk,bkd->bqd"}> : () -> ()
    %cst_46 = arith.constant dense<0.000000e+00> : vector<2x8x8xf32>
    %183 = tpu.matmul %182, %168, %cst_46 {dimension_numbers = #tpu.dot_dimension_numbers<[2], [1], [1], [2], [0, 0, 0, 1, 1, 2], [0], [0]>} : vector<2x8x8xbf16>, vector<2x8x8xbf16>, vector<2x8x8xf32> -> vector<2x8x8xf32>
    "tpu.trace_stop"() : () -> ()
    %184 = vector.shape_cast %183 : vector<2x8x8xf32> to vector<16x8xf32>
    %185 = arith.truncf %184 : vector<16x8xf32> to vector<16x8xbf16>
    %c40 = arith.constant 40 : index
    %c0_47 = arith.constant 0 : index
    %186 = vector.load %arg5[%c40, %c0_47] : memref<64x64xbf16, #tpu.memory_space<vmem>>, vector<8x64xbf16>
    %cst_48 = arith.constant dense<0.000000e+00> : vector<16x64xf32>
    %187 = tpu.matmul %185, %186, %cst_48 {dimension_numbers = #tpu.dot_dimension_numbers<[1], [0], [0], [1], [0, 0, 1, 1], [], []>} : vector<16x8xbf16>, vector<8x64xbf16>, vector<16x64xf32> -> vector<16x64xf32>
    %188 = arith.addf %159, %187 : vector<16x64xf32>
    %189 = vector.extract_strided_slice %7 {offsets = [0, 48], sizes = [16, 8], strides = [1, 1]} : vector<16x192xf32> to vector<16x8xf32>
    %190 = vector.shape_cast %189 : vector<16x8xf32> to vector<2x8x8xf32>
    %191 = arith.truncf %190 : vector<2x8x8xf32> to vector<2x8x8xbf16>
    %192 = vector.extract_strided_slice %7 {offsets = [0, 112], sizes = [16, 8], strides = [1, 1]} : vector<16x192xf32> to vector<16x8xf32>
    %193 = vector.shape_cast %192 : vector<16x8xf32> to vector<2x8x8xf32>
    %194 = arith.truncf %193 : vector<2x8x8xf32> to vector<2x8x8xbf16>
    %195 = vector.extract_strided_slice %7 {offsets = [0, 176], sizes = [16, 8], strides = [1, 1]} : vector<16x192xf32> to vector<16x8xf32>
    %196 = vector.shape_cast %195 : vector<16x8xf32> to vector<2x8x8xf32>
    %197 = arith.truncf %196 : vector<2x8x8xf32> to vector<2x8x8xbf16>
    "tpu.trace_start"() <{level = 10 : i32, message = "bqd,bkd->bqk"}> : () -> ()
    %cst_49 = arith.constant dense<0.000000e+00> : vector<2x8x8xf32>
    %198 = tpu.matmul %191, %194, %cst_49 {dimension_numbers = #tpu.dot_dimension_numbers<[2], [2], [1], [1], [0, 0, 0, 1, 1, 1], [0], [0]>} : vector<2x8x8xbf16>, vector<2x8x8xbf16>, vector<2x8x8xf32> -> vector<2x8x8xf32>
    "tpu.trace_stop"() : () -> ()
    %199 = vector.broadcast %13 : vector<2x1x8xf32> to vector<2x8x8xf32>
    %200 = arith.addf %198, %199 : vector<2x8x8xf32>
    %cst_50 = arith.constant dense<0xFF800000> : vector<2x8xf32>
    %201 = vector.multi_reduction <maximumf>, %200, %cst_50 [2] : vector<2x8x8xf32> to vector<2x8xf32>
    %202 = vector.shape_cast %201 : vector<2x8xf32> to vector<2x8x1xf32>
    %203 = vector.broadcast %202 : vector<2x8x1xf32> to vector<2x8x8xf32>
    %204 = arith.subf %200, %203 : vector<2x8x8xf32>
    %205 = math.exp %204 : vector<2x8x8xf32>
    %cst_51 = arith.constant dense<0.000000e+00> : vector<2x8xf32>
    %206 = vector.multi_reduction <add>, %205, %cst_51 [2] : vector<2x8x8xf32> to vector<2x8xf32>
    %207 = vector.shape_cast %206 : vector<2x8xf32> to vector<2x8x1xf32>
    %208 = tpu.reciprocal %207 {approx = true} : vector<2x8x1xf32> -> vector<2x8x1xf32>
    %209 = vector.broadcast %208 : vector<2x8x1xf32> to vector<2x8x8xf32>
    %210 = arith.mulf %205, %209 : vector<2x8x8xf32>
    %211 = arith.truncf %210 : vector<2x8x8xf32> to vector<2x8x8xbf16>
    "tpu.trace_start"() <{level = 10 : i32, message = "bqk,bkd->bqd"}> : () -> ()
    %cst_52 = arith.constant dense<0.000000e+00> : vector<2x8x8xf32>
    %212 = tpu.matmul %211, %197, %cst_52 {dimension_numbers = #tpu.dot_dimension_numbers<[2], [1], [1], [2], [0, 0, 0, 1, 1, 2], [0], [0]>} : vector<2x8x8xbf16>, vector<2x8x8xbf16>, vector<2x8x8xf32> -> vector<2x8x8xf32>
    "tpu.trace_stop"() : () -> ()
    %213 = vector.shape_cast %212 : vector<2x8x8xf32> to vector<16x8xf32>
    %214 = arith.truncf %213 : vector<16x8xf32> to vector<16x8xbf16>
    %c48 = arith.constant 48 : index
    %c0_53 = arith.constant 0 : index
    %215 = vector.load %arg5[%c48, %c0_53] : memref<64x64xbf16, #tpu.memory_space<vmem>>, vector<8x64xbf16>
    %cst_54 = arith.constant dense<0.000000e+00> : vector<16x64xf32>
    %216 = tpu.matmul %214, %215, %cst_54 {dimension_numbers = #tpu.dot_dimension_numbers<[1], [0], [0], [1], [0, 0, 1, 1], [], []>} : vector<16x8xbf16>, vector<8x64xbf16>, vector<16x64xf32> -> vector<16x64xf32>
    %217 = arith.addf %188, %216 : vector<16x64xf32>
    %218 = vector.extract_strided_slice %7 {offsets = [0, 56], sizes = [16, 8], strides = [1, 1]} : vector<16x192xf32> to vector<16x8xf32>
    %219 = vector.shape_cast %218 : vector<16x8xf32> to vector<2x8x8xf32>
    %220 = arith.truncf %219 : vector<2x8x8xf32> to vector<2x8x8xbf16>
    %221 = vector.extract_strided_slice %7 {offsets = [0, 120], sizes = [16, 8], strides = [1, 1]} : vector<16x192xf32> to vector<16x8xf32>
    %222 = vector.shape_cast %221 : vector<16x8xf32> to vector<2x8x8xf32>
    %223 = arith.truncf %222 : vector<2x8x8xf32> to vector<2x8x8xbf16>
    %224 = vector.extract_strided_slice %7 {offsets = [0, 184], sizes = [16, 8], strides = [1, 1]} : vector<16x192xf32> to vector<16x8xf32>
    %225 = vector.shape_cast %224 : vector<16x8xf32> to vector<2x8x8xf32>
    %226 = arith.truncf %225 : vector<2x8x8xf32> to vector<2x8x8xbf16>
    "tpu.trace_start"() <{level = 10 : i32, message = "bqd,bkd->bqk"}> : () -> ()
    %cst_55 = arith.constant dense<0.000000e+00> : vector<2x8x8xf32>
    %227 = tpu.matmul %220, %223, %cst_55 {dimension_numbers = #tpu.dot_dimension_numbers<[2], [2], [1], [1], [0, 0, 0, 1, 1, 1], [0], [0]>} : vector<2x8x8xbf16>, vector<2x8x8xbf16>, vector<2x8x8xf32> -> vector<2x8x8xf32>
    "tpu.trace_stop"() : () -> ()
    %228 = vector.broadcast %13 : vector<2x1x8xf32> to vector<2x8x8xf32>
    %229 = arith.addf %227, %228 : vector<2x8x8xf32>
    %cst_56 = arith.constant dense<0xFF800000> : vector<2x8xf32>
    %230 = vector.multi_reduction <maximumf>, %229, %cst_56 [2] : vector<2x8x8xf32> to vector<2x8xf32>
    %231 = vector.shape_cast %230 : vector<2x8xf32> to vector<2x8x1xf32>
    %232 = vector.broadcast %231 : vector<2x8x1xf32> to vector<2x8x8xf32>
    %233 = arith.subf %229, %232 : vector<2x8x8xf32>
    %234 = math.exp %233 : vector<2x8x8xf32>
    %cst_57 = arith.constant dense<0.000000e+00> : vector<2x8xf32>
    %235 = vector.multi_reduction <add>, %234, %cst_57 [2] : vector<2x8x8xf32> to vector<2x8xf32>
    %236 = vector.shape_cast %235 : vector<2x8xf32> to vector<2x8x1xf32>
    %237 = tpu.reciprocal %236 {approx = true} : vector<2x8x1xf32> -> vector<2x8x1xf32>
    %238 = vector.broadcast %237 : vector<2x8x1xf32> to vector<2x8x8xf32>
    %239 = arith.mulf %234, %238 : vector<2x8x8xf32>
    %240 = arith.truncf %239 : vector<2x8x8xf32> to vector<2x8x8xbf16>
    "tpu.trace_start"() <{level = 10 : i32, message = "bqk,bkd->bqd"}> : () -> ()
    %cst_58 = arith.constant dense<0.000000e+00> : vector<2x8x8xf32>
    %241 = tpu.matmul %240, %226, %cst_58 {dimension_numbers = #tpu.dot_dimension_numbers<[2], [1], [1], [2], [0, 0, 0, 1, 1, 2], [0], [0]>} : vector<2x8x8xbf16>, vector<2x8x8xbf16>, vector<2x8x8xf32> -> vector<2x8x8xf32>
    "tpu.trace_stop"() : () -> ()
    %242 = vector.shape_cast %241 : vector<2x8x8xf32> to vector<16x8xf32>
    %243 = arith.truncf %242 : vector<16x8xf32> to vector<16x8xbf16>
    %c56 = arith.constant 56 : index
    %c0_59 = arith.constant 0 : index
    %244 = vector.load %arg5[%c56, %c0_59] : memref<64x64xbf16, #tpu.memory_space<vmem>>, vector<8x64xbf16>
    %cst_60 = arith.constant dense<0.000000e+00> : vector<16x64xf32>
    %245 = tpu.matmul %243, %244, %cst_60 {dimension_numbers = #tpu.dot_dimension_numbers<[1], [0], [0], [1], [0, 0, 1, 1], [], []>} : vector<16x8xbf16>, vector<8x64xbf16>, vector<16x64xf32> -> vector<16x64xf32>
    %246 = arith.addf %217, %245 : vector<16x64xf32>
    %c0_61 = arith.constant 0 : index
    %c0_62 = arith.constant 0 : index
    %247 = vector.load %arg6[%c0_61, %c0_62] : memref<1x64xf32, #tpu.memory_space<vmem>>, vector<1x64xf32>
    %248 = vector.broadcast %247 : vector<1x64xf32> to vector<16x64xf32>
    %249 = arith.addf %246, %248 : vector<16x64xf32>
    %250 = arith.addf %1, %249 : vector<16x64xf32>
    %c0_63 = arith.constant 0 : index
    %c0_64 = arith.constant 0 : index
    %251 = vector.load %arg11[%c0_63, %c0_64] : memref<1x64xf32, #tpu.memory_space<vmem>>, vector<1x64xf32>
    %c0_65 = arith.constant 0 : index
    %c0_66 = arith.constant 0 : index
    %252 = vector.load %arg12[%c0_65, %c0_66] : memref<1x64xf32, #tpu.memory_space<vmem>>, vector<1x64xf32>
    %cst_67 = arith.constant dense<0.000000e+00> : vector<16xf32>
    %253 = vector.multi_reduction <add>, %250, %cst_67 [1] : vector<16x64xf32> to vector<16xf32>
    %254 = vector.shape_cast %253 : vector<16xf32> to vector<16x1xf32>
    %cst_68 = arith.constant 6.400000e+01 : f32
    %255 = vector.broadcast %cst_68 : f32 to vector<16x1xf32>
    %256 = arith.divf %254, %255 : vector<16x1xf32>
    %257 = vector.broadcast %256 : vector<16x1xf32> to vector<16x64xf32>
    %258 = arith.subf %250, %257 : vector<16x64xf32>
    %259 = arith.mulf %258, %258 : vector<16x64xf32>
    %cst_69 = arith.constant dense<0.000000e+00> : vector<16xf32>
    %260 = vector.multi_reduction <add>, %259, %cst_69 [1] : vector<16x64xf32> to vector<16xf32>
    %261 = vector.shape_cast %260 : vector<16xf32> to vector<16x1xf32>
    %cst_70 = arith.constant 0.0158730168 : f32
    %262 = vector.broadcast %cst_70 : f32 to vector<16x1xf32>
    %263 = arith.mulf %261, %262 : vector<16x1xf32>
    %264 = math.sqrt %263 : vector<16x1xf32>
    %cst_71 = arith.constant 9.99999997E-7 : f32
    %265 = vector.broadcast %cst_71 : f32 to vector<16x1xf32>
    %266 = arith.addf %264, %265 : vector<16x1xf32>
    %267 = vector.broadcast %266 : vector<16x1xf32> to vector<16x64xf32>
    %268 = arith.divf %258, %267 : vector<16x64xf32>
    %269 = vector.broadcast %251 : vector<1x64xf32> to vector<16x64xf32>
    %270 = arith.mulf %269, %268 : vector<16x64xf32>
    %271 = vector.broadcast %252 : vector<1x64xf32> to vector<16x64xf32>
    %272 = arith.addf %270, %271 : vector<16x64xf32>
    %273 = arith.truncf %272 : vector<16x64xf32> to vector<16x64xbf16>
    %c0_72 = arith.constant 0 : index
    %c0_73 = arith.constant 0 : index
    %274 = vector.load %arg7[%c0_72, %c0_73] : memref<64x256xbf16, #tpu.memory_space<vmem>>, vector<64x256xbf16>
    %cst_74 = arith.constant dense<0.000000e+00> : vector<16x256xf32>
    %275 = tpu.matmul %273, %274, %cst_74 {dimension_numbers = #tpu.dot_dimension_numbers<[1], [0], [0], [1], [0, 0, 1, 1], [], []>} : vector<16x64xbf16>, vector<64x256xbf16>, vector<16x256xf32> -> vector<16x256xf32>
    %c0_75 = arith.constant 0 : index
    %c0_76 = arith.constant 0 : index
    %276 = vector.load %arg8[%c0_75, %c0_76] : memref<1x256xf32, #tpu.memory_space<vmem>>, vector<1x256xf32>
    %277 = vector.broadcast %276 : vector<1x256xf32> to vector<16x256xf32>
    %278 = arith.addf %275, %277 : vector<16x256xf32>
    %cst_77 = arith.constant 0.000000e+00 : f32
    %279 = vector.broadcast %cst_77 : f32 to vector<16x256xf32>
    %280 = arith.maximumf %278, %279 : vector<16x256xf32>
    %281 = arith.truncf %280 : vector<16x256xf32> to vector<16x256xbf16>
    %c0_78 = arith.constant 0 : index
    %c0_79 = arith.constant 0 : index
    %282 = vector.load %arg9[%c0_78, %c0_79] : memref<256x64xbf16, #tpu.memory_space<vmem>>, vector<256x64xbf16>
    %cst_80 = arith.constant dense<0.000000e+00> : vector<16x64xf32>
    %283 = tpu.matmul %281, %282, %cst_80 {dimension_numbers = #tpu.dot_dimension_numbers<[1], [0], [0], [1], [0, 0, 1, 1], [], []>} : vector<16x256xbf16>, vector<256x64xbf16>, vector<16x64xf32> -> vector<16x64xf32>
    %c0_81 = arith.constant 0 : index
    %c0_82 = arith.constant 0 : index
    %284 = vector.load %arg10[%c0_81, %c0_82] : memref<1x64xf32, #tpu.memory_space<vmem>>, vector<1x64xf32>
    %285 = vector.broadcast %284 : vector<1x64xf32> to vector<16x64xf32>
    %286 = arith.addf %283, %285 : vector<16x64xf32>
    %287 = arith.addf %272, %286 : vector<16x64xf32>
    %c0_83 = arith.constant 0 : index
    %c0_84 = arith.constant 0 : index
    %288 = vector.load %arg13[%c0_83, %c0_84] : memref<1x64xf32, #tpu.memory_space<vmem>>, vector<1x64xf32>
    %c0_85 = arith.constant 0 : index
    %c0_86 = arith.constant 0 : index
    %289 = vector.load %arg14[%c0_85, %c0_86] : memref<1x64xf32, #tpu.memory_space<vmem>>, vector<1x64xf32>
    %cst_87 = arith.constant dense<0.000000e+00> : vector<16xf32>
    %290 = vector.multi_reduction <add>, %287, %cst_87 [1] : vector<16x64xf32> to vector<16xf32>
    %291 = vector.shape_cast %290 : vector<16xf32> to vector<16x1xf32>
    %cst_88 = arith.constant 6.400000e+01 : f32
    %292 = vector.broadcast %cst_88 : f32 to vector<16x1xf32>
    %293 = arith.divf %291, %292 : vector<16x1xf32>
    %294 = vector.broadcast %293 : vector<16x1xf32> to vector<16x64xf32>
    %295 = arith.subf %287, %294 : vector<16x64xf32>
    %296 = arith.mulf %295, %295 : vector<16x64xf32>
    %cst_89 = arith.constant dense<0.000000e+00> : vector<16xf32>
    %297 = vector.multi_reduction <add>, %296, %cst_89 [1] : vector<16x64xf32> to vector<16xf32>
    %298 = vector.shape_cast %297 : vector<16xf32> to vector<16x1xf32>
    %cst_90 = arith.constant 0.0158730168 : f32
    %299 = vector.broadcast %cst_90 : f32 to vector<16x1xf32>
    %300 = arith.mulf %298, %299 : vector<16x1xf32>
    %301 = math.sqrt %300 : vector<16x1xf32>
    %cst_91 = arith.constant 9.99999997E-7 : f32
    %302 = vector.broadcast %cst_91 : f32 to vector<16x1xf32>
    %303 = arith.addf %301, %302 : vector<16x1xf32>
    %304 = vector.broadcast %303 : vector<16x1xf32> to vector<16x64xf32>
    %305 = arith.divf %295, %304 : vector<16x64xf32>
    %306 = vector.broadcast %288 : vector<1x64xf32> to vector<16x64xf32>
    %307 = arith.mulf %306, %305 : vector<16x64xf32>
    %308 = vector.broadcast %289 : vector<1x64xf32> to vector<16x64xf32>
    %309 = arith.addf %307, %308 : vector<16x64xf32>
    %310 = vector.shape_cast %309 : vector<16x64xf32> to vector<2x8x64xf32>
    %c0_92 = arith.constant 0 : index
    %c0_93 = arith.constant 0 : index
    %c0_94 = arith.constant 0 : index
    %311 = vector.load %arg15[%c0_92, %c0_93, %c0_94] : memref<2x8x64xf32, #tpu.memory_space<vmem>>, vector<2x8x64xf32>
    tpu.vector_store %arg15[%c0_92, %c0_93, %c0_94], %310 {strides = array<i32>} : memref<2x8x64xf32, #tpu.memory_space<vmem>>, vector<2x8x64xf32>,
    return
  }
  func.func @transform_0(%arg0: i32) -> (i32, i32, i32) {
    %c0_i32 = arith.constant 0 : i32
    %c0_i32_0 = arith.constant 0 : i32
    %c0_i32_1 = arith.constant 0 : i32
    return %arg0, %c0_i32, %c0_i32_0 : i32, i32, i32
  }
  func.func @transform_1(%arg0: i32) -> (i32, i32, i32) {
    %c0_i32 = arith.constant 0 : i32
    %c0_i32_0 = arith.constant 0 : i32
    %c0_i32_1 = arith.constant 0 : i32
    return %arg0, %c0_i32, %c0_i32_0 : i32, i32, i32
  }
  func.func @transform_2(%arg0: i32) -> (i32, i32) {
    %c0_i32 = arith.constant 0 : i32
    %c0_i32_0 = arith.constant 0 : i32
    %c0_i32_1 = arith.constant 0 : i32
    return %c0_i32, %c0_i32_0 : i32, i32
  }
  func.func @transform_3(%arg0: i32) -> (i32, i32) {
    %c0_i32 = arith.constant 0 : i32
    %c0_i32_0 = arith.constant 0 : i32
    %c0_i32_1 = arith.constant 0 : i32
    return %c0_i32, %c0_i32_0 : i32, i32
  }
  func.func @transform_4(%arg0: i32) -> (i32, i32) {
    %c0_i32 = arith.constant 0 : i32
    %c0_i32_0 = arith.constant 0 : i32
    %c0_i32_1 = arith.constant 0 : i32
    return %c0_i32, %c0_i32_0 : i32, i32
  }
  func.func @transform_5(%arg0: i32) -> (i32, i32) {
    %c0_i32 = arith.constant 0 : i32
    %c0_i32_0 = arith.constant 0 : i32
    %c0_i32_1 = arith.constant 0 : i32
    return %c0_i32, %c0_i32_0 : i32, i32
  }
  func.func @transform_6(%arg0: i32) -> (i32, i32) {
    %c0_i32 = arith.constant 0 : i32
    %c0_i32_0 = arith.constant 0 : i32
    %c0_i32_1 = arith.constant 0 : i32
    return %c0_i32, %c0_i32_0 : i32, i32
  }
  func.func @transform_7(%arg0: i32) -> (i32, i32) {
    %c0_i32 = arith.constant 0 : i32
    %c0_i32_0 = arith.constant 0 : i32
    %c0_i32_1 = arith.constant 0 : i32
    return %c0_i32, %c0_i32_0 : i32, i32
  }
  func.func @transform_8(%arg0: i32) -> (i32, i32) {
    %c0_i32 = arith.constant 0 : i32
    %c0_i32_0 = arith.constant 0 : i32
    %c0_i32_1 = arith.constant 0 : i32
    return %c0_i32, %c0_i32_0 : i32, i32
  }
  func.func @transform_9(%arg0: i32) -> (i32, i32) {
    %c0_i32 = arith.constant 0 : i32
    %c0_i32_0 = arith.constant 0 : i32
    %c0_i32_1 = arith.constant 0 : i32
    return %c0_i32, %c0_i32_0 : i32, i32
  }
  func.func @transform_10(%arg0: i32) -> (i32, i32) {
    %c0_i32 = arith.constant 0 : i32
    %c0_i32_0 = arith.constant 0 : i32
    %c0_i32_1 = arith.constant 0 : i32
    return %c0_i32, %c0_i32_0 : i32, i32
  }
  func.func @transform_11(%arg0: i32) -> (i32, i32) {
    %c0_i32 = arith.constant 0 : i32
    %c0_i32_0 = arith.constant 0 : i32
    %c0_i32_1 = arith.constant 0 : i32
    return %c0_i32, %c0_i32_0 : i32, i32
  }
  func.func @transform_12(%arg0: i32) -> (i32, i32) {
    %c0_i32 = arith.constant 0 : i32
    %c0_i32_0 = arith.constant 0 : i32
    %c0_i32_1 = arith.constant 0 : i32
    return %c0_i32, %c0_i32_0 : i32, i32
  }
  func.func @transform_13(%arg0: i32) -> (i32, i32) {
    %c0_i32 = arith.constant 0 : i32
    %c0_i32_0 = arith.constant 0 : i32
    %c0_i32_1 = arith.constant 0 : i32
    return %c0_i32, %c0_i32_0 : i32, i32
  }
  func.func @transform_14(%arg0: i32) -> (i32, i32, i32) {
    %c0_i32 = arith.constant 0 : i32
    %c0_i32_0 = arith.constant 0 : i32
    %c0_i32_1 = arith.constant 0 : i32
    return %arg0, %c0_i32, %c0_i32_0 : i32, i32, i32
  }
}

</mosaic_0001>

<bundles_post_ra>
// kernel: tpu_custom_call.1
= control target key start
LH: loop header
LB: loop body
LE: loop exit
PB: predicated region body
PF: predicated region fallthrough
CT: control target
= control target key end

     0   :  { %s2646_s0 = inlined_call_operand.vmem [shape: f32[2,8,64], index: 0, kind: input, shape index: {}]   ;;  %s2647_s1 = inlined_call_operand.vmem [shape: s32[2,1,8], index: 1, kind: input, shape index: {}]   ;;  %s2648_s2 = inlined_call_operand.vmem [shape: bf16[64,192], index: 2, kind: input, shape index: {}]   ;;  %s2649_s3 = inlined_call_operand.vmem [shape: f32[1,192], index: 3, kind: input, shape index: {}]   ;;  %s2650_s4 = inlined_call_operand.vmem [shape: bf16[64,64], index: 4, kind: input, shape index: {}]   ;;  %s2651_s5 = inlined_call_operand.vmem [shape: f32[1,64], index: 5, kind: input, shape index: {}]   ;;  %s2652_s6 = inlined_call_operand.vmem [shape: bf16[64,256], index: 6, kind: input, shape index: {}]   ;;  %s2653_s7 = inlined_call_operand.vmem [shape: f32[1,256], index: 7, kind: input, shape index: {}]   ;;  %s2654_s8 = inlined_call_operand.vmem [shape: bf16[256,64], index: 8, kind: input, shape index: {}]   ;;  %s2655_s9 = inlined_call_operand.vmem [shape: f32[1,64], index: 9, kind: input, shape index: {}]   ;;  %s2656_s10 = inlined_call_operand.vmem [shape: f32[1,64], index: 10, kind: input, shape index: {}]   ;;  %s2657_s11 = inlined_call_operand.vmem [shape: f32[1,64], index: 11, kind: input, shape index: {}]   ;;  %s2658_s12 = inlined_call_operand.vmem [shape: f32[1,64], index: 12, kind: input, shape index: {}]   ;;  %s2659_s13 = inlined_call_operand.vmem [shape: f32[1,64], index: 13, kind: input, shape index: {}]   ;;  %s2660_s14 = inlined_call_operand.hbm [shape: f32[2,8,64], index: 14, kind: output, shape index: {}]  }
   0x1   :  { %v1735_v0 = vld [vmem:[%s2648_s2 + $0x30] sm:$0xf]  ;;  %v1888_v1 = vld [vmem:[%s2648_s2 + $0x34] sm:$0xf0]  ;;  %v1727_v2 = vld [vmem:[%s2648_s2 + $0x20] sm:$0xf] }
   0x2   :  { %v1736_v3 = vor.u32 %v1888_v1, %v1735_v0  ;;  %v1886_v4 = vld [vmem:[%s2648_s2 + $0x24] sm:$0xf0]  ;;  %v1719_v6 = vld [vmem:[%s2648_s2 + $0x10] sm:$0xf]  ;;  %v1884_v7 = vld [vmem:[%s2648_s2 + $0x14] sm:$0xf0] }
   0x3   :  { %v1728_v5 = vor.u32 %v1886_v4, %v1727_v2 }
   0x4   :  { %114 = vmatpush.bf16.msra.mxu0 %v1736_v3 }
   0x5   :  { %19 = vsyncpa [#allocation3], 0  ;;  %v1720_v8 = vor.u32 %v1884_v7, %v1719_v6  ;;  %v1711_v9 = vld [vmem:[%s2648_s2] sm:$0xf]  ;;  %v1882_v10 = vld [vmem:[%s2648_s2 + $0x4] sm:$0xf0] }
   0x6   :  { %v1712_v11 = vor.u32 %v1882_v10, %v1711_v9  ;;  %v49_v12 = vld [vmem:[%s2646_s0] sm:$0xff]  ;;  %v50_v13 = vld [vmem:[%s2646_s0 + $0x8] sm:$0xff]  ;;  %vm106_vm0 = vcmask 523264   ;;  %s2048_s19 = smov 120   ;;  %s2049_s20 = smov 64   ;;  %vm159_vm1 = vcmask 64512  }
   0x7   :  { %v51_v14 = vpack.c.bf16 %v50_v13, %v49_v12  ;;  %v2176_v15 = vld [vmem:[%s2649_s3] sm:$0x3]  ;;  %s2050_s3 = smov 56   ;;  %v1887_v27 = vld [vmem:[%s2648_s2 + $0x34] sm:$0xf]  ;;  %v2051_v54 = vmov 0.0  }
   0x8   :  { %115 = vmatpush.bf16.msra.mxu0 %v1728_v5  ;;  %v62_v16 = vperm.slane %v2176_v15, 0  ;;  %v1737_v28 = vld [vmem:[%s2648_s2 + $0x38] sm:$0xf0]  ;;  %v1885_v30 = vld [vmem:[%s2648_s2 + $0x24] sm:$0xf]  ;;  %v63_v50 = vperm.slane %v2176_v15, 1 }
   0x9   :  { %v1740_v29 = vor.u32 %v1887_v27, %v1737_v28  ;;  %v1729_v31 = vld [vmem:[%s2648_s2 + $0x28] sm:$0xf0]  ;;  %v1883_v33 = vld [vmem:[%s2648_s2 + $0x14] sm:$0xf]  ;;  %v1721_v34 = vld [vmem:[%s2648_s2 + $0x18] sm:$0xf0] }
   0xa   :  { %v1732_v32 = vor.u32 %v1885_v30, %v1729_v31  ;;  %v1881_v35 = vld [vmem:[%s2648_s2 + $0x4] sm:$0xf]  ;;  %v1724_v36 = vor.u32 %v1883_v33, %v1721_v34  ;;  %v1713_v37 = vld [vmem:[%s2648_s2 + $0x8] sm:$0xf0]  ;;  %v138_v53 = vld [vmem:[%s2647_s1] sm:$0x1] }
   0xb   :  { %128 = vmatpush.bf16.msra.mxu1 %v1740_v29  ;;  %v1716_v38 = vor.u32 %v1881_v35, %v1713_v37  ;;  %vm140_vm2 = vcmp.ne.s32.totalorder %v138_v53, 0  ;;  %s2052_s22 = smov 48   ;;  %v139_v9 = vld [vmem:[%s2647_s1 + $0x1] sm:$0x1]  ;;  %vm230_vm4 = vcmask 1043456   ;;  %s2053_s1 = smov 104  }
   0xc   :  { %116 = vmatpush.bf16.msra.mxu0 %v1720_v8  ;;  %v142_v55 = vsel %vm140_vm2, -1e+09, %v2051_v54  ;;  %vm141_vm3 = vcmp.ne.s32.totalorder %v139_v9, 0  ;;  %s2054_s25 = smov 112   ;;  %s2056_s30 = smov 32  }
   0xd   :  { %v2228_v56 = vperm.slane %v142_v55, 0  ;;  %v143_v10 = vsel %vm141_vm3, -1e+09, %v2051_v54  ;;  %s2057_s15 = smov 96   ;;  %s2058_s16 = smov 24  }
   0xe   :  { %s2059_s17 = smov 88   ;;  %s2061_s2 = smov 80  }
   0xf   :  { %129 = vmatpush.bf16.msra.mxu1 %v1732_v32  ;;  %s2062_s23 = smov 8   ;;  %s2063_s26 = smov 72  }
  0x10   :  { %117 = vmatpush.bf16.msra.mxu0 %v1712_v11  ;;  %v2243_v11 = vperm.slane %v143_v10, 0 }
  0x13   :  { %1741 = vmatmul.msk.bf16.vlgmr.msra.gmra.mxu0 %vm106_vm0, %v51_v14  ;;  %130 = vmatpush.bf16.msra.mxu1 %v1724_v36 }
  0x17   :  { %131 = vmatpush.bf16.msra.mxu1 %v1716_v38 }
  0x1a   :  { %1742 = vmatmul.msk.bf16.vlgmr.msra.gmra.mxu1 %vm106_vm0, %v51_v14 }
  0x90   :  { %v119_v17 = vpop.f32.mrf.mxu0 }
  0x91   :  { %v120_v18 = vadd.f32 %v119_v17, %v62_v16 }
  0x93   :  { %v144_v19 = vpack.c.bf16 %v120_v18, %v120_v18 }
  0x95   :  { %v155_v20 = vunpack.c.l.b16 %v144_v19 }
  0x97   :  { %v2179_v21 = vpack.c.b16 %v155_v20, %v155_v20  ;;  %v133_v49 = vpop.f32.mrf.mxu1 }
  0x98   :  { %v121_v22 = vpop.f32.mrf.mxu0  ;;  %v134_v60 = vadd.f32 %v133_v49, %v63_v50 }
  0x99   :  { %v122_v23 = vadd.f32 %v121_v22, %v62_v16  ;;  %268 = vrot.lane.b32.xlu1 %v2179_v21, %s2048_s19  ;;  %157 = vrot.lane.b32.xlu0 %v2179_v21, %s2049_s20 }
  0x9a   :  { %v146_v63 = vpack.c.bf16 %v134_v60, %v134_v60 }
  0x9b   :  { %v145_v24 = vpack.c.bf16 %v122_v23, %v122_v23 }
  0x9c   :  { %v339_v0 = vunpack.c.l.b16 %v146_v63 }
  0x9d   :  { %v180_v25 = vunpack.c.l.b16 %v145_v24 }
  0x9e   :  { %v2234_v5 = vpack.c.b16 %v339_v0, %v339_v0 }
  0x9f   :  { %v2184_v26 = vpack.c.b16 %v180_v25, %v180_v25  ;;  %v135_v51 = vpop.f32.mrf.mxu1 }
  0xa0   :  { %v136_v52 = vadd.f32 %v135_v51, %v63_v50 }
  0xa1   :  { %293 = vrot.lane.b32.xlu2 %v2184_v26, %s2050_s3  ;;  %182 = vrot.lane.b32.xlu1 %v2184_v26, %s2049_s20 }
  0xa2   :  { %270 = vrot.lane.b32.xlu0 %v2179_v21, %s2050_s3  ;;  %v147_v16 = vpack.c.bf16 %v136_v52, %v136_v52  ;;  %s2060_s3 = smov 16  }
  0xa4   :  { %v363_v17 = vunpack.c.l.b16 %v147_v16  ;;  %v251_v20 = vsel %vm230_vm4, %v147_v16, 0 }
  0xa5   :  { %260 = vmatpush.bf16.msra.mxu3 %v251_v20 }
  0xa6   :  { %v2249_v18 = vpack.c.b16 %v363_v17, %v363_v17 }
  0xa9   :  { %291 = vrot.lane.b32.xlu2 %v2184_v26, %s2048_s19 }
  0xfb   :  { %v294_v42 = vpop.permute.xlu2 %293 }
  0xfc   :  { %v299_v46 = vsel %vm159_vm1, %v294_v42, 0 }
 0x103   :  { %v292_v48 = vpop.permute.xlu2 %291 }
 0x10b   :  { %v269_v39 = vpop.permute.xlu1 %268  ;;  %v158_v40 = vpop.permute.xlu0 %157 }
 0x10c   :  { %v164_v41 = vsel %vm159_vm1, %v158_v40, 0 }
 0x10d   :  { %173 = vmatpush.bf16.xpose.msrb.mxu0 %v164_v41 }
 0x113   :  { %v183_v43 = vpop.permute.xlu1 %182 }
 0x114   :  { %v271_v44 = vpop.permute.xlu0 %270  ;;  %1743 = vmatmul.msk.bf16.vlgmr.msrb.gmra.mxu0 %vm159_vm1, %v144_v19  ;;  %v188_v45 = vsel %vm159_vm1, %v183_v43, 0  ;;  %v232_v19 = vsel %vm230_vm4, %v146_v63, 0 }
 0x115   :  { %v276_v47 = vsel %vm159_vm1, %v271_v44, 0  ;;  %197 = vmatpush.bf16.xpose.msrb.mxu1 %v188_v45  ;;  %241 = vmatpush.bf16.msra.mxu2 %v232_v19 }
 0x116   :  { %285 = vmatpush.bf16.xpose.msra.mxu0 %v276_v47 }
 0x11c   :  { %1744 = vmatmul.msk.bf16.vlgmr.msrb.gmra.mxu1 %vm159_vm1, %v145_v24 }
 0x11d   :  { %308 = vmatpush.bf16.xpose.msra.mxu1 %v299_v46 }
 0x124   :  { %1747 = vmatmul.msk.bf16.vlgmr.msra.gmra.mxu0 %vm159_vm1, %v269_v39 }
 0x12c   :  { %1748 = vmatmul.msk.bf16.vlgmr.msra.gmra.mxu1 %vm159_vm1, %v292_v48  ;;  %v387_v48 = vld [vmem:[%s2650_s4 + $0x4] sm:$0xf] }
 0x12d   :  { %v392_v49 = vsel %vm230_vm4, %v387_v48, 0 }
 0x12e   :  { %401 = vmatpush.bf16.msrb.mxu0 %v392_v49 }
 0x191   :  { %v175_v57 = vpop.f32.mrf.mxu0 }
 0x192   :  { %v176_v58 = vadd.f32 %v175_v57, %v2228_v56 }
 0x194   :  { %v203_v59 = vsel %vm159_vm1, %v176_v58, -inf }
 0x195   :  { %204 = vmax.xlane.f32.xlu0 %v203_v59 }
 0x199   :  { %v177_v61 = vpop.f32.mrf.mxu0  ;;  %v199_v62 = vpop.f32.mrf.mxu1 }
 0x19a   :  { %v200_v12 = vadd.f32 %v199_v62, %v2243_v11 }
 0x19c   :  { %v206_v13 = vsel %vm159_vm1, %v200_v12, -inf }
 0x1a1   :  { %v201_v1 = vpop.f32.mrf.mxu1  ;;  %v287_v2 = vpop.f32.mrf.mxu0 }
 0x1a2   :  { %v288_v3 = vadd.f32 %v287_v2, %v2228_v56 }
 0x1a4   :  { %v314_v4 = vsel %vm159_vm1, %v288_v3, -inf }
 0x1a5   :  { %315 = vmax.xlane.f32.xlu1 %v314_v4 }
 0x1a9   :  { %v310_v6 = vpop.f32.mrf.mxu1  ;;  %341 = vrot.lane.b32.xlu0 %v2234_v5, %s2048_s19  ;;  %v289_v7 = vpop.f32.mrf.mxu0 }
 0x1aa   :  { %v311_v14 = vadd.f32 %v310_v6, %v2243_v11 }
 0x1ac   :  { %v317_v15 = vsel %vm159_vm1, %v311_v14, -inf }
 0x1b1   :  { %v312_v8 = vpop.f32.mrf.mxu1 }
 0x1be   :  { %430 = vrot.lane.b32.xlu1 %v2179_v21, %s2052_s22 }
 0x1d3   :  { %207 = vmax.xlane.f32.xlu0 %v206_v13 }
 0x1e8   :  { %318 = vmax.xlane.f32.xlu1 %v317_v15 }
 0x201   :  { %365 = vrot.lane.b32.xlu1 %v2249_v18, %s2048_s19  ;;  %s2055_s19 = smov 40  }
 0x208   :  { %v205_v22 = vpop.xlane.xlu0 %204 }
 0x209   :  { %v209_v23 = vsub.f32 %v176_v58, %v205_v22  ;;  %564 = vrot.lane.b32.xlu1 %v2179_v21, %s2053_s1 }
 0x20b   :  { %v211_v24 = vmul.f32 1.442695, %v209_v23 }
 0x20d   :  { %1938 = vpow2.f32 %v211_v24 }
 0x211   :  { %498 = vrot.lane.b32.xlu1 %v2234_v5, %s2054_s25 }
 0x213   :  { %v1939_v25 = vpop.eup %1938 }
 0x214   :  { %v215_v27 = vsel %vm159_vm1, %v1939_v25, 0.0 }
 0x215   :  { %216 = vadd.xlane.f32.xlu2 %v215_v27 }
 0x218   :  { %v316_v28 = vpop.xlane.xlu1 %315 }
 0x219   :  { %v320_v29 = vsub.f32 %v288_v3, %v316_v28  ;;  %589 = vrot.lane.b32.xlu1 %v2184_v26, %s2055_s19 }
 0x21b   :  { %v322_v30 = vmul.f32 1.442695, %v320_v29  ;;  %v342_v33 = vpop.permute.xlu0 %341 }
 0x21c   :  { %v347_v46 = vsel %vm230_vm4, %v342_v33, 0 }
 0x21d   :  { %1940 = vpow2.f32 %v322_v30  ;;  %356 = vmatpush.bf16.msrb.mxu2 %v347_v46 }
 0x221   :  { %587 = vrot.lane.b32.xlu1 %v2184_v26, %s2053_s1 }
 0x223   :  { %v1941_v31 = vpop.eup %1940 }
 0x224   :  { %v326_v32 = vsel %vm159_vm1, %v1941_v31, 0.0 }
 0x225   :  { %327 = vadd.xlane.f32.xlu2 %v326_v32 }
 0x230   :  { %v431_v35 = vpop.permute.xlu1 %430 }
 0x231   :  { %v436_v58 = vsel %vm159_vm1, %v431_v35, 0 }
 0x23d   :  { %428 = vrot.lane.b32.xlu2 %v2179_v21, %s2054_s25 }
 0x246   :  { %v208_v34 = vpop.xlane.xlu0 %207 }
 0x247   :  { %v210_v36 = vsub.f32 %v200_v12, %v208_v34 }
 0x249   :  { %v213_v37 = vmul.f32 1.442695, %v210_v36 }
 0x24b   :  { %1942 = vpow2.f32 %v213_v37 }
 0x251   :  { %v1943_v41 = vpop.eup %1942 }
 0x252   :  { %v218_v42 = vsel %vm159_vm1, %v1943_v41, 0.0 }
 0x25b   :  { %v319_v38 = vpop.xlane.xlu1 %318 }
 0x25c   :  { %v321_v39 = vsub.f32 %v311_v14, %v319_v38 }
 0x25e   :  { %v324_v40 = vmul.f32 1.442695, %v321_v39 }
 0x260   :  { %1944 = vpow2.f32 %v324_v40 }
 0x266   :  { %v1945_v43 = vpop.eup %1944  ;;  %219 = vadd.xlane.f32.xlu2 %v218_v42 }
 0x267   :  { %v329_v44 = vsel %vm159_vm1, %v1945_v43, 0.0 }
 0x268   :  { %330 = vadd.xlane.f32.xlu0 %v329_v44 }
 0x273   :  { %v366_v45 = vpop.permute.xlu1 %365 }
 0x274   :  { %v371_v50 = vsel %vm230_vm4, %v366_v45, 0 }
 0x275   :  { %380 = vmatpush.bf16.msrb.mxu3 %v371_v50 }
 0x27b   :  { %v565_v47 = vpop.permute.xlu1 %564 }
 0x27c   :  { %453 = vrot.lane.b32.xlu0 %v2184_v26, %s2052_s22 }
 0x27e   :  { %451 = vrot.lane.b32.xlu2 %v2184_v26, %s2054_s25 }
 0x283   :  { %v499_v51 = vpop.permute.xlu1 %498 }
 0x284   :  { %v504_v52 = vsel %vm230_vm4, %v499_v51, 0  ;;  %566 = vrot.lane.b32.xlu0 %v2179_v21, %s2055_s19 }
 0x285   :  { %513 = vmatpush.bf16.msra.mxu0 %v504_v52 }
 0x288   :  { %v217_v53 = vpop.xlane.xlu2 %216 }
 0x289   :  { %1946 = vrcp.f32 %v217_v53 }
 0x28f   :  { %v1947_v54 = vpop.eup %1946 }
 0x290   :  { %v223_v55 = vmul.f32 %v1947_v54, %v1939_v25  ;;  %v267_v25 = vld [vmem:[%s2650_s4] sm:$0xf] }
 0x291   :  { %v412_v27 = vsel %vm230_vm4, %v267_v25, 0 }
 0x292   :  { %v225_v57 = vpack.c.bf16 %v223_v55, %v223_v55  ;;  %421 = vmatpush.bf16.msrb.mxu1 %v412_v27 }
 0x294   :  { %1745 = vmatmul.msk.bf16.vlgmr.msra.gmra.mxu2 %vm159_vm1, %v225_v57 }
 0x295   :  { %445 = vmatpush.bf16.xpose.msra.mxu2 %v436_v58 }
 0x298   :  { %v328_v59 = vpop.xlane.xlu2 %327 }
 0x299   :  { %1948 = vrcp.f32 %v328_v59 }
 0x29f   :  { %v1949_v60 = vpop.eup %1948 }
 0x2a0   :  { %v334_v61 = vmul.f32 %v1949_v60, %v1941_v31  ;;  %v429_v63 = vpop.permute.xlu2 %428  ;;  %v590_v31 = vpop.permute.xlu1 %589 }
 0x2a1   :  { %v595_v34 = vsel %vm159_vm1, %v590_v31, 0 }
 0x2a2   :  { %v336_v62 = vpack.c.bf16 %v334_v61, %v334_v61 }
 0x2a4   :  { %1749 = vmatmul.msk.bf16.vlgmr.msrb.gmra.mxu2 %vm159_vm1, %v336_v62 }
 0x2a8   :  { %v588_v48 = vpop.permute.xlu1 %587 }
 0x2b4   :  { %1753 = vmatmul.msk.bf16.vlgmr.msra.gmra.mxu2 %vm159_vm1, %v429_v63 }
 0x2d9   :  { %v220_v0 = vpop.xlane.xlu2 %219 }
 0x2da   :  { %1950 = vrcp.f32 %v220_v0 }
 0x2db   :  { %v331_v3 = vpop.xlane.xlu0 %330 }
 0x2dc   :  { %1952 = vrcp.f32 %v331_v3 }
 0x2e0   :  { %v1951_v1 = vpop.eup %1950 }
 0x2e1   :  { %v224_v2 = vmul.f32 %v1951_v1, %v1943_v41  ;;  %v452_v14 = vpop.permute.xlu2 %451 }
 0x2e2   :  { %v1953_v6 = vpop.eup %1952 }
 0x2e3   :  { %v226_v4 = vpack.c.bf16 %v224_v2, %v224_v2  ;;  %v335_v8 = vmul.f32 %v1953_v6, %v1945_v43 }
 0x2e5   :  { %1746 = vmatmul.msk.bf16.vlgmr.msra.gmra.mxu3 %vm159_vm1, %v226_v4  ;;  %v337_v10 = vpack.c.bf16 %v335_v8, %v335_v8 }
 0x2ee   :  { %v454_v7 = vpop.permute.xlu0 %453 }
 0x2ef   :  { %v459_v9 = vsel %vm159_vm1, %v454_v7, 0 }
 0x2f0   :  { %468 = vmatpush.bf16.xpose.msra.mxu3 %v459_v9 }
 0x2f5   :  { %1750 = vmatmul.msk.bf16.vlgmr.msrb.gmra.mxu3 %vm159_vm1, %v337_v10 }
 0x2f6   :  { %v567_v12 = vpop.permute.xlu0 %566 }
 0x2f7   :  { %v572_v13 = vsel %vm159_vm1, %v567_v12, 0 }
 0x2f8   :  { %581 = vmatpush.bf16.xpose.msrb.mxu3 %v572_v13 }
 0x305   :  { %1754 = vmatmul.msk.bf16.vlgmr.msra.gmra.mxu3 %vm159_vm1, %v452_v14 }
 0x315   :  { %1758 = vmatmul.msk.bf16.vlgmr.msrb.gmra.mxu3 %vm159_vm1, %v565_v47 }
 0x317   :  { %v243_v15 = vpop.f32.mrf.mxu2 }
 0x31f   :  { %v245_v16 = vpop.f32.mrf.mxu2 }
 0x327   :  { %v358_v17 = vpop.f32.mrf.mxu2 }
 0x32f   :  { %v360_v19 = vpop.f32.mrf.mxu2 }
 0x337   :  { %v447_v20 = vpop.f32.mrf.mxu2 }
 0x338   :  { %v448_v22 = vadd.f32 %v447_v20, %v2228_v56 }
 0x33a   :  { %v474_v23 = vsel %vm159_vm1, %v448_v22, -inf }
 0x33b   :  { %475 = vmax.xlane.f32.xlu2 %v474_v23 }
 0x33f   :  { %v449_v24 = vpop.f32.mrf.mxu2 }
 0x353   :  { %702 = vrot.lane.b32.xlu2 %v2179_v21, %s2056_s30 }
 0x368   :  { %v262_v28 = vpop.f32.mrf.mxu3 }
 0x369   :  { %v266_v29 = vpack.c.bf16 %v262_v28, %v243_v15 }
 0x36b   :  { %1752 = vmatmul.msk.bf16.vlgmr.msrb.gmra.mxu1 %vm159_vm1, %v266_v29 }
 0x370   :  { %v264_v30 = vpop.f32.mrf.mxu3 }
 0x378   :  { %v382_v32 = vpop.f32.mrf.mxu3 }
 0x379   :  { %v386_v33 = vpack.c.bf16 %v382_v32, %v358_v17 }
 0x37b   :  { %1751 = vmatmul.msk.bf16.vlgmr.msrb.gmra.mxu0 %vm159_vm1, %v386_v33  ;;  %v541_v33 = vld [vmem:[%s2650_s4 + $0x8] sm:$0xf] }
 0x37c   :  { %604 = vmatpush.bf16.xpose.msrb.mxu0 %v595_v34  ;;  %v546_v34 = vsel %vm230_vm4, %v541_v33, 0 }
 0x37d   :  { %555 = vmatpush.bf16.msrb.mxu2 %v546_v34 }
 0x380   :  { %v384_v35 = vpop.f32.mrf.mxu3 }
 0x388   :  { %v470_v36 = vpop.f32.mrf.mxu3 }
 0x389   :  { %v471_v37 = vadd.f32 %v470_v36, %v2243_v11 }
 0x38b   :  { %v477_v38 = vsel %vm159_vm1, %v471_v37, -inf }
 0x38c   :  { %478 = vmax.xlane.f32.xlu1 %v477_v38 }
 0x390   :  { %v472_v39 = vpop.f32.mrf.mxu3 }
 0x398   :  { %v583_v40 = vpop.f32.mrf.mxu3 }
 0x399   :  { %v584_v47 = vadd.f32 %v583_v40, %v2228_v56 }
 0x39b   :  { %v610_v51 = vsel %vm159_vm1, %v584_v47, -inf }
 0x3a0   :  { %v585_v41 = vpop.f32.mrf.mxu3 }
 0x3a5   :  { %519 = vrot.lane.b32.xlu1 %v2249_v18, %s2054_s25  ;;  %s1697_s25 = sshll.u32 %s2660_s14, 4  ;;  %s1698_s25 = int_to_ptr.hbm [resolvable:$true] %s1697_s25 }
 0x3ae   :  { %v476_v42 = vpop.xlane.xlu2 %475 }
 0x3af   :  { %v480_v43 = vsub.f32 %v448_v22, %v476_v42 }
 0x3b1   :  { %v482_v44 = vmul.f32 1.442695, %v480_v43 }
 0x3b3   :  { %1954 = vpow2.f32 %v482_v44 }
 0x3b6   :  { %v703_v0 = vpop.permute.xlu2 %702 }
 0x3b7   :  { %v708_v2 = vsel %vm159_vm1, %v703_v0, 0 }
 0x3b9   :  { %v1955_v45 = vpop.eup %1954 }
 0x3ba   :  { %v486_v46 = vsel %vm159_vm1, %v1955_v45, 0.0 }
 0x3bb   :  { %487 = vadd.xlane.f32.xlu0 %v486_v46 }
 0x3cf   :  { %700 = vrot.lane.b32.xlu0 %v2179_v21, %s2057_s15 }
 0x3e8   :  { %v423_v49 = vpop.f32.mrf.mxu1 }
 0x3f0   :  { %v2354_v42 = vpop.f32.mrf.mxu1 }
 0x3f8   :  { %v403_v50 = vpop.f32.mrf.mxu0 }
 0x3f9   :  { %v2312_v52 = vadd.f32 %v423_v49, %v403_v50  ;;  %611 = vmax.xlane.f32.xlu0 %v610_v51 }
 0x3ff   :  { %v479_v53 = vpop.xlane.xlu1 %478 }
 0x400   :  { %v481_v54 = vsub.f32 %v471_v37, %v479_v53  ;;  %v2334_v20 = vpop.f32.mrf.mxu0 }
 0x402   :  { %v484_v55 = vmul.f32 1.442695, %v481_v54 }
 0x404   :  { %1956 = vpow2.f32 %v484_v55 }
 0x40a   :  { %v1957_v57 = vpop.eup %1956 }
 0x40b   :  { %v489_v58 = vsel %vm159_vm1, %v1957_v57, 0.0 }
 0x40c   :  { %490 = vadd.xlane.f32.xlu2 %v489_v58 }
 0x40d   :  { %634 = vrot.lane.b32.xlu0 %v2234_v5, %s2053_s1 }
 0x415   :  { %723 = vrot.lane.b32.xlu0 %v2184_v26, %s2057_s15 }
 0x417   :  { %v520_v59 = vpop.permute.xlu1 %519 }
 0x418   :  { %v525_v60 = vsel %vm230_vm4, %v520_v59, 0 }
 0x419   :  { %534 = vmatpush.bf16.msra.mxu1 %v525_v60 }
 0x41d   :  { %838 = vrot.lane.b32.xlu0 %v2179_v21, %s2058_s16 }
 0x424   :  { %725 = vrot.lane.b32.xlu2 %v2184_v26, %s2056_s30 }
 0x42e   :  { %v488_v61 = vpop.xlane.xlu0 %487 }
 0x42f   :  { %1958 = vrcp.f32 %v488_v61 }
 0x435   :  { %v1959_v62 = vpop.eup %1958 }
 0x436   :  { %v494_v63 = vmul.f32 %v1959_v62, %v1955_v45 }
 0x438   :  { %v496_v1 = vpack.c.bf16 %v494_v63, %v494_v63 }
 0x43a   :  { %1755 = vmatmul.msk.bf16.vlgmr.msra.gmra.mxu0 %vm159_vm1, %v496_v1 }
 0x43b   :  { %717 = vmatpush.bf16.xpose.msra.mxu0 %v708_v2 }
 0x441   :  { %v701_v3 = vpop.permute.xlu0 %700 }
 0x44a   :  { %1759 = vmatmul.msk.bf16.vlgmr.msrb.gmra.mxu0 %vm159_vm1, %v588_v48 }
 0x45a   :  { %1763 = vmatmul.msk.bf16.vlgmr.msra.gmra.mxu0 %vm159_vm1, %v701_v3 }
 0x46c   :  { %v612_v4 = vpop.xlane.xlu0 %611 }
 0x46d   :  { %v616_v6 = vsub.f32 %v584_v47, %v612_v4 }
 0x46f   :  { %v618_v7 = vmul.f32 1.442695, %v616_v6 }
 0x471   :  { %1960 = vpow2.f32 %v618_v7 }
 0x477   :  { %v1961_v8 = vpop.eup %1960 }
 0x478   :  { %v622_v9 = vsel %vm159_vm1, %v1961_v8, 0.0 }
 0x479   :  { %623 = vadd.xlane.f32.xlu1 %v622_v9 }
 0x47f   :  { %v491_v10 = vpop.xlane.xlu2 %490  ;;  %v635_v12 = vpop.permute.xlu0 %634 }
 0x480   :  { %1962 = vrcp.f32 %v491_v10  ;;  %v640_v13 = vsel %vm230_vm4, %v635_v12, 0 }
 0x481   :  { %649 = vmatpush.bf16.msrb.mxu1 %v640_v13 }
 0x486   :  { %v1963_v14 = vpop.eup %1962 }
 0x487   :  { %v495_v15 = vmul.f32 %v1963_v14, %v1957_v57  ;;  %v726_v16 = vpop.permute.xlu2 %725  ;;  %v724_v35 = vpop.permute.xlu0 %723 }
 0x488   :  { %v731_v19 = vsel %vm159_vm1, %v726_v16, 0 }
 0x489   :  { %v497_v17 = vpack.c.bf16 %v495_v15, %v495_v15 }
 0x48b   :  { %1756 = vmatmul.msk.bf16.vlgmr.msra.gmra.mxu1 %vm159_vm1, %v497_v17 }
 0x48c   :  { %740 = vmatpush.bf16.xpose.msra.mxu1 %v731_v19 }
 0x48f   :  { %v839_v39 = vpop.permute.xlu0 %838 }
 0x490   :  { %v844_v41 = vsel %vm159_vm1, %v839_v39, 0 }
 0x492   :  { %836 = vrot.lane.b32.xlu1 %v2179_v21, %s2059_s17 }
 0x4b7   :  { %v515_v22 = vpop.f32.mrf.mxu0 }
 0x4bf   :  { %v517_v23 = vpop.f32.mrf.mxu0 }
 0x4c7   :  { %v606_v24 = vpop.f32.mrf.mxu0 }
 0x4c8   :  { %v607_v25 = vadd.f32 %v606_v24, %v2243_v11 }
 0x4ca   :  { %v613_v27 = vsel %vm159_vm1, %v607_v25, -inf }
 0x4cb   :  { %614 = vmax.xlane.f32.xlu2 %v613_v27 }
 0x4cf   :  { %v608_v28 = vpop.f32.mrf.mxu0 }
 0x4d7   :  { %v719_v29 = vpop.f32.mrf.mxu0 }
 0x4d8   :  { %v720_v30 = vadd.f32 %v719_v29, %v2228_v56 }
 0x4da   :  { %v746_v31 = vsel %vm159_vm1, %v720_v30, -inf }
 0x4db   :  { %747 = vmax.xlane.f32.xlu0 %v746_v31 }
 0x4df   :  { %v721_v32 = vpop.f32.mrf.mxu0 }
 0x4e3   :  { %655 = vrot.lane.b32.xlu2 %v2249_v18, %s2053_s1 }
 0x4eb   :  { %861 = vrot.lane.b32.xlu2 %v2184_v26, %s2058_s16 }
 0x4ec   :  { %v624_v36 = vpop.xlane.xlu1 %623 }
 0x4ed   :  { %1964 = vrcp.f32 %v624_v36 }
 0x4f3   :  { %v1965_v37 = vpop.eup %1964  ;;  %859 = vrot.lane.b32.xlu2 %v2184_v26, %s2059_s17 }
 0x4f4   :  { %v630_v38 = vmul.f32 %v1965_v37, %v1961_v8 }
 0x4f6   :  { %v632_v40 = vpack.c.bf16 %v630_v38, %v630_v38 }
 0x4f8   :  { %1760 = vmatmul.msk.bf16.vlgmr.msrb.gmra.mxu1 %vm159_vm1, %v632_v40 }
 0x4f9   :  { %853 = vmatpush.bf16.xpose.msrb.mxu1 %v844_v41 }
 0x4fb   :  { %974 = vrot.lane.b32.xlu2 %v2179_v21, %s2060_s3 }
 0x504   :  { %v837_v46 = vpop.permute.xlu1 %836 }
 0x508   :  { %v536_v43 = vpop.f32.mrf.mxu1  ;;  %1764 = vmatmul.msk.bf16.vlgmr.msra.gmra.mxu1 %vm159_vm1, %v724_v35 }
 0x509   :  { %v540_v44 = vpack.c.bf16 %v536_v43, %v515_v22 }
 0x50b   :  { %1757 = vmatmul.msk.bf16.vlgmr.msrb.gmra.mxu2 %vm159_vm1, %v540_v44 }
 0x510   :  { %v538_v45 = vpop.f32.mrf.mxu1 }
 0x518   :  { %1768 = vmatmul.msk.bf16.vlgmr.msrb.gmra.mxu1 %vm159_vm1, %v837_v46 }
 0x53e   :  { %v615_v47 = vpop.xlane.xlu2 %614 }
 0x53f   :  { %v617_v48 = vsub.f32 %v607_v25, %v615_v47 }
 0x541   :  { %v620_v49 = vmul.f32 1.442695, %v617_v48 }
 0x543   :  { %1966 = vpow2.f32 %v620_v49 }
 0x546   :  { %v656_v50 = vpop.permute.xlu2 %655 }
 0x547   :  { %v661_v51 = vsel %vm230_vm4, %v656_v50, 0 }
 0x548   :  { %670 = vmatpush.bf16.msra.mxu2 %v661_v51 }
 0x549   :  { %v1967_v53 = vpop.eup %1966 }
 0x54a   :  { %v625_v54 = vsel %vm159_vm1, %v1967_v53, 0.0 }
 0x54b   :  { %626 = vadd.xlane.f32.xlu1 %v625_v54 }
 0x54e   :  { %v748_v55 = vpop.xlane.xlu0 %747  ;;  %v862_v15 = vpop.permute.xlu2 %861 }
 0x54f   :  { %v752_v57 = vsub.f32 %v720_v30, %v748_v55  ;;  %v867_v27 = vsel %vm159_vm1, %v862_v15, 0  ;;  %v813_v15 = vld [vmem:[%s2650_s4 + $0x10] sm:$0xf] }
 0x551   :  { %v754_v58 = vmul.f32 1.442695, %v752_v57 }
 0x553   :  { %1968 = vpow2.f32 %v754_v58 }
 0x556   :  { %v860_v19 = vpop.permute.xlu2 %859 }
 0x559   :  { %v1969_v59 = vpop.eup %1968 }
 0x55a   :  { %v758_v60 = vsel %vm159_vm1, %v1969_v59, 0.0 }
 0x55b   :  { %759 = vadd.xlane.f32.xlu0 %v758_v60 }
 0x55e   :  { %v975_v28 = vpop.permute.xlu2 %974 }
 0x55f   :  { %v980_v30 = vsel %vm159_vm1, %v975_v28, 0 }
 0x56f   :  { %770 = vrot.lane.b32.xlu0 %v2234_v5, %s2057_s15 }
 0x575   :  { %v2364_v61 = vpop.f32.mrf.mxu1 }
 0x577   :  { %972 = vrot.lane.b32.xlu0 %v2179_v21, %s2061_s2 }
 0x57d   :  { %v653_v62 = vpop.f32.mrf.mxu1 }
 0x57f   :  { %791 = vrot.lane.b32.xlu0 %v2249_v18, %s2057_s15 }
 0x585   :  { %v742_v63 = vpop.f32.mrf.mxu1 }
 0x586   :  { %v743_v0 = vadd.f32 %v742_v63, %v2243_v11 }
 0x587   :  { %906 = vrot.lane.b32.xlu0 %v2234_v5, %s2059_s17 }
 0x588   :  { %v749_v1 = vsel %vm159_vm1, %v743_v0, -inf }
 0x589   :  { %750 = vmax.xlane.f32.xlu1 %v749_v1 }
 0x58d   :  { %v744_v2 = vpop.f32.mrf.mxu1 }
 0x58e   :  { %v557_v3 = vpop.f32.mrf.mxu2 }
 0x58f   :  { %v2375_v4 = vadd.f32 %v557_v3, %v2312_v52  ;;  %995 = vrot.lane.b32.xlu0 %v2184_v26, %s2061_s2  ;;  %v677_v52 = vld [vmem:[%s2650_s4 + $0xc] sm:$0xf] }
 0x590   :  { %v682_v16 = vsel %vm230_vm4, %v677_v52, 0  ;;  %v818_v52 = vsel %vm230_vm4, %v813_v15, 0 }
 0x591   :  { %691 = vmatpush.bf16.msra.mxu3 %v682_v16  ;;  %827 = vmatpush.bf16.msrb.mxu0 %v818_v52 }
 0x595   :  { %v855_v6 = vpop.f32.mrf.mxu1 }
 0x596   :  { %v856_v7 = vadd.f32 %v855_v6, %v2228_v56  ;;  %v2397_v45 = vpop.f32.mrf.mxu2 }
 0x598   :  { %v882_v8 = vsel %vm159_vm1, %v856_v7, -inf }
 0x599   :  { %883 = vmax.xlane.f32.xlu1 %v882_v8 }
 0x59d   :  { %v857_v9 = vpop.f32.mrf.mxu1 }
 0x5be   :  { %v627_v10 = vpop.xlane.xlu1 %626 }
 0x5bf   :  { %1970 = vrcp.f32 %v627_v10 }
 0x5c5   :  { %v1971_v12 = vpop.eup %1970 }
 0x5c6   :  { %v631_v13 = vmul.f32 %v1971_v12, %v1967_v53 }
 0x5c8   :  { %v633_v14 = vpack.c.bf16 %v631_v13, %v631_v13 }
 0x5ca   :  { %1761 = vmatmul.msk.bf16.vlgmr.msra.gmra.mxu2 %vm159_vm1, %v633_v14 }
 0x5ce   :  { %v760_v17 = vpop.xlane.xlu0 %759 }
 0x5cf   :  { %1972 = vrcp.f32 %v760_v17 }
 0x5d5   :  { %v1973_v22 = vpop.eup %1972 }
 0x5d6   :  { %v766_v23 = vmul.f32 %v1973_v22, %v1969_v59 }
 0x5d8   :  { %v768_v29 = vpack.c.bf16 %v766_v23, %v766_v23 }
 0x5e1   :  { %v771_v24 = vpop.permute.xlu0 %770 }
 0x5e2   :  { %v776_v25 = vsel %vm230_vm4, %v771_v24, 0 }
 0x5e3   :  { %785 = vmatpush.bf16.msrb.mxu2 %v776_v25 }
 0x5e6   :  { %1765 = vmatmul.msk.bf16.vlgmr.msrb.gmra.mxu2 %vm159_vm1, %v768_v29 }
 0x5e7   :  { %876 = vmatpush.bf16.xpose.msra.mxu2 %v867_v27 }
 0x5e9   :  { %v973_v31 = vpop.permute.xlu0 %972 }
 0x5ef   :  { %989 = vmatpush.bf16.xpose.msrb.mxu2 %v980_v30 }
 0x5f1   :  { %v792_v32 = vpop.permute.xlu0 %791 }
 0x5f2   :  { %v797_v33 = vsel %vm230_vm4, %v792_v32, 0 }
 0x5f3   :  { %806 = vmatpush.bf16.msrb.mxu3 %v797_v33 }
 0x5f6   :  { %1769 = vmatmul.msk.bf16.vlgmr.msra.gmra.mxu2 %vm159_vm1, %v860_v19 }
 0x5f9   :  { %v907_v46 = vpop.permute.xlu0 %906 }
 0x5fa   :  { %v912_v49 = vsel %vm230_vm4, %v907_v46, 0 }
 0x5fc   :  { %v751_v34 = vpop.xlane.xlu1 %750 }
 0x5fd   :  { %v753_v35 = vsub.f32 %v743_v0, %v751_v34 }
 0x5ff   :  { %v756_v36 = vmul.f32 1.442695, %v753_v35 }
 0x601   :  { %1974 = vpow2.f32 %v756_v36  ;;  %v996_v12 = vpop.permute.xlu0 %995 }
 0x606   :  { %1773 = vmatmul.msk.bf16.vlgmr.msrb.gmra.mxu2 %vm159_vm1, %v973_v31 }
 0x607   :  { %v1975_v37 = vpop.eup %1974 }
 0x608   :  { %v761_v38 = vsel %vm159_vm1, %v1975_v37, 0.0 }
 0x609   :  { %762 = vadd.xlane.f32.xlu2 %v761_v38 }
 0x60c   :  { %v884_v39 = vpop.xlane.xlu1 %883 }
 0x60d   :  { %v888_v40 = vsub.f32 %v856_v7, %v884_v39 }
 0x60f   :  { %v890_v41 = vmul.f32 1.442695, %v888_v40 }
 0x611   :  { %1976 = vpow2.f32 %v890_v41 }
 0x617   :  { %v1977_v43 = vpop.eup %1976 }
 0x618   :  { %v894_v44 = vsel %vm159_vm1, %v1977_v43, 0.0 }
 0x619   :  { %895 = vadd.xlane.f32.xlu1 %v894_v44 }
 0x632   :  { %997 = vrot.lane.b32.xlu1 %v2184_v26, %s2060_s3 }
 0x64d   :  { %v672_v47 = vpop.f32.mrf.mxu2 }
 0x64e   :  { %v676_v48 = vpack.c.bf16 %v672_v47, %v2364_v61 }
 0x650   :  { %1762 = vmatmul.msk.bf16.vlgmr.msra.gmra.mxu3 %vm159_vm1, %v676_v48 }
 0x651   :  { %921 = vmatpush.bf16.msra.mxu3 %v912_v49 }
 0x655   :  { %v674_v50 = vpop.f32.mrf.mxu2 }
 0x669   :  { %v787_v51 = vpop.f32.mrf.mxu2 }
 0x671   :  { %v789_v53 = vpop.f32.mrf.mxu2 }
 0x679   :  { %v878_v54 = vpop.f32.mrf.mxu2 }
 0x67a   :  { %v879_v55 = vadd.f32 %v878_v54, %v2243_v11 }
 0x67c   :  { %v763_v57 = vpop.xlane.xlu2 %762  ;;  %v885_v58 = vsel %vm159_vm1, %v879_v55, -inf }
 0x67d   :  { %1978 = vrcp.f32 %v763_v57  ;;  %886 = vmax.xlane.f32.xlu0 %v885_v58 }
 0x681   :  { %v880_v59 = vpop.f32.mrf.mxu2 }
 0x683   :  { %v1979_v60 = vpop.eup %1978 }
 0x684   :  { %v767_v62 = vmul.f32 %v1979_v60, %v1975_v37 }
 0x686   :  { %v769_v61 = vpack.c.bf16 %v767_v62, %v767_v62 }
 0x688   :  { %1766 = vmatmul.msk.bf16.vlgmr.msrb.gmra.mxu3 %vm159_vm1, %v769_v61 }
 0x689   :  { %v991_v63 = vpop.f32.mrf.mxu2 }
 0x68a   :  { %v992_v0 = vadd.f32 %v991_v63, %v2228_v56 }
 0x68c   :  { %v896_v1 = vpop.xlane.xlu1 %895  ;;  %v1018_v2 = vsel %vm159_vm1, %v992_v0, -inf }
 0x68d   :  { %1980 = vrcp.f32 %v896_v1  ;;  %1019 = vmax.xlane.f32.xlu1 %v1018_v2 }
 0x691   :  { %v993_v3 = vpop.f32.mrf.mxu2 }
 0x693   :  { %v1981_v6 = vpop.eup %1980 }
 0x694   :  { %v902_v7 = vmul.f32 %v1981_v6, %v1977_v43 }
 0x696   :  { %v904_v8 = vpack.c.bf16 %v902_v7, %v902_v7 }
 0x698   :  { %1770 = vmatmul.msk.bf16.vlgmr.msra.gmra.mxu3 %vm159_vm1, %v904_v8 }
 0x6a4   :  { %v998_v9 = vpop.permute.xlu1 %997 }
 0x6a5   :  { %v1003_v10 = vsel %vm159_vm1, %v998_v9, 0 }
 0x6a6   :  { %1133 = vrot.lane.b32.xlu1 %v2184_v26, %s2062_s23  ;;  %1012 = vmatpush.bf16.xpose.msrb.mxu3 %v1003_v10 }
 0x6ad   :  { %1774 = vmatmul.msk.bf16.vlgmr.msrb.gmra.mxu3 %vm159_vm1, %v996_v12 }
 0x6ae   :  { %1063 = vrot.lane.b32.xlu1 %v2249_v18, %s2061_s2 }
 0x6d3   :  { %v693_v13 = vpop.f32.mrf.mxu3 }
 0x6d4   :  { %v2415_v14 = vadd.f32 %v693_v13, %v2375_v4  ;;  %v949_v4 = vld [vmem:[%s2650_s4 + $0x14] sm:$0xf] }
 0x6d5   :  { %v954_v27 = vsel %vm230_vm4, %v949_v4, 0 }
 0x6d6   :  { %963 = vmatpush.bf16.msra.mxu1 %v954_v27 }
 0x6db   :  { %v2426_v28 = vpop.f32.mrf.mxu3 }
 0x6f0   :  { %v887_v16 = vpop.xlane.xlu0 %886 }
 0x6f1   :  { %v889_v17 = vsub.f32 %v879_v55, %v887_v16 }
 0x6f3   :  { %v892_v19 = vmul.f32 1.442695, %v889_v17 }
 0x6f5   :  { %1982 = vpow2.f32 %v892_v19 }
 0x6fb   :  { %v1983_v22 = vpop.eup %1982 }
 0x6fc   :  { %v897_v23 = vsel %vm159_vm1, %v1983_v22, 0.0 }
 0x6fd   :  { %898 = vadd.xlane.f32.xlu2 %v897_v23 }
 0x700   :  { %v1020_v24 = vpop.xlane.xlu1 %1019 }
 0x701   :  { %v1024_v25 = vsub.f32 %v992_v0, %v1020_v24 }
 0x703   :  { %v1026_v29 = vmul.f32 1.442695, %v1024_v25 }
 0x705   :  { %1984 = vpow2.f32 %v1026_v29 }
 0x70b   :  { %v1985_v30 = vpop.eup %1984  ;;  %v808_v31 = vpop.f32.mrf.mxu3 }
 0x70c   :  { %v812_v32 = vpack.c.bf16 %v808_v31, %v787_v51  ;;  %v1030_v33 = vsel %vm159_vm1, %v1985_v30, 0.0 }
 0x70d   :  { %1031 = vadd.xlane.f32.xlu0 %v1030_v33 }
 0x70e   :  { %1767 = vmatmul.msk.bf16.vlgmr.msrb.gmra.mxu0 %vm159_vm1, %v812_v32 }
 0x713   :  { %v810_v34 = vpop.f32.mrf.mxu3 }
 0x715   :  { %927 = vrot.lane.b32.xlu2 %v2249_v18, %s2059_s17 }
 0x718   :  { %v1134_v35 = vpop.permute.xlu1 %1133 }
 0x719   :  { %v1139_v54 = vsel %vm159_vm1, %v1134_v35, 0 }
 0x71b   :  { %v923_v36 = vpop.f32.mrf.mxu3 }
 0x71d   :  { %1042 = vrot.lane.b32.xlu2 %v2234_v5, %s2061_s2 }
 0x720   :  { %v1064_v37 = vpop.permute.xlu1 %1063 }
 0x721   :  { %v1069_v38 = vsel %vm230_vm4, %v1064_v37, 0  ;;  %1110 = vrot.lane.b32.xlu0 %v2179_v21, %s2062_s23 }
 0x722   :  { %1078 = vmatpush.bf16.msrb.mxu1 %v1069_v38 }
 0x723   :  { %v925_v39 = vpop.f32.mrf.mxu3 }
 0x724   :  { %v1085_v39 = vld [vmem:[%s2650_s4 + $0x18] sm:$0xf] }
 0x725   :  { %1108 = vrot.lane.b32.xlu2 %v2179_v21, %s2063_s26 }
 0x72d   :  { %1131 = vrot.lane.b32.xlu2 %v2184_v26, %s2063_s26 }
 0x730   :  { %v1014_v40 = vpop.f32.mrf.mxu3 }
 0x731   :  { %v1015_v43 = vadd.f32 %v1014_v40, %v2243_v11  ;;  %v1090_v40 = vsel %vm230_vm4, %v1085_v39, 0 }
 0x732   :  { %1099 = vmatpush.bf16.msra.mxu2 %v1090_v40 }
 0x733   :  { %v1021_v44 = vsel %vm159_vm1, %v1015_v43, -inf }
 0x738   :  { %v1016_v41 = vpop.f32.mrf.mxu3 }
 0x74b   :  { %1022 = vmax.xlane.f32.xlu0 %v1021_v44 }
 0x770   :  { %v899_v46 = vpop.xlane.xlu2 %898 }
 0x771   :  { %1986 = vrcp.f32 %v899_v46 }
 0x777   :  { %v1987_v47 = vpop.eup %1986 }
 0x778   :  { %v903_v48 = vmul.f32 %v1987_v47, %v1983_v22  ;;  %v928_v49 = vpop.permute.xlu2 %927 }
 0x779   :  { %v933_v50 = vsel %vm230_vm4, %v928_v49, 0 }
 0x77a   :  { %v905_v51 = vpack.c.bf16 %v903_v48, %v903_v48  ;;  %942 = vmatpush.bf16.msra.mxu0 %v933_v50 }
 0x77d   :  { %1771 = vmatmul.msk.bf16.vlgmr.msra.gmra.mxu0 %vm159_vm1, %v905_v51 }
 0x780   :  { %v1043_v21 = vpop.permute.xlu2 %1042  ;;  %v1032_v26 = vpop.xlane.xlu0 %1031 }
 0x781   :  { %v1048_v53 = vsel %vm230_vm4, %v1043_v21, 0  ;;  %1988 = vrcp.f32 %v1032_v26 }
 0x782   :  { %1057 = vmatpush.bf16.msrb.mxu0 %v1048_v53 }
 0x786   :  { %1148 = vmatpush.bf16.xpose.msra.mxu0 %v1139_v54 }
 0x787   :  { %v1989_v55 = vpop.eup %1988 }
 0x788   :  { %v1038_v57 = vmul.f32 %v1989_v55, %v1985_v30  ;;  %v1109_v62 = vpop.permute.xlu2 %1108 }
 0x78a   :  { %v1040_v58 = vpack.c.bf16 %v1038_v57, %v1038_v57 }
 0x78b   :  { %v829_v59 = vpop.f32.mrf.mxu0 }
 0x78c   :  { %v834_v60 = vadd.f32 %v829_v59, %v2415_v14 }
 0x78d   :  { %1775 = vmatmul.msk.bf16.vlgmr.msrb.gmra.mxu0 %vm159_vm1, %v1040_v58 }
 0x790   :  { %v1132_v0 = vpop.permute.xlu2 %1131 }
 0x793   :  { %v1111_v61 = vpop.permute.xlu0 %1110  ;;  %v2453_v8 = vpop.f32.mrf.mxu0 }
 0x794   :  { %v1116_v63 = vsel %vm159_vm1, %v1111_v61, 0 }
 0x795   :  { %1125 = vmatpush.bf16.xpose.msra.mxu3 %v1116_v63 }
 0x79c   :  { %1778 = vmatmul.msk.bf16.vlgmr.msra.gmra.mxu3 %vm159_vm1, %v1109_v62 }
 0x79d   :  { %1779 = vmatmul.msk.bf16.vlgmr.msra.gmra.mxu0 %vm159_vm1, %v1132_v0 }
 0x7be   :  { %v1023_v1 = vpop.xlane.xlu0 %1022 }
 0x7bf   :  { %v1025_v2 = vsub.f32 %v1015_v43, %v1023_v1 }
 0x7c1   :  { %v1028_v3 = vmul.f32 1.442695, %v1025_v2 }
 0x7c3   :  { %1990 = vpow2.f32 %v1028_v3 }
 0x7c9   :  { %v1991_v6 = vpop.eup %1990 }
 0x7ca   :  { %v1033_v7 = vsel %vm159_vm1, %v1991_v6, 0.0 }
 0x7cb   :  { %1034 = vadd.xlane.f32.xlu2 %v1033_v7 }
 0x7fa   :  { %v944_v9 = vpop.f32.mrf.mxu0 }
 0x7fb   :  { %v948_v10 = vpack.c.bf16 %v944_v9, %v923_v36  ;;  %v1932_v9 = vld [vmem:[%s2651_s5] ss:$0 sm:$0xff] }
 0x7fd   :  { %1772 = vmatmul.msk.bf16.vlgmr.msra.gmra.mxu1 %vm159_vm1, %v948_v10 }
 0x802   :  { %v946_v12 = vpop.f32.mrf.mxu0 }
 0x80a   :  { %v1059_v13 = vpop.f32.mrf.mxu0 }
 0x812   :  { %v1061_v14 = vpop.f32.mrf.mxu0 }
 0x81a   :  { %v1150_v15 = vpop.f32.mrf.mxu0 }
 0x81b   :  { %v1151_v52 = vadd.f32 %v1150_v15, %v2243_v11 }
 0x81d   :  { %v1157_v16 = vsel %vm159_vm1, %v1151_v52, -inf }
 0x81e   :  { %1158 = vmax.xlane.f32.xlu1 %v1157_v16  ;;  %v2020_v16 = vld [vmem:[%s2646_s0] sm:$0xff] }
 0x81f   :  { %v1127_v17 = vpop.f32.mrf.mxu3 }
 0x820   :  { %v1128_v19 = vadd.f32 %v1127_v17, %v2228_v56 }
 0x822   :  { %v1152_v22 = vpop.f32.mrf.mxu0  ;;  %v1154_v23 = vsel %vm159_vm1, %v1128_v19, -inf }
 0x823   :  { %1155 = vmax.xlane.f32.xlu0 %v1154_v23 }
 0x827   :  { %v1129_v24 = vpop.f32.mrf.mxu3 }
 0x828   :  { %v2064_v24 = vmov 64.0  }
 0x837   :  { %1178 = vrot.lane.b32.xlu1 %v2234_v5, %s2063_s26 }
 0x83e   :  { %v1035_v4 = vpop.xlane.xlu2 %1034 }
 0x83f   :  { %1992 = vrcp.f32 %v1035_v4 }
 0x845   :  { %v1993_v25 = vpop.eup %1992 }
 0x846   :  { %v1039_v27 = vmul.f32 %v1993_v25, %v1991_v6  ;;  %v426_v6 = vadd.f32 %v2354_v42, %v2334_v20 }
 0x848   :  { %v1041_v29 = vpack.c.bf16 %v1039_v27, %v1039_v27  ;;  %v563_v7 = vadd.f32 %v2397_v45, %v426_v6 }
 0x84a   :  { %1776 = vmatmul.msk.bf16.vlgmr.msrb.gmra.mxu1 %vm159_vm1, %v1041_v29  ;;  %v699_v12 = vadd.f32 %v2426_v28, %v563_v7  ;;  %v2021_v28 = vld [vmem:[%s2646_s0 + $0x8] sm:$0xff] }
 0x84c   :  { %v835_v14 = vadd.f32 %v2453_v8, %v699_v12 }
 0x87a   :  { %v965_v11 = vpop.f32.mrf.mxu1 }
 0x87b   :  { %v970_v30 = vadd.f32 %v965_v11, %v834_v60  ;;  %v1221_v60 = vld [vmem:[%s2650_s4 + $0x1c] sm:$0xf] }
 0x87c   :  { %v1226_v62 = vsel %vm230_vm4, %v1221_v60, 0 }
 0x87d   :  { %1235 = vmatpush.bf16.msrb.mxu3 %v1226_v62 }
 0x882   :  { %v967_v44 = vpop.f32.mrf.mxu1 }
 0x891   :  { %v1159_v31 = vpop.xlane.xlu1 %1158 }
 0x892   :  { %v1161_v32 = vsub.f32 %v1151_v52, %v1159_v31  ;;  %v971_v52 = vadd.f32 %v967_v44, %v835_v14  ;;  %v1895_v44 = vld [vmem:[%s2652_s6 + $0x34] sm:$0xf] }
 0x894   :  { %v1164_v56 = vmul.f32 1.442695, %v1161_v32 }
 0x896   :  { %1994 = vpow2.f32 %v1164_v56  ;;  %v1156_v33 = vpop.xlane.xlu0 %1155 }
 0x897   :  { %v1160_v34 = vsub.f32 %v1128_v19, %v1156_v33 }
 0x899   :  { %v1162_v35 = vmul.f32 1.442695, %v1160_v34 }
 0x89b   :  { %1996 = vpow2.f32 %v1162_v35 }
 0x89c   :  { %v1995_v36 = vpop.eup %1994 }
 0x89d   :  { %v1169_v5 = vsel %vm159_vm1, %v1995_v36, 0.0 }
 0x89e   :  { %1170 = vadd.xlane.f32.xlu2 %v1169_v5 }
 0x8a1   :  { %v1997_v37 = vpop.eup %1996 }
 0x8a2   :  { %v1166_v38 = vsel %vm159_vm1, %v1997_v37, 0.0 }
 0x8a3   :  { %1167 = vadd.xlane.f32.xlu0 %v1166_v38 }
 0x8a9   :  { %v1179_v41 = vpop.permute.xlu1 %1178 }
 0x8aa   :  { %v1184_v43 = vsel %vm230_vm4, %v1179_v41, 0  ;;  %v1809_v41 = vld [vmem:[%s2652_s6 + $0x30] sm:$0xf] }
 0x8ab   :  { %1193 = vmatpush.bf16.msra.mxu1 %v1184_v43  ;;  %v1896_v43 = vld [vmem:[%s2652_s6 + $0x34] sm:$0xf0] }
 0x8b6   :  { %1199 = vrot.lane.b32.xlu2 %v2249_v18, %s2063_s26 }
 0x8c7   :  { %v1080_v46 = vpop.f32.mrf.mxu1 }
 0x8c8   :  { %v1084_v47 = vpack.c.bf16 %v1080_v46, %v1059_v13  ;;  %v1811_v46 = vld [vmem:[%s2652_s6 + $0x38] sm:$0xf0] }
 0x8ca   :  { %1777 = vmatmul.msk.bf16.vlgmr.msra.gmra.mxu2 %vm159_vm1, %v1084_v47  ;;  %v1810_v47 = vor.u32 %v1896_v43, %v1809_v41 }
 0x8cc   :  { %1409 = vmatpush.bf16.msrb.mxu0 %v1810_v47 }
 0x8cf   :  { %v1082_v48 = vpop.f32.mrf.mxu1 }
 0x8d0   :  { %v1814_v48 = vor.u32 %v1895_v44, %v1811_v46 }
 0x8d2   :  { %1423 = vmatpush.bf16.msrb.mxu1 %v1814_v48 }
 0x911   :  { %v1171_v49 = vpop.xlane.xlu2 %1170 }
 0x912   :  { %1998 = vrcp.f32 %v1171_v49  ;;  %v1801_v49 = vld [vmem:[%s2652_s6 + $0x20] sm:$0xf] }
 0x916   :  { %v1168_v50 = vpop.xlane.xlu0 %1167 }
 0x917   :  { %2000 = vrcp.f32 %v1168_v50  ;;  %v1894_v50 = vld [vmem:[%s2652_s6 + $0x24] sm:$0xf0] }
 0x918   :  { %v1999_v51 = vpop.eup %1998  ;;  %2002 = vrcp.f32 %v2064_v24 }
 0x919   :  { %v1175_v21 = vmul.f32 %v1999_v51, %v1995_v36  ;;  %v1200_v26 = vpop.permute.xlu2 %1199  ;;  %v1893_v51 = vld [vmem:[%s2652_s6 + $0x24] sm:$0xf] }
 0x91a   :  { %v1205_v53 = vsel %vm230_vm4, %v1200_v26, 0  ;;  %v1802_v26 = vor.u32 %v1894_v50, %v1801_v49 }
 0x91b   :  { %v1177_v54 = vpack.c.bf16 %v1175_v21, %v1175_v21  ;;  %1214 = vmatpush.bf16.msrb.mxu2 %v1205_v53  ;;  %v1803_v21 = vld [vmem:[%s2652_s6 + $0x28] sm:$0xf0] }
 0x91c   :  { %v1806_v53 = vor.u32 %v1893_v51, %v1803_v21  ;;  %1410 = vmatpush.bf16.msrb.mxu0 %v1802_v26 }
 0x91d   :  { %v2001_v55 = vpop.eup %2000 }
 0x91e   :  { %v1174_v57 = vmul.f32 %v2001_v55, %v1997_v37  ;;  %1781 = vmatmul.msk.bf16.vlgmr.msrb.gmra.mxu2 %vm159_vm1, %v1177_v54  ;;  %v2003_v4 = vpop.eup %2002  ;;  %v1793_v54 = vld [vmem:[%s2652_s6 + $0x10] sm:$0xf]  ;;  %v1892_v55 = vld [vmem:[%s2652_s6 + $0x14] sm:$0xf0]  ;;  %1424 = vmatpush.bf16.msrb.mxu1 %v1806_v53 }
 0x91f   :  { %v1261_v25 = vmul.f32 64.0, %v2003_v4  ;;  %vm1265_vm5 = vweird.f32 %v2003_v4 }
 0x920   :  { %v1176_v18 = vpack.c.bf16 %v1174_v57, %v1174_v57  ;;  %v1891_v57 = vld [vmem:[%s2652_s6 + $0x14] sm:$0xf] }
 0x921   :  { %v1262_v27 = vsub.f32 1.0, %v1261_v25  ;;  %v1903_v25 = vld [vmem:[%s2654_s8 + $0x30] sm:$0xff] }
 0x922   :  { %1780 = vmatmul.msk.bf16.vlgmr.msra.gmra.mxu1 %vm159_vm1, %v1176_v18  ;;  %v1795_v18 = vld [vmem:[%s2652_s6 + $0x18] sm:$0xf0] }
 0x923   :  { %v1263_v29 = vmul.f32 %v2003_v4, %v1262_v27  ;;  %v1911_v27 = vld [vmem:[%s2654_s8 + $0x70] sm:$0xff] }
 0x925   :  { %v1264_v11 = vadd.f32 %v2003_v4, %v1263_v29 }
 0x94d   :  { %v1101_v58 = vpop.f32.mrf.mxu2 }
 0x94e   :  { %v1106_v59 = vadd.f32 %v1101_v58, %v970_v30  ;;  %v2497_v30 = vsel %vm1265_vm5, %v2003_v4, %v1264_v11 }
 0x955   :  { %v1103_v61 = vpop.f32.mrf.mxu2 }
 0x956   :  { %v1107_v20 = vadd.f32 %v1103_v61, %v971_v52  ;;  %v1794_v61 = vor.u32 %v1892_v55, %v1793_v54  ;;  %v1933_v55 = vld [vmem:[%s2656_s10] ss:$0 sm:$0xff]  ;;  %s2066_s10 = smov 128  }
 0x958   :  { %1411 = vmatpush.bf16.msrb.mxu0 %v1794_v61 }
 0x99f   :  { %v1195_v63 = vpop.f32.mrf.mxu1 }
 0x9a1   :  { %v1216_v0 = vpop.f32.mrf.mxu2 }
 0x9a2   :  { %v1220_v1 = vpack.c.bf16 %v1216_v0, %v1195_v63  ;;  %v1798_v63 = vor.u32 %v1891_v57, %v1795_v18  ;;  %v1785_v0 = vld [vmem:[%s2652_s6] sm:$0xf] }
 0x9a4   :  { %1782 = vmatmul.msk.bf16.vlgmr.msrb.gmra.mxu3 %vm159_vm1, %v1220_v1  ;;  %v1890_v1 = vld [vmem:[%s2652_s6 + $0x4] sm:$0xf0]  ;;  %1425 = vmatpush.bf16.msrb.mxu1 %v1798_v63 }
 0x9a7   :  { %v1197_v2 = vpop.f32.mrf.mxu1 }
 0x9a8   :  { %v1889_v2 = vld [vmem:[%s2652_s6 + $0x4] sm:$0xf] }
 0x9a9   :  { %v1218_v3 = vpop.f32.mrf.mxu2 }
 0x9aa   :  { %v1787_v3 = vld [vmem:[%s2652_s6 + $0x8] sm:$0xf0] }
 0xa27   :  { %v1237_v10 = vpop.f32.mrf.mxu3 }
 0xa28   :  { %v1242_v13 = vadd.f32 %v1237_v10, %v1106_v59  ;;  %v1790_v10 = vor.u32 %v1889_v2, %v1787_v3  ;;  %v1899_v2 = vld [vmem:[%s2654_s8 + $0x10] sm:$0xff] }
 0xa29   :  { %v1907_v3 = vld [vmem:[%s2654_s8 + $0x50] sm:$0xff] }
 0xa2a   :  { %v1248_v15 = vadd.f32 %v1932_v9, %v1242_v13  ;;  %1426 = vmatpush.bf16.msrb.mxu1 %v1790_v10  ;;  %v1905_v10 = vld [vmem:[%s2654_s8 + $0x40] sm:$0xff] }
 0xa2c   :  { %v1250_v17 = vadd.f32 %v2020_v16, %v1248_v15 }
 0xa2e   :  { %v1254_v42 = vsel %vm106_vm0, %v1250_v17, 0.0 }
 0xa2f   :  { %1255 = vadd.xlane.f32.xlu0 %v1254_v42  ;;  %v1239_v45 = vpop.f32.mrf.mxu3 }
 0xa30   :  { %v1243_v19 = vadd.f32 %v1239_v45, %v1107_v20 }
 0xa32   :  { %v1249_v22 = vadd.f32 %v1932_v9, %v1243_v19  ;;  %v1786_v9 = vor.u32 %v1890_v1, %v1785_v0  ;;  %v1900_v1 = vld [vmem:[%s2654_s8 + $0x18] sm:$0xff] }
 0xa34   :  { %v1251_v23 = vadd.f32 %v2021_v28, %v1249_v22  ;;  %1412 = vmatpush.bf16.msrb.mxu0 %v1786_v9  ;;  %v1897_v9 = vld [vmem:[%s2654_s8] sm:$0xff] }
 0xa36   :  { %v1257_v8 = vsel %vm106_vm0, %v1251_v23, 0.0 }
 0xa37   :  { %1258 = vadd.xlane.f32.xlu0 %v1257_v8  ;;  %v1912_v8 = vld [vmem:[%s2654_s8 + $0x78] sm:$0xff] }
 0xa38   :  { %1585 = vmatpush.bf16.msra.mxu3 %v1912_v8 }
 0xa3c   :  { %1586 = vmatpush.bf16.msra.mxu3 %v1911_v27 }
 0xaa2   :  { %v1256_v31 = vpop.xlane.xlu0 %1255 }
 0xaa3   :  { %v1267_v32 = vmul.f32 %v2497_v30, %v1256_v31 }
 0xaa5   :  { %v2500_v56 = vsub.f32 %v1250_v17, %v1267_v32 }
 0xaa7   :  { %v1271_v33 = vmul.f32 %v2500_v56, %v2500_v56 }
 0xaa9   :  { %v1273_v34 = vsel %vm106_vm0, %v1271_v33, 0.0 }
 0xaaa   :  { %1274 = vadd.xlane.f32.xlu0 %v1273_v34  ;;  %v1259_v35 = vpop.xlane.xlu0 %1258  ;;  %v1902_v34 = vld [vmem:[%s2654_s8 + $0x28] sm:$0xff] }
 0xaab   :  { %v1268_v36 = vmul.f32 %v2497_v30, %v1259_v35  ;;  %v1910_v35 = vld [vmem:[%s2654_s8 + $0x68] sm:$0xff] }
 0xaac   :  { %1587 = vmatpush.bf16.msra.mxu3 %v1910_v35 }
 0xaad   :  { %v2506_v5 = vsub.f32 %v1251_v23, %v1268_v36  ;;  %v1904_v23 = vld [vmem:[%s2654_s8 + $0x38] sm:$0xff] }
 0xaae   :  { %1571 = vmatpush.bf16.msra.mxu2 %v1904_v23 }
 0xaaf   :  { %v1272_v37 = vmul.f32 %v2506_v5, %v2506_v5 }
 0xab1   :  { %v1276_v38 = vsel %vm106_vm0, %v1272_v37, 0.0 }
 0xab2   :  { %1277 = vadd.xlane.f32.xlu2 %v1276_v38  ;;  %1572 = vmatpush.bf16.msra.mxu2 %v1903_v25  ;;  %v1901_v38 = vld [vmem:[%s2654_s8 + $0x20] sm:$0xff] }
 0xab3   :  { %v1935_v25 = vld [vmem:[%s2655_s9] ss:$0 sm:$0xff] }
 0xab6   :  { %1573 = vmatpush.bf16.msra.mxu2 %v1902_v34 }
 0xaba   :  { %1574 = vmatpush.bf16.msra.mxu2 %v1901_v38 }
 0xabe   :  { %1575 = vmatpush.bf16.msra.mxu2 %v1900_v1 }
 0xac2   :  { %1576 = vmatpush.bf16.msra.mxu2 %v1899_v2 }
 0xb1d   :  { %v1275_v39 = vpop.xlane.xlu0 %1274 }
 0xb1e   :  { %v1279_v40 = vmul.f32 0.015873017, %v1275_v39  ;;  %v1909_v39 = vld [vmem:[%s2654_s8 + $0x60] sm:$0xff] }
 0xb1f   :  { %1588 = vmatpush.bf16.msra.mxu3 %v1909_v39 }
 0xb20   :  { %2004 = vrsqrt.f32 %v1279_v40  ;;  %vm1288_vm6 = vcmp.eq.f32.partialorder %v1279_v40, inf  ;;  %v1291_v17 = vand.u32 2147483648, %v1279_v40  ;;  %vm1290_vm7 = vcmp.eq.f32.partialorder %v1279_v40, 0.0 }
 0xb25   :  { %v1278_v58 = vpop.xlane.xlu2 %1277 }
 0xb26   :  { %v2005_v59 = vpop.eup %2004  ;;  %v1280_v60 = vmul.f32 0.015873017, %v1278_v58 }
 0xb27   :  { %v1282_v62 = vmul.f32 %v2005_v59, %v1279_v40 }
 0xb28   :  { %2006 = vrsqrt.f32 %v1280_v60  ;;  %vm1300_vm8 = vcmp.eq.f32.partialorder %v1280_v60, inf  ;;  %v1303_v4 = vand.u32 2147483648, %v1280_v60  ;;  %vm1302_vm9 = vcmp.eq.f32.partialorder %v1280_v60, 0.0 }
 0xb29   :  { %v1283_v6 = vmul.f32 %v2005_v59, %v1282_v62  ;;  %v1934_v62 = vld [vmem:[%s2657_s11] ss:$0 sm:$0xff] }
 0xb2b   :  { %v1284_v7 = vmul.f32 0.5, %v1283_v6  ;;  %v1898_v6 = vld [vmem:[%s2654_s8 + $0x8] sm:$0xff] }
 0xb2c   :  { %1577 = vmatpush.bf16.msra.mxu2 %v1898_v6 }
 0xb2d   :  { %v1285_v12 = vsub.f32 1.5, %v1284_v7  ;;  %v1906_v7 = vld [vmem:[%s2654_s8 + $0x48] sm:$0xff] }
 0xb2e   :  { %v2007_v13 = vpop.eup %2006 }
 0xb2f   :  { %v1286_v14 = vmul.f32 %v2005_v59, %v1285_v12  ;;  %v1294_v15 = vmul.f32 %v2007_v13, %v1280_v60  ;;  %v1356_v12 = vld [vmem:[%s2653_s7] sm:$0x3] }
 0xb30   :  { %1578 = vmatpush.bf16.msra.mxu2 %v1897_v9 }
 0xb31   :  { %v1287_v52 = vmul.f32 %v1286_v14, %v1279_v40  ;;  %v1295_v16 = vmul.f32 %v2007_v13, %v1294_v15  ;;  %v1358_v15 = vperm.slane %v1356_v12, 0 }
 0xb33   :  { %v1289_v20 = vsel %vm1288_vm6, %v1279_v40, %v1287_v52  ;;  %v1296_v42 = vmul.f32 0.5, %v1295_v16  ;;  %v1359_v52 = vperm.slane %v1356_v12, 1 }
 0xb34   :  { %v1292_v45 = vsel %vm1290_vm7, %v1291_v17, %v1289_v20 }
 0xb35   :  { %v1305_v19 = vadd.f32 1e-06, %v1292_v45  ;;  %v1297_v22 = vsub.f32 1.5, %v1296_v42 }
 0xb37   :  { %2008 = vrcp.f32 %v1305_v19  ;;  %v1298_v28 = vmul.f32 %v2007_v13, %v1297_v22  ;;  %v1318_v40 = vand.u32 2147483648, %v1305_v19  ;;  %vm1312_vm11 = vweird.f32 %v1305_v19 }
 0xb38   :  { %v1316_v43 = vand.u32 2147483647, %v1305_v19 }
 0xb39   :  { %v1299_v24 = vmul.f32 %v1298_v28, %v1280_v60  ;;  %v1319_v48 = vor.u32 1.1754944e-38, %v1318_v40 }
 0xb3a   :  { %vm1317_vm13 = vcmp.eq.f32.partialorder %v1316_v43, 8.507059e+37 }
 0xb3b   :  { %v1301_v29 = vsel %vm1300_vm8, %v1280_v60, %v1299_v24 }
 0xb3c   :  { %v1304_v11 = vsel %vm1302_vm9, %v1303_v4, %v1301_v29 }
 0xb3d   :  { %v2009_v31 = vpop.eup %2008  ;;  %v1306_v32 = vadd.f32 1e-06, %v1304_v11 }
 0xb3e   :  { %v1308_v33 = vmul.f32 %v2009_v31, %v1305_v19  ;;  %vm1313_vm10 = vweird.f32 %v2009_v31 }
 0xb3f   :  { %2010 = vrcp.f32 %v1306_v32  ;;  %vm1314_vm12 = vmor %vm1312_vm11, %vm1313_vm10  ;;  %v1333_v51 = vand.u32 2147483648, %v1306_v32  ;;  %v1331_v26 = vand.u32 2147483647, %v1306_v32  ;;  %vm1327_vm15 = vweird.f32 %v1306_v32 }
 0xb40   :  { %v1309_v36 = vsub.f32 1.0, %v1308_v33 }
 0xb41   :  { %v1334_v57 = vor.u32 1.1754944e-38, %v1333_v51  ;;  %vm1332_vm2 = vcmp.eq.f32.partialorder %v1331_v26, 8.507059e+37 }
 0xb42   :  { %v1310_v37 = vmul.f32 %v2009_v31, %v1309_v36 }
 0xb44   :  { %v1311_v41 = vadd.f32 %v2009_v31, %v1310_v37 }
 0xb45   :  { %v2011_v44 = vpop.eup %2010 }
 0xb46   :  { %v1315_v46 = vsel %vm1314_vm12, %v2009_v31, %v1311_v41  ;;  %v1323_v47 = vmul.f32 %v2011_v44, %v1306_v32  ;;  %vm1328_vm14 = vweird.f32 %v2011_v44 }
 0xb47   :  { %v1320_v50 = vsel %vm1317_vm13, %v1319_v48, %v1315_v46  ;;  %vm1329_vm1 = vmor %vm1327_vm15, %vm1328_vm14 }
 0xb48   :  { %v1324_v49 = vsub.f32 1.0, %v1323_v47  ;;  %v1321_v53 = vmul.f32 %v1320_v50, %v2500_v56 }
 0xb4a   :  { %v1325_v21 = vmul.f32 %v2011_v44, %v1324_v49  ;;  %v1340_v60 = vmul.f32 %v1933_v55, %v1321_v53 }
 0xb4c   :  { %v1326_v54 = vadd.f32 %v2011_v44, %v1325_v21  ;;  %v1345_v56 = vadd.f32 %v1934_v62, %v1340_v60 }
 0xb4e   :  { %v1330_v18 = vsel %vm1329_vm1, %v2011_v44, %v1326_v54 }
 0xb4f   :  { %v1335_v58 = vsel %vm1332_vm2, %v1334_v57, %v1330_v18 }
 0xb50   :  { %v1336_v59 = vmul.f32 %v1335_v58, %v2506_v5  ;;  %v1908_v5 = vld [vmem:[%s2654_s8 + $0x58] sm:$0xff] }
 0xb51   :  { %1589 = vmatpush.bf16.msra.mxu3 %v1908_v5 }
 0xb52   :  { %v1341_v61 = vmul.f32 %v1933_v55, %v1336_v59 }
 0xb54   :  { %v1346_v63 = vadd.f32 %v1934_v62, %v1341_v61 }
 0xb55   :  { %1590 = vmatpush.bf16.msra.mxu3 %v1907_v3 }
 0xb56   :  { %v1347_v0 = vpack.c.bf16 %v1346_v63, %v1345_v56 }
 0xb58   :  { %1815 = vmatmul.msk.bf16.vlgmr.msrb.gmra.mxu0 %vm106_vm0, %v1347_v0  ;;  %1816 = vmatmul.msk.bf16.vlgmr.msrb.gmra.mxu1 %vm106_vm0, %v1347_v0 }
 0xb59   :  { %1591 = vmatpush.bf16.msra.mxu3 %v1906_v7 }
 0xb5d   :  { %1592 = vmatpush.bf16.msra.mxu3 %v1905_v10 }
 0xbd5   :  { %v1414_v13 = vpop.f32.mrf.mxu0  ;;  %v1428_v14 = vpop.f32.mrf.mxu1 }
 0xbd6   :  { %v1415_v16 = vadd.f32 %v1414_v13, %v1358_v15  ;;  %v1429_v17 = vadd.f32 %v1428_v14, %v1359_v52 }
 0xbd8   :  { %v1433_v22 = vmax.f32 %v1415_v16, 0.0  ;;  %v1434_v28 = vmax.f32 %v1429_v17, 0.0 }
 0xbdd   :  { %v1416_v20 = vpop.f32.mrf.mxu0  ;;  %v1430_v42 = vpop.f32.mrf.mxu1 }
 0xbde   :  { %v1417_v45 = vadd.f32 %v1416_v20, %v1358_v15  ;;  %v1431_v19 = vadd.f32 %v1430_v42, %v1359_v52 }
 0xbe0   :  { %v1435_v23 = vmax.f32 %v1417_v45, 0.0  ;;  %v1436_v8 = vmax.f32 %v1431_v19, 0.0 }
 0xbe2   :  { %v1437_v24 = vpack.c.bf16 %v1435_v23, %v1433_v22  ;;  %v1438_v4 = vpack.c.bf16 %v1436_v8, %v1434_v28  ;;  %v1936_v23 = vld [vmem:[%s2658_s12] ss:$0 sm:$0xff]  ;;  %s2065_s12 = smov [#allocation2]  }
 0xbe3   :  { %s1695_s24 = sshll.u32 %s2065_s12, 4  ;;  %s1696_s24 = int_to_ptr.vmem [resolvable:$true] %s1695_s24 }
 0xbe4   :  { %1579 = vmatmul.bf16.vlgmr.msra.gmra.mxu2 %v1437_v24  ;;  %1593 = vmatmul.bf16.vlgmr.msra.gmra.mxu3 %v1438_v4 }
 0xc67   :  { %v1580_v27 = vpop.f32.mrf.mxu2  ;;  %v1594_v29 = vpop.f32.mrf.mxu3 }
 0xc68   :  { %v1581_v11 = vadd.f32 %v1935_v25, %v1580_v27 }
 0xc6a   :  { %v1595_v31 = vadd.f32 %v1594_v29, %v1581_v11 }
 0xc6c   :  { %v1599_v32 = vadd.f32 %v1595_v31, %v1345_v56 }
 0xc6e   :  { %v1603_v33 = vsel %vm106_vm0, %v1599_v32, 0.0 }
 0xc6f   :  { %v1582_v34 = vpop.f32.mrf.mxu2  ;;  %1604 = vadd.xlane.f32.xlu1 %v1603_v33  ;;  %v1596_v36 = vpop.f32.mrf.mxu3 }
 0xc70   :  { %v1583_v35 = vadd.f32 %v1935_v25, %v1582_v34  ;;  %v1937_v25 = vld [vmem:[%s2659_s13] ss:$0 sm:$0xff] }
 0xc72   :  { %v1597_v37 = vadd.f32 %v1596_v36, %v1583_v35 }
 0xc74   :  { %v1600_v38 = vadd.f32 %v1597_v37, %v1346_v63 }
 0xc76   :  { %v1606_v39 = vsel %vm106_vm0, %v1600_v38, 0.0 }
 0xc77   :  { %1607 = vadd.xlane.f32.xlu0 %v1606_v39 }
 0xce2   :  { %v1605_v40 = vpop.xlane.xlu1 %1604 }
 0xce3   :  { %v1609_v41 = vmul.f32 %v1605_v40, %v2497_v30 }
 0xce5   :  { %v1611_v43 = vsub.f32 %v1599_v32, %v1609_v41 }
 0xce7   :  { %v1613_v44 = vmul.f32 %v1611_v43, %v1611_v43 }
 0xce9   :  { %v1615_v46 = vsel %vm106_vm0, %v1613_v44, 0.0 }
 0xcea   :  { %v1608_v47 = vpop.xlane.xlu0 %1607  ;;  %1616 = vadd.xlane.f32.xlu0 %v1615_v46 }
 0xceb   :  { %v1610_v48 = vmul.f32 %v1608_v47, %v2497_v30 }
 0xced   :  { %v2628_v49 = vsub.f32 %v1600_v38, %v1610_v48 }
 0xcef   :  { %v1614_v50 = vmul.f32 %v2628_v49, %v2628_v49 }
 0xcf1   :  { %v1618_v51 = vsel %vm106_vm0, %v1614_v50, 0.0 }
 0xcf2   :  { %1619 = vadd.xlane.f32.xlu0 %v1618_v51 }
 0xd5d   :  { %v1617_v21 = vpop.xlane.xlu0 %1616 }
 0xd5e   :  { %v1621_v26 = vmul.f32 0.015873017, %v1617_v21 }
 0xd60   :  { %2012 = vrsqrt.f32 %v1621_v26  ;;  %vm1630_vm3 = vcmp.eq.f32.partialorder %v1621_v26, inf  ;;  %v1633_v63 = vand.u32 2147483648, %v1621_v26  ;;  %vm1632_vm4 = vcmp.eq.f32.partialorder %v1621_v26, 0.0 }
 0xd65   :  { %v1620_v53 = vpop.xlane.xlu0 %1619 }
 0xd66   :  { %v2013_v54 = vpop.eup %2012  ;;  %v1622_v55 = vmul.f32 0.015873017, %v1620_v53 }
 0xd67   :  { %v1624_v57 = vmul.f32 %v2013_v54, %v1621_v26 }
 0xd68   :  { %2014 = vrsqrt.f32 %v1622_v55  ;;  %vm1642_vm5 = vcmp.eq.f32.partialorder %v1622_v55, inf  ;;  %v1645_v9 = vand.u32 2147483648, %v1622_v55  ;;  %vm1644_vm6 = vcmp.eq.f32.partialorder %v1622_v55, 0.0 }
 0xd69   :  { %v1625_v18 = vmul.f32 %v2013_v54, %v1624_v57 }
 0xd6b   :  { %v1626_v58 = vmul.f32 0.5, %v1625_v18 }
 0xd6d   :  { %v1627_v59 = vsub.f32 1.5, %v1626_v58 }
 0xd6e   :  { %v2015_v30 = vpop.eup %2014 }
 0xd6f   :  { %v1628_v60 = vmul.f32 %v2013_v54, %v1627_v59  ;;  %v1636_v62 = vmul.f32 %v2015_v30, %v1622_v55 }
 0xd71   :  { %v1629_v61 = vmul.f32 %v1628_v60, %v1621_v26  ;;  %v1637_v56 = vmul.f32 %v2015_v30, %v1636_v62 }
 0xd73   :  { %v1631_v0 = vsel %vm1630_vm3, %v1621_v26, %v1629_v61  ;;  %v1638_v1 = vmul.f32 0.5, %v1637_v56 }
 0xd74   :  { %v1634_v5 = vsel %vm1632_vm4, %v1633_v63, %v1631_v0 }
 0xd75   :  { %v1647_v2 = vadd.f32 1e-06, %v1634_v5  ;;  %v1639_v3 = vsub.f32 1.5, %v1638_v1 }
 0xd77   :  { %2016 = vrcp.f32 %v1647_v2  ;;  %v1640_v6 = vmul.f32 %v2015_v30, %v1639_v3  ;;  %v1660_v16 = vand.u32 2147483648, %v1647_v2  ;;  %v1658_v20 = vand.u32 2147483647, %v1647_v2 }
 0xd78   :  { %vm1654_vm8 = vweird.f32 %v1647_v2 }
 0xd79   :  { %v1641_v7 = vmul.f32 %v1640_v6, %v1622_v55  ;;  %v1661_v19 = vor.u32 1.1754944e-38, %v1660_v16  ;;  %vm1659_vm10 = vcmp.eq.f32.partialorder %v1658_v20, 8.507059e+37 }
 0xd7b   :  { %v1643_v10 = vsel %vm1642_vm5, %v1622_v55, %v1641_v7 }
 0xd7c   :  { %v1646_v12 = vsel %vm1644_vm6, %v1645_v9, %v1643_v10 }
 0xd7d   :  { %v2017_v13 = vpop.eup %2016  ;;  %v1648_v14 = vadd.f32 1e-06, %v1646_v12 }
 0xd7e   :  { %v1650_v15 = vmul.f32 %v2017_v13, %v1647_v2  ;;  %vm1655_vm7 = vweird.f32 %v2017_v13 }
 0xd7f   :  { %2018 = vrcp.f32 %v1648_v14  ;;  %vm1656_vm9 = vmor %vm1654_vm8, %vm1655_vm7  ;;  %v1675_v27 = vand.u32 2147483648, %v1648_v14  ;;  %v1673_v11 = vand.u32 2147483647, %v1648_v14  ;;  %vm1669_vm12 = vweird.f32 %v1648_v14 }
 0xd80   :  { %v1651_v52 = vsub.f32 1.0, %v1650_v15 }
 0xd81   :  { %v1676_v34 = vor.u32 1.1754944e-38, %v1675_v27  ;;  %vm1674_vm14 = vcmp.eq.f32.partialorder %v1673_v11, 8.507059e+37 }
 0xd82   :  { %v1652_v17 = vmul.f32 %v2017_v13, %v1651_v52 }
 0xd84   :  { %v1653_v42 = vadd.f32 %v2017_v13, %v1652_v17 }
 0xd85   :  { %v2019_v45 = vpop.eup %2018 }
 0xd86   :  { %v1657_v22 = vsel %vm1656_vm9, %v2017_v13, %v1653_v42  ;;  %v1665_v28 = vmul.f32 %v2019_v45, %v1648_v14  ;;  %vm1670_vm11 = vweird.f32 %v2019_v45 }
 0xd87   :  { %v1662_v8 = vsel %vm1659_vm10, %v1661_v19, %v1657_v22  ;;  %vm1671_vm13 = vmor %vm1669_vm12, %vm1670_vm11 }
 0xd88   :  { %v1663_v24 = vmul.f32 %v1662_v8, %v1611_v43  ;;  %v1666_v4 = vsub.f32 1.0, %v1665_v28 }
 0xd8a   :  { %v1667_v29 = vmul.f32 %v2019_v45, %v1666_v4  ;;  %v1682_v31 = vmul.f32 %v1936_v23, %v1663_v24 }
 0xd8c   :  { %v1668_v32 = vadd.f32 %v2019_v45, %v1667_v29  ;;  %v1687_v33 = vadd.f32 %v1937_v25, %v1682_v31 }
 0xd8e   :  { %v1672_v35 = vsel %vm1671_vm13, %v2019_v45, %v1668_v32  ;;  %1689 = vst.msk [vmem:[#allocation2] sm:$0xff] %vm106_vm0, %v1687_v33 }
 0xd8f   :  { %v1677_v36 = vsel %vm1674_vm14, %v1676_v34, %v1672_v35 }
 0xd90   :  { %v1678_v37 = vmul.f32 %v1677_v36, %v2628_v49 }
 0xd92   :  { %v1683_v38 = vmul.f32 %v1936_v23, %v1678_v37 }
 0xd94   :  { %v1688_v39 = vadd.f32 %v1937_v25, %v1683_v38 }
 0xd96   :  { %1690 = vst.msk [vmem:[#allocation2 + $0x8] sm:$0xff] %vm106_vm0, %v1688_v39 }
 0xd97   :  { %1703 = dma.vmem_to_hbm [thread:$0]  %s1696_s24, 256, %s1698_s25, [#allocation3], %s2066_s10, %s2066_s10, %s2062_s23  }
 0xd98   :  { %2046 = dma.done.wait [#allocation3], 256  }
 0xd99   :  { %2047 = vsyncadd [#allocation3], 4294967040 }
 0xd9a   :  { %1708 = vsyncpa [#allocation3], 1 }

// kernel: tpu_custom_call.1
= control target key start
LH: loop header
LB: loop body
LE: loop exit
PB: predicated region body
PF: predicated region fallthrough
CT: control target
= control target key end

     0   :  { %s2646_s0 = inlined_call_operand.vmem [shape: f32[2,8,64], index: 0, kind: input, shape index: {}]   ;;  %s2647_s1 = inlined_call_operand.vmem [shape: s32[2,1,8], index: 1, kind: input, shape index: {}]   ;;  %s2648_s2 = inlined_call_operand.vmem [shape: bf16[64,192], index: 2, kind: input, shape index: {}]   ;;  %s2649_s3 = inlined_call_operand.vmem [shape: f32[1,192], index: 3, kind: input, shape index: {}]   ;;  %s2650_s4 = inlined_call_operand.vmem [shape: bf16[64,64], index: 4, kind: input, shape index: {}]   ;;  %s2651_s5 = inlined_call_operand.vmem [shape: f32[1,64], index: 5, kind: input, shape index: {}]   ;;  %s2652_s6 = inlined_call_operand.vmem [shape: bf16[64,256], index: 6, kind: input, shape index: {}]   ;;  %s2653_s7 = inlined_call_operand.vmem [shape: f32[1,256], index: 7, kind: input, shape index: {}]   ;;  %s2654_s8 = inlined_call_operand.vmem [shape: bf16[256,64], index: 8, kind: input, shape index: {}]   ;;  %s2655_s9 = inlined_call_operand.vmem [shape: f32[1,64], index: 9, kind: input, shape index: {}]   ;;  %s2656_s10 = inlined_call_operand.vmem [shape: f32[1,64], index: 10, kind: input, shape index: {}]   ;;  %s2657_s11 = inlined_call_operand.vmem [shape: f32[1,64], index: 11, kind: input, shape index: {}]   ;;  %s2658_s12 = inlined_call_operand.vmem [shape: f32[1,64], index: 12, kind: input, shape index: {}]   ;;  %s2659_s13 = inlined_call_operand.vmem [shape: f32[1,64], index: 13, kind: input, shape index: {}]   ;;  %s2660_s14 = inlined_call_operand.hbm [shape: f32[2,8,64], index: 14, kind: output, shape index: {}]  }
   0x1   :  { %v1735_v0 = vld [vmem:[%s2648_s2 + $0x30] sm:$0xf]  ;;  %v1888_v1 = vld [vmem:[%s2648_s2 + $0x34] sm:$0xf0]  ;;  %v1727_v2 = vld [vmem:[%s2648_s2 + $0x20] sm:$0xf] }
   0x2   :  { %v1736_v3 = vor.u32 %v1888_v1, %v1735_v0  ;;  %v1886_v4 = vld [vmem:[%s2648_s2 + $0x24] sm:$0xf0]  ;;  %v1719_v6 = vld [vmem:[%s2648_s2 + $0x10] sm:$0xf]  ;;  %v1884_v7 = vld [vmem:[%s2648_s2 + $0x14] sm:$0xf0] }
   0x3   :  { %v1728_v5 = vor.u32 %v1886_v4, %v1727_v2 }
   0x4   :  { %114 = vmatpush.bf16.msra.mxu0 %v1736_v3 }
   0x5   :  { %19 = vsyncpa [#allocation3], 0  ;;  %v1720_v8 = vor.u32 %v1884_v7, %v1719_v6  ;;  %v1711_v9 = vld [vmem:[%s2648_s2] sm:$0xf]  ;;  %v1882_v10 = vld [vmem:[%s2648_s2 + $0x4] sm:$0xf0] }
   0x6   :  { %v1712_v11 = vor.u32 %v1882_v10, %v1711_v9  ;;  %v49_v12 = vld [vmem:[%s2646_s0] sm:$0xff]  ;;  %v50_v13 = vld [vmem:[%s2646_s0 + $0x8] sm:$0xff]  ;;  %vm106_vm0 = vcmask 523264   ;;  %s2048_s19 = smov 120   ;;  %s2049_s20 = smov 64   ;;  %vm159_vm1 = vcmask 64512  }
   0x7   :  { %v51_v14 = vpack.c.bf16 %v50_v13, %v49_v12  ;;  %v2176_v15 = vld [vmem:[%s2649_s3] sm:$0x3]  ;;  %s2050_s3 = smov 56   ;;  %v1887_v27 = vld [vmem:[%s2648_s2 + $0x34] sm:$0xf]  ;;  %v2051_v54 = vmov 0.0  }
   0x8   :  { %115 = vmatpush.bf16.msra.mxu0 %v1728_v5  ;;  %v62_v16 = vperm.slane %v2176_v15, 0  ;;  %v1737_v28 = vld [vmem:[%s2648_s2 + $0x38] sm:$0xf0]  ;;  %v1885_v30 = vld [vmem:[%s2648_s2 + $0x24] sm:$0xf]  ;;  %v63_v50 = vperm.slane %v2176_v15, 1 }
   0x9   :  { %v1740_v29 = vor.u32 %v1887_v27, %v1737_v28  ;;  %v1729_v31 = vld [vmem:[%s2648_s2 + $0x28] sm:$0xf0]  ;;  %v1883_v33 = vld [vmem:[%s2648_s2 + $0x14] sm:$0xf]  ;;  %v1721_v34 = vld [vmem:[%s2648_s2 + $0x18] sm:$0xf0] }
   0xa   :  { %v1732_v32 = vor.u32 %v1885_v30, %v1729_v31  ;;  %v1881_v35 = vld [vmem:[%s2648_s2 + $0x4] sm:$0xf]  ;;  %v1724_v36 = vor.u32 %v1883_v33, %v1721_v34  ;;  %v1713_v37 = vld [vmem:[%s2648_s2 + $0x8] sm:$0xf0]  ;;  %v138_v53 = vld [vmem:[%s2647_s1] sm:$0x1] }
   0xb   :  { %128 = vmatpush.bf16.msra.mxu1 %v1740_v29  ;;  %v1716_v38 = vor.u32 %v1881_v35, %v1713_v37  ;;  %vm140_vm2 = vcmp.ne.s32.totalorder %v138_v53, 0  ;;  %s2052_s22 = smov 48   ;;  %v139_v9 = vld [vmem:[%s2647_s1 + $0x1] sm:$0x1]  ;;  %vm230_vm4 = vcmask 1043456   ;;  %s2053_s1 = smov 104  }
   0xc   :  { %116 = vmatpush.bf16.msra.mxu0 %v1720_v8  ;;  %v142_v55 = vsel %vm140_vm2, -1e+09, %v2051_v54  ;;  %vm141_vm3 = vcmp.ne.s32.totalorder %v139_v9, 0  ;;  %s2054_s25 = smov 112   ;;  %s2056_s30 = smov 32  }
   0xd   :  { %v2228_v56 = vperm.slane %v142_v55, 0  ;;  %v143_v10 = vsel %vm141_vm3, -1e+09, %v2051_v54  ;;  %s2057_s15 = smov 96   ;;  %s2058_s16 = smov 24  }
   0xe   :  { %s2059_s17 = smov 88   ;;  %s2061_s2 = smov 80  }
   0xf   :  { %129 = vmatpush.bf16.msra.mxu1 %v1732_v32  ;;  %s2062_s23 = smov 8   ;;  %s2063_s26 = smov 72  }
  0x10   :  { %117 = vmatpush.bf16.msra.mxu0 %v1712_v11  ;;  %v2243_v11 = vperm.slane %v143_v10, 0 }
  0x13   :  { %1741 = vmatmul.msk.bf16.vlgmr.msra.gmra.mxu0 %vm106_vm0, %v51_v14  ;;  %130 = vmatpush.bf16.msra.mxu1 %v1724_v36 }
  0x17   :  { %131 = vmatpush.bf16.msra.mxu1 %v1716_v38 }
  0x1a   :  { %1742 = vmatmul.msk.bf16.vlgmr.msra.gmra.mxu1 %vm106_vm0, %v51_v14 }
  0x90   :  { %v119_v17 = vpop.f32.mrf.mxu0 }
  0x91   :  { %v120_v18 = vadd.f32 %v119_v17, %v62_v16 }
  0x93   :  { %v144_v19 = vpack.c.bf16 %v120_v18, %v120_v18 }
  0x95   :  { %v155_v20 = vunpack.c.l.b16 %v144_v19 }
  0x97   :  { %v2179_v21 = vpack.c.b16 %v155_v20, %v155_v20  ;;  %v133_v49 = vpop.f32.mrf.mxu1 }
  0x98   :  { %v121_v22 = vpop.f32.mrf.mxu0  ;;  %v134_v60 = vadd.f32 %v133_v49, %v63_v50 }
  0x99   :  { %v122_v23 = vadd.f32 %v121_v22, %v62_v16  ;;  %268 = vrot.lane.b32.xlu1 %v2179_v21, %s2048_s19  ;;  %157 = vrot.lane.b32.xlu0 %v2179_v21, %s2049_s20 }
  0x9a   :  { %v146_v63 = vpack.c.bf16 %v134_v60, %v134_v60 }
  0x9b   :  { %v145_v24 = vpack.c.bf16 %v122_v23, %v122_v23 }
  0x9c   :  { %v339_v0 = vunpack.c.l.b16 %v146_v63 }
  0x9d   :  { %v180_v25 = vunpack.c.l.b16 %v145_v24 }
  0x9e   :  { %v2234_v5 = vpack.c.b16 %v339_v0, %v339_v0 }
  0x9f   :  { %v2184_v26 = vpack.c.b16 %v180_v25, %v180_v25  ;;  %v135_v51 = vpop.f32.mrf.mxu1 }
  0xa0   :  { %v136_v52 = vadd.f32 %v135_v51, %v63_v50 }
  0xa1   :  { %293 = vrot.lane.b32.xlu2 %v2184_v26, %s2050_s3  ;;  %182 = vrot.lane.b32.xlu1 %v2184_v26, %s2049_s20 }
  0xa2   :  { %270 = vrot.lane.b32.xlu0 %v2179_v21, %s2050_s3  ;;  %v147_v16 = vpack.c.bf16 %v136_v52, %v136_v52  ;;  %s2060_s3 = smov 16  }
  0xa4   :  { %v363_v17 = vunpack.c.l.b16 %v147_v16  ;;  %v251_v20 = vsel %vm230_vm4, %v147_v16, 0 }
  0xa5   :  { %260 = vmatpush.bf16.msra.mxu3 %v251_v20 }
  0xa6   :  { %v2249_v18 = vpack.c.b16 %v363_v17, %v363_v17 }
  0xa9   :  { %291 = vrot.lane.b32.xlu2 %v2184_v26, %s2048_s19 }
  0xfb   :  { %v294_v42 = vpop.permute.xlu2 %293 }
  0xfc   :  { %v299_v46 = vsel %vm159_vm1, %v294_v42, 0 }
 0x103   :  { %v292_v48 = vpop.permute.xlu2 %291 }
 0x10b   :  { %v269_v39 = vpop.permute.xlu1 %268  ;;  %v158_v40 = vpop.permute.xlu0 %157 }
 0x10c   :  { %v164_v41 = vsel %vm159_vm1, %v158_v40, 0 }
 0x10d   :  { %173 = vmatpush.bf16.xpose.msrb.mxu0 %v164_v41 }
 0x113   :  { %v183_v43 = vpop.permute.xlu1 %182 }
 0x114   :  { %v271_v44 = vpop.permute.xlu0 %270  ;;  %1743 = vmatmul.msk.bf16.vlgmr.msrb.gmra.mxu0 %vm159_vm1, %v144_v19  ;;  %v188_v45 = vsel %vm159_vm1, %v183_v43, 0  ;;  %v232_v19 = vsel %vm230_vm4, %v146_v63, 0 }
 0x115   :  { %v276_v47 = vsel %vm159_vm1, %v271_v44, 0  ;;  %197 = vmatpush.bf16.xpose.msrb.mxu1 %v188_v45  ;;  %241 = vmatpush.bf16.msra.mxu2 %v232_v19 }
 0x116   :  { %285 = vmatpush.bf16.xpose.msra.mxu0 %v276_v47 }
 0x11c   :  { %1744 = vmatmul.msk.bf16.vlgmr.msrb.gmra.mxu1 %vm159_vm1, %v145_v24 }
 0x11d   :  { %308 = vmatpush.bf16.xpose.msra.mxu1 %v299_v46 }
 0x124   :  { %1747 = vmatmul.msk.bf16.vlgmr.msra.gmra.mxu0 %vm159_vm1, %v269_v39 }
 0x12c   :  { %1748 = vmatmul.msk.bf16.vlgmr.msra.gmra.mxu1 %vm159_vm1, %v292_v48  ;;  %v387_v48 = vld [vmem:[%s2650_s4 + $0x4] sm:$0xf] }
 0x12d   :  { %v392_v49 = vsel %vm230_vm4, %v387_v48, 0 }
 0x12e   :  { %401 = vmatpush.bf16.msrb.mxu0 %v392_v49 }
 0x191   :  { %v175_v57 = vpop.f32.mrf.mxu0 }
 0x192   :  { %v176_v58 = vadd.f32 %v175_v57, %v2228_v56 }
 0x194   :  { %v203_v59 = vsel %vm159_vm1, %v176_v58, -inf }
 0x195   :  { %204 = vmax.xlane.f32.xlu0 %v203_v59 }
 0x199   :  { %v177_v61 = vpop.f32.mrf.mxu0  ;;  %v199_v62 = vpop.f32.mrf.mxu1 }
 0x19a   :  { %v200_v12 = vadd.f32 %v199_v62, %v2243_v11 }
 0x19c   :  { %v206_v13 = vsel %vm159_vm1, %v200_v12, -inf }
 0x1a1   :  { %v201_v1 = vpop.f32.mrf.mxu1  ;;  %v287_v2 = vpop.f32.mrf.mxu0 }
 0x1a2   :  { %v288_v3 = vadd.f32 %v287_v2, %v2228_v56 }
 0x1a4   :  { %v314_v4 = vsel %vm159_vm1, %v288_v3, -inf }
 0x1a5   :  { %315 = vmax.xlane.f32.xlu1 %v314_v4 }
 0x1a9   :  { %v310_v6 = vpop.f32.mrf.mxu1  ;;  %341 = vrot.lane.b32.xlu0 %v2234_v5, %s2048_s19  ;;  %v289_v7 = vpop.f32.mrf.mxu0 }
 0x1aa   :  { %v311_v14 = vadd.f32 %v310_v6, %v2243_v11 }
 0x1ac   :  { %v317_v15 = vsel %vm159_vm1, %v311_v14, -inf }
 0x1b1   :  { %v312_v8 = vpop.f32.mrf.mxu1 }
 0x1be   :  { %430 = vrot.lane.b32.xlu1 %v2179_v21, %s2052_s22 }
 0x1d3   :  { %207 = vmax.xlane.f32.xlu0 %v206_v13 }
 0x1e8   :  { %318 = vmax.xlane.f32.xlu1 %v317_v15 }
 0x201   :  { %365 = vrot.lane.b32.xlu1 %v2249_v18, %s2048_s19  ;;  %s2055_s19 = smov 40  }
 0x208   :  { %v205_v22 = vpop.xlane.xlu0 %204 }
 0x209   :  { %v209_v23 = vsub.f32 %v176_v58, %v205_v22  ;;  %564 = vrot.lane.b32.xlu1 %v2179_v21, %s2053_s1 }
 0x20b   :  { %v211_v24 = vmul.f32 1.442695, %v209_v23 }
 0x20d   :  { %1938 = vpow2.f32 %v211_v24 }
 0x211   :  { %498 = vrot.lane.b32.xlu1 %v2234_v5, %s2054_s25 }
 0x213   :  { %v1939_v25 = vpop.eup %1938 }
 0x214   :  { %v215_v27 = vsel %vm159_vm1, %v1939_v25, 0.0 }
 0x215   :  { %216 = vadd.xlane.f32.xlu2 %v215_v27 }
 0x218   :  { %v316_v28 = vpop.xlane.xlu1 %315 }
 0x219   :  { %v320_v29 = vsub.f32 %v288_v3, %v316_v28  ;;  %589 = vrot.lane.b32.xlu1 %v2184_v26, %s2055_s19 }
 0x21b   :  { %v322_v30 = vmul.f32 1.442695, %v320_v29  ;;  %v342_v33 = vpop.permute.xlu0 %341 }
 0x21c   :  { %v347_v46 = vsel %vm230_vm4, %v342_v33, 0 }
 0x21d   :  { %1940 = vpow2.f32 %v322_v30  ;;  %356 = vmatpush.bf16.msrb.mxu2 %v347_v46 }
 0x221   :  { %587 = vrot.lane.b32.xlu1 %v2184_v26, %s2053_s1 }
 0x223   :  { %v1941_v31 = vpop.eup %1940 }
 0x224   :  { %v326_v32 = vsel %vm159_vm1, %v1941_v31, 0.0 }
 0x225   :  { %327 = vadd.xlane.f32.xlu2 %v326_v32 }
 0x230   :  { %v431_v35 = vpop.permute.xlu1 %430 }
 0x231   :  { %v436_v58 = vsel %vm159_vm1, %v431_v35, 0 }
 0x23d   :  { %428 = vrot.lane.b32.xlu2 %v2179_v21, %s2054_s25 }
 0x246   :  { %v208_v34 = vpop.xlane.xlu0 %207 }
 0x247   :  { %v210_v36 = vsub.f32 %v200_v12, %v208_v34 }
 0x249   :  { %v213_v37 = vmul.f32 1.442695, %v210_v36 }
 0x24b   :  { %1942 = vpow2.f32 %v213_v37 }
 0x251   :  { %v1943_v41 = vpop.eup %1942 }
 0x252   :  { %v218_v42 = vsel %vm159_vm1, %v1943_v41, 0.0 }
 0x25b   :  { %v319_v38 = vpop.xlane.xlu1 %318 }
 0x25c   :  { %v321_v39 = vsub.f32 %v311_v14, %v319_v38 }
 0x25e   :  { %v324_v40 = vmul.f32 1.442695, %v321_v39 }
 0x260   :  { %1944 = vpow2.f32 %v324_v40 }
 0x266   :  { %v1945_v43 = vpop.eup %1944  ;;  %219 = vadd.xlane.f32.xlu2 %v218_v42 }
 0x267   :  { %v329_v44 = vsel %vm159_vm1, %v1945_v43, 0.0 }
 0x268   :  { %330 = vadd.xlane.f32.xlu0 %v329_v44 }
 0x273   :  { %v366_v45 = vpop.permute.xlu1 %365 }
 0x274   :  { %v371_v50 = vsel %vm230_vm4, %v366_v45, 0 }
 0x275   :  { %380 = vmatpush.bf16.msrb.mxu3 %v371_v50 }
 0x27b   :  { %v565_v47 = vpop.permute.xlu1 %564 }
 0x27c   :  { %453 = vrot.lane.b32.xlu0 %v2184_v26, %s2052_s22 }
 0x27e   :  { %451 = vrot.lane.b32.xlu2 %v2184_v26, %s2054_s25 }
 0x283   :  { %v499_v51 = vpop.permute.xlu1 %498 }
 0x284   :  { %v504_v52 = vsel %vm230_vm4, %v499_v51, 0  ;;  %566 = vrot.lane.b32.xlu0 %v2179_v21, %s2055_s19 }
 0x285   :  { %513 = vmatpush.bf16.msra.mxu0 %v504_v52 }
 0x288   :  { %v217_v53 = vpop.xlane.xlu2 %216 }
 0x289   :  { %1946 = vrcp.f32 %v217_v53 }
 0x28f   :  { %v1947_v54 = vpop.eup %1946 }
 0x290   :  { %v223_v55 = vmul.f32 %v1947_v54, %v1939_v25  ;;  %v267_v25 = vld [vmem:[%s2650_s4] sm:$0xf] }
 0x291   :  { %v412_v27 = vsel %vm230_vm4, %v267_v25, 0 }
 0x292   :  { %v225_v57 = vpack.c.bf16 %v223_v55, %v223_v55  ;;  %421 = vmatpush.bf16.msrb.mxu1 %v412_v27 }
 0x294   :  { %1745 = vmatmul.msk.bf16.vlgmr.msra.gmra.mxu2 %vm159_vm1, %v225_v57 }
 0x295   :  { %445 = vmatpush.bf16.xpose.msra.mxu2 %v436_v58 }
 0x298   :  { %v328_v59 = vpop.xlane.xlu2 %327 }
 0x299   :  { %1948 = vrcp.f32 %v328_v59 }
 0x29f   :  { %v1949_v60 = vpop.eup %1948 }
 0x2a0   :  { %v334_v61 = vmul.f32 %v1949_v60, %v1941_v31  ;;  %v429_v63 = vpop.permute.xlu2 %428  ;;  %v590_v31 = vpop.permute.xlu1 %589 }
 0x2a1   :  { %v595_v34 = vsel %vm159_vm1, %v590_v31, 0 }
 0x2a2   :  { %v336_v62 = vpack.c.bf16 %v334_v61, %v334_v61 }
 0x2a4   :  { %1749 = vmatmul.msk.bf16.vlgmr.msrb.gmra.mxu2 %vm159_vm1, %v336_v62 }
 0x2a8   :  { %v588_v48 = vpop.permute.xlu1 %587 }
 0x2b4   :  { %1753 = vmatmul.msk.bf16.vlgmr.msra.gmra.mxu2 %vm159_vm1, %v429_v63 }
 0x2d9   :  { %v220_v0 = vpop.xlane.xlu2 %219 }
 0x2da   :  { %1950 = vrcp.f32 %v220_v0 }
 0x2db   :  { %v331_v3 = vpop.xlane.xlu0 %330 }
 0x2dc   :  { %1952 = vrcp.f32 %v331_v3 }
 0x2e0   :  { %v1951_v1 = vpop.eup %1950 }
 0x2e1   :  { %v224_v2 = vmul.f32 %v1951_v1, %v1943_v41  ;;  %v452_v14 = vpop.permute.xlu2 %451 }
 0x2e2   :  { %v1953_v6 = vpop.eup %1952 }
 0x2e3   :  { %v226_v4 = vpack.c.bf16 %v224_v2, %v224_v2  ;;  %v335_v8 = vmul.f32 %v1953_v6, %v1945_v43 }
 0x2e5   :  { %1746 = vmatmul.msk.bf16.vlgmr.msra.gmra.mxu3 %vm159_vm1, %v226_v4  ;;  %v337_v10 = vpack.c.bf16 %v335_v8, %v335_v8 }
 0x2ee   :  { %v454_v7 = vpop.permute.xlu0 %453 }
 0x2ef   :  { %v459_v9 = vsel %vm159_vm1, %v454_v7, 0 }
 0x2f0   :  { %468 = vmatpush.bf16.xpose.msra.mxu3 %v459_v9 }
 0x2f5   :  { %1750 = vmatmul.msk.bf16.vlgmr.msrb.gmra.mxu3 %vm159_vm1, %v337_v10 }
 0x2f6   :  { %v567_v12 = vpop.permute.xlu0 %566 }
 0x2f7   :  { %v572_v13 = vsel %vm159_vm1, %v567_v12, 0 }
 0x2f8   :  { %581 = vmatpush.bf16.xpose.msrb.mxu3 %v572_v13 }
 0x305   :  { %1754 = vmatmul.msk.bf16.vlgmr.msra.gmra.mxu3 %vm159_vm1, %v452_v14 }
 0x315   :  { %1758 = vmatmul.msk.bf16.vlgmr.msrb.gmra.mxu3 %vm159_vm1, %v565_v47 }
 0x317   :  { %v243_v15 = vpop.f32.mrf.mxu2 }
 0x31f   :  { %v245_v16 = vpop.f32.mrf.mxu2 }
 0x327   :  { %v358_v17 = vpop.f32.mrf.mxu2 }
 0x32f   :  { %v360_v19 = vpop.f32.mrf.mxu2 }
 0x337   :  { %v447_v20 = vpop.f32.mrf.mxu2 }
 0x338   :  { %v448_v22 = vadd.f32 %v447_v20, %v2228_v56 }
 0x33a   :  { %v474_v23 = vsel %vm159_vm1, %v448_v22, -inf }
 0x33b   :  { %475 = vmax.xlane.f32.xlu2 %v474_v23 }
 0x33f   :  { %v449_v24 = vpop.f32.mrf.mxu2 }
 0x353   :  { %702 = vrot.lane.b32.xlu2 %v2179_v21, %s2056_s30 }
 0x368   :  { %v262_v28 = vpop.f32.mrf.mxu3 }
 0x369   :  { %v266_v29 = vpack.c.bf16 %v262_v28, %v243_v15 }
 0x36b   :  { %1752 = vmatmul.msk.bf16.vlgmr.msrb.gmra.mxu1 %vm159_vm1, %v266_v29 }
 0x370   :  { %v264_v30 = vpop.f32.mrf.mxu3 }
 0x378   :  { %v382_v32 = vpop.f32.mrf.mxu3 }
 0x379   :  { %v386_v33 = vpack.c.bf16 %v382_v32, %v358_v17 }
 0x37b   :  { %1751 = vmatmul.msk.bf16.vlgmr.msrb.gmra.mxu0 %vm159_vm1, %v386_v33  ;;  %v541_v33 = vld [vmem:[%s2650_s4 + $0x8] sm:$0xf] }
 0x37c   :  { %604 = vmatpush.bf16.xpose.msrb.mxu0 %v595_v34  ;;  %v546_v34 = vsel %vm230_vm4, %v541_v33, 0 }
 0x37d   :  { %555 = vmatpush.bf16.msrb.mxu2 %v546_v34 }
 0x380   :  { %v384_v35 = vpop.f32.mrf.mxu3 }
 0x388   :  { %v470_v36 = vpop.f32.mrf.mxu3 }
 0x389   :  { %v471_v37 = vadd.f32 %v470_v36, %v2243_v11 }
 0x38b   :  { %v477_v38 = vsel %vm159_vm1, %v471_v37, -inf }
 0x38c   :  { %478 = vmax.xlane.f32.xlu1 %v477_v38 }
 0x390   :  { %v472_v39 = vpop.f32.mrf.mxu3 }
 0x398   :  { %v583_v40 = vpop.f32.mrf.mxu3 }
 0x399   :  { %v584_v47 = vadd.f32 %v583_v40, %v2228_v56 }
 0x39b   :  { %v610_v51 = vsel %vm159_vm1, %v584_v47, -inf }
 0x3a0   :  { %v585_v41 = vpop.f32.mrf.mxu3 }
 0x3a5   :  { %519 = vrot.lane.b32.xlu1 %v2249_v18, %s2054_s25  ;;  %s1697_s25 = sshll.u32 %s2660_s14, 4  ;;  %s1698_s25 = int_to_ptr.hbm [resolvable:$true] %s1697_s25 }
 0x3ae   :  { %v476_v42 = vpop.xlane.xlu2 %475 }
 0x3af   :  { %v480_v43 = vsub.f32 %v448_v22, %v476_v42 }
 0x3b1   :  { %v482_v44 = vmul.f32 1.442695, %v480_v43 }
 0x3b3   :  { %1954 = vpow2.f32 %v482_v44 }
 0x3b6   :  { %v703_v0 = vpop.permute.xlu2 %702 }
 0x3b7   :  { %v708_v2 = vsel %vm159_vm1, %v703_v0, 0 }
 0x3b9   :  { %v1955_v45 = vpop.eup %1954 }
 0x3ba   :  { %v486_v46 = vsel %vm159_vm1, %v1955_v45, 0.0 }
 0x3bb   :  { %487 = vadd.xlane.f32.xlu0 %v486_v46 }
 0x3cf   :  { %700 = vrot.lane.b32.xlu0 %v2179_v21, %s2057_s15 }
 0x3e8   :  { %v423_v49 = vpop.f32.mrf.mxu1 }
 0x3f0   :  { %v2354_v42 = vpop.f32.mrf.mxu1 }
 0x3f8   :  { %v403_v50 = vpop.f32.mrf.mxu0 }
 0x3f9   :  { %v2312_v52 = vadd.f32 %v423_v49, %v403_v50  ;;  %611 = vmax.xlane.f32.xlu0 %v610_v51 }
 0x3ff   :  { %v479_v53 = vpop.xlane.xlu1 %478 }
 0x400   :  { %v481_v54 = vsub.f32 %v471_v37, %v479_v53  ;;  %v2334_v20 = vpop.f32.mrf.mxu0 }
 0x402   :  { %v484_v55 = vmul.f32 1.442695, %v481_v54 }
 0x404   :  { %1956 = vpow2.f32 %v484_v55 }
 0x40a   :  { %v1957_v57 = vpop.eup %1956 }
 0x40b   :  { %v489_v58 = vsel %vm159_vm1, %v1957_v57, 0.0 }
 0x40c   :  { %490 = vadd.xlane.f32.xlu2 %v489_v58 }
 0x40d   :  { %634 = vrot.lane.b32.xlu0 %v2234_v5, %s2053_s1 }
 0x415   :  { %723 = vrot.lane.b32.xlu0 %v2184_v26, %s2057_s15 }
 0x417   :  { %v520_v59 = vpop.permute.xlu1 %519 }
 0x418   :  { %v525_v60 = vsel %vm230_vm4, %v520_v59, 0 }
 0x419   :  { %534 = vmatpush.bf16.msra.mxu1 %v525_v60 }
 0x41d   :  { %838 = vrot.lane.b32.xlu0 %v2179_v21, %s2058_s16 }
 0x424   :  { %725 = vrot.lane.b32.xlu2 %v2184_v26, %s2056_s30 }
 0x42e   :  { %v488_v61 = vpop.xlane.xlu0 %487 }
 0x42f   :  { %1958 = vrcp.f32 %v488_v61 }
 0x435   :  { %v1959_v62 = vpop.eup %1958 }
 0x436   :  { %v494_v63 = vmul.f32 %v1959_v62, %v1955_v45 }
 0x438   :  { %v496_v1 = vpack.c.bf16 %v494_v63, %v494_v63 }
 0x43a   :  { %1755 = vmatmul.msk.bf16.vlgmr.msra.gmra.mxu0 %vm159_vm1, %v496_v1 }
 0x43b   :  { %717 = vmatpush.bf16.xpose.msra.mxu0 %v708_v2 }
 0x441   :  { %v701_v3 = vpop.permute.xlu0 %700 }
 0x44a   :  { %1759 = vmatmul.msk.bf16.vlgmr.msrb.gmra.mxu0 %vm159_vm1, %v588_v48 }
 0x45a   :  { %1763 = vmatmul.msk.bf16.vlgmr.msra.gmra.mxu0 %vm159_vm1, %v701_v3 }
 0x46c   :  { %v612_v4 = vpop.xlane.xlu0 %611 }
 0x46d   :  { %v616_v6 = vsub.f32 %v584_v47, %v612_v4 }
 0x46f   :  { %v618_v7 = vmul.f32 1.442695, %v616_v6 }
 0x471   :  { %1960 = vpow2.f32 %v618_v7 }
 0x477   :  { %v1961_v8 = vpop.eup %1960 }
 0x478   :  { %v622_v9 = vsel %vm159_vm1, %v1961_v8, 0.0 }
 0x479   :  { %623 = vadd.xlane.f32.xlu1 %v622_v9 }
 0x47f   :  { %v491_v10 = vpop.xlane.xlu2 %490  ;;  %v635_v12 = vpop.permute.xlu0 %634 }
 0x480   :  { %1962 = vrcp.f32 %v491_v10  ;;  %v640_v13 = vsel %vm230_vm4, %v635_v12, 0 }
 0x481   :  { %649 = vmatpush.bf16.msrb.mxu1 %v640_v13 }
 0x486   :  { %v1963_v14 = vpop.eup %1962 }
 0x487   :  { %v495_v15 = vmul.f32 %v1963_v14, %v1957_v57  ;;  %v726_v16 = vpop.permute.xlu2 %725  ;;  %v724_v35 = vpop.permute.xlu0 %723 }
 0x488   :  { %v731_v19 = vsel %vm159_vm1, %v726_v16, 0 }
 0x489   :  { %v497_v17 = vpack.c.bf16 %v495_v15, %v495_v15 }
 0x48b   :  { %1756 = vmatmul.msk.bf16.vlgmr.msra.gmra.mxu1 %vm159_vm1, %v497_v17 }
 0x48c   :  { %740 = vmatpush.bf16.xpose.msra.mxu1 %v731_v19 }
 0x48f   :  { %v839_v39 = vpop.permute.xlu0 %838 }
 0x490   :  { %v844_v41 = vsel %vm159_vm1, %v839_v39, 0 }
 0x492   :  { %836 = vrot.lane.b32.xlu1 %v2179_v21, %s2059_s17 }
 0x4b7   :  { %v515_v22 = vpop.f32.mrf.mxu0 }
 0x4bf   :  { %v517_v23 = vpop.f32.mrf.mxu0 }
 0x4c7   :  { %v606_v24 = vpop.f32.mrf.mxu0 }
 0x4c8   :  { %v607_v25 = vadd.f32 %v606_v24, %v2243_v11 }
 0x4ca   :  { %v613_v27 = vsel %vm159_vm1, %v607_v25, -inf }
 0x4cb   :  { %614 = vmax.xlane.f32.xlu2 %v613_v27 }
 0x4cf   :  { %v608_v28 = vpop.f32.mrf.mxu0 }
 0x4d7   :  { %v719_v29 = vpop.f32.mrf.mxu0 }
 0x4d8   :  { %v720_v30 = vadd.f32 %v719_v29, %v2228_v56 }
 0x4da   :  { %v746_v31 = vsel %vm159_vm1, %v720_v30, -inf }
 0x4db   :  { %747 = vmax.xlane.f32.xlu0 %v746_v31 }
 0x4df   :  { %v721_v32 = vpop.f32.mrf.mxu0 }
 0x4e3   :  { %655 = vrot.lane.b32.xlu2 %v2249_v18, %s2053_s1 }
 0x4eb   :  { %861 = vrot.lane.b32.xlu2 %v2184_v26, %s2058_s16 }
 0x4ec   :  { %v624_v36 = vpop.xlane.xlu1 %623 }
 0x4ed   :  { %1964 = vrcp.f32 %v624_v36 }
 0x4f3   :  { %v1965_v37 = vpop.eup %1964  ;;  %859 = vrot.lane.b32.xlu2 %v2184_v26, %s2059_s17 }
 0x4f4   :  { %v630_v38 = vmul.f32 %v1965_v37, %v1961_v8 }
 0x4f6   :  { %v632_v40 = vpack.c.bf16 %v630_v38, %v630_v38 }
 0x4f8   :  { %1760 = vmatmul.msk.bf16.vlgmr.msrb.gmra.mxu1 %vm159_vm1, %v632_v40 }
 0x4f9   :  { %853 = vmatpush.bf16.xpose.msrb.mxu1 %v844_v41 }
 0x4fb   :  { %974 = vrot.lane.b32.xlu2 %v2179_v21, %s2060_s3 }
 0x504   :  { %v837_v46 = vpop.permute.xlu1 %836 }
 0x508   :  { %v536_v43 = vpop.f32.mrf.mxu1  ;;  %1764 = vmatmul.msk.bf16.vlgmr.msra.gmra.mxu1 %vm159_vm1, %v724_v35 }
 0x509   :  { %v540_v44 = vpack.c.bf16 %v536_v43, %v515_v22 }
 0x50b   :  { %1757 = vmatmul.msk.bf16.vlgmr.msrb.gmra.mxu2 %vm159_vm1, %v540_v44 }
 0x510   :  { %v538_v45 = vpop.f32.mrf.mxu1 }
 0x518   :  { %1768 = vmatmul.msk.bf16.vlgmr.msrb.gmra.mxu1 %vm159_vm1, %v837_v46 }
 0x53e   :  { %v615_v47 = vpop.xlane.xlu2 %614 }
 0x53f   :  { %v617_v48 = vsub.f32 %v607_v25, %v615_v47 }
 0x541   :  { %v620_v49 = vmul.f32 1.442695, %v617_v48 }
 0x543   :  { %1966 = vpow2.f32 %v620_v49 }
 0x546   :  { %v656_v50 = vpop.permute.xlu2 %655 }
 0x547   :  { %v661_v51 = vsel %vm230_vm4, %v656_v50, 0 }
 0x548   :  { %670 = vmatpush.bf16.msra.mxu2 %v661_v51 }
 0x549   :  { %v1967_v53 = vpop.eup %1966 }
 0x54a   :  { %v625_v54 = vsel %vm159_vm1, %v1967_v53, 0.0 }
 0x54b   :  { %626 = vadd.xlane.f32.xlu1 %v625_v54 }
 0x54e   :  { %v748_v55 = vpop.xlane.xlu0 %747  ;;  %v862_v15 = vpop.permute.xlu2 %861 }
 0x54f   :  { %v752_v57 = vsub.f32 %v720_v30, %v748_v55  ;;  %v867_v27 = vsel %vm159_vm1, %v862_v15, 0  ;;  %v813_v15 = vld [vmem:[%s2650_s4 + $0x10] sm:$0xf] }
 0x551   :  { %v754_v58 = vmul.f32 1.442695, %v752_v57 }
 0x553   :  { %1968 = vpow2.f32 %v754_v58 }
 0x556   :  { %v860_v19 = vpop.permute.xlu2 %859 }
 0x559   :  { %v1969_v59 = vpop.eup %1968 }
 0x55a   :  { %v758_v60 = vsel %vm159_vm1, %v1969_v59, 0.0 }
 0x55b   :  { %759 = vadd.xlane.f32.xlu0 %v758_v60 }
 0x55e   :  { %v975_v28 = vpop.permute.xlu2 %974 }
 0x55f   :  { %v980_v30 = vsel %vm159_vm1, %v975_v28, 0 }
 0x56f   :  { %770 = vrot.lane.b32.xlu0 %v2234_v5, %s2057_s15 }
 0x575   :  { %v2364_v61 = vpop.f32.mrf.mxu1 }
 0x577   :  { %972 = vrot.lane.b32.xlu0 %v2179_v21, %s2061_s2 }
 0x57d   :  { %v653_v62 = vpop.f32.mrf.mxu1 }
 0x57f   :  { %791 = vrot.lane.b32.xlu0 %v2249_v18, %s2057_s15 }
 0x585   :  { %v742_v63 = vpop.f32.mrf.mxu1 }
 0x586   :  { %v743_v0 = vadd.f32 %v742_v63, %v2243_v11 }
 0x587   :  { %906 = vrot.lane.b32.xlu0 %v2234_v5, %s2059_s17 }
 0x588   :  { %v749_v1 = vsel %vm159_vm1, %v743_v0, -inf }
 0x589   :  { %750 = vmax.xlane.f32.xlu1 %v749_v1 }
 0x58d   :  { %v744_v2 = vpop.f32.mrf.mxu1 }
 0x58e   :  { %v557_v3 = vpop.f32.mrf.mxu2 }
 0x58f   :  { %v2375_v4 = vadd.f32 %v557_v3, %v2312_v52  ;;  %995 = vrot.lane.b32.xlu0 %v2184_v26, %s2061_s2  ;;  %v677_v52 = vld [vmem:[%s2650_s4 + $0xc] sm:$0xf] }
 0x590   :  { %v682_v16 = vsel %vm230_vm4, %v677_v52, 0  ;;  %v818_v52 = vsel %vm230_vm4, %v813_v15, 0 }
 0x591   :  { %691 = vmatpush.bf16.msra.mxu3 %v682_v16  ;;  %827 = vmatpush.bf16.msrb.mxu0 %v818_v52 }
 0x595   :  { %v855_v6 = vpop.f32.mrf.mxu1 }
 0x596   :  { %v856_v7 = vadd.f32 %v855_v6, %v2228_v56  ;;  %v2397_v45 = vpop.f32.mrf.mxu2 }
 0x598   :  { %v882_v8 = vsel %vm159_vm1, %v856_v7, -inf }
 0x599   :  { %883 = vmax.xlane.f32.xlu1 %v882_v8 }
 0x59d   :  { %v857_v9 = vpop.f32.mrf.mxu1 }
 0x5be   :  { %v627_v10 = vpop.xlane.xlu1 %626 }
 0x5bf   :  { %1970 = vrcp.f32 %v627_v10 }
 0x5c5   :  { %v1971_v12 = vpop.eup %1970 }
 0x5c6   :  { %v631_v13 = vmul.f32 %v1971_v12, %v1967_v53 }
 0x5c8   :  { %v633_v14 = vpack.c.bf16 %v631_v13, %v631_v13 }
 0x5ca   :  { %1761 = vmatmul.msk.bf16.vlgmr.msra.gmra.mxu2 %vm159_vm1, %v633_v14 }
 0x5ce   :  { %v760_v17 = vpop.xlane.xlu0 %759 }
 0x5cf   :  { %1972 = vrcp.f32 %v760_v17 }
 0x5d5   :  { %v1973_v22 = vpop.eup %1972 }
 0x5d6   :  { %v766_v23 = vmul.f32 %v1973_v22, %v1969_v59 }
 0x5d8   :  { %v768_v29 = vpack.c.bf16 %v766_v23, %v766_v23 }
 0x5e1   :  { %v771_v24 = vpop.permute.xlu0 %770 }
 0x5e2   :  { %v776_v25 = vsel %vm230_vm4, %v771_v24, 0 }
 0x5e3   :  { %785 = vmatpush.bf16.msrb.mxu2 %v776_v25 }
 0x5e6   :  { %1765 = vmatmul.msk.bf16.vlgmr.msrb.gmra.mxu2 %vm159_vm1, %v768_v29 }
 0x5e7   :  { %876 = vmatpush.bf16.xpose.msra.mxu2 %v867_v27 }
 0x5e9   :  { %v973_v31 = vpop.permute.xlu0 %972 }
 0x5ef   :  { %989 = vmatpush.bf16.xpose.msrb.mxu2 %v980_v30 }
 0x5f1   :  { %v792_v32 = vpop.permute.xlu0 %791 }
 0x5f2   :  { %v797_v33 = vsel %vm230_vm4, %v792_v32, 0 }
 0x5f3   :  { %806 = vmatpush.bf16.msrb.mxu3 %v797_v33 }
 0x5f6   :  { %1769 = vmatmul.msk.bf16.vlgmr.msra.gmra.mxu2 %vm159_vm1, %v860_v19 }
 0x5f9   :  { %v907_v46 = vpop.permute.xlu0 %906 }
 0x5fa   :  { %v912_v49 = vsel %vm230_vm4, %v907_v46, 0 }
 0x5fc   :  { %v751_v34 = vpop.xlane.xlu1 %750 }
 0x5fd   :  { %v753_v35 = vsub.f32 %v743_v0, %v751_v34 }
 0x5ff   :  { %v756_v36 = vmul.f32 1.442695, %v753_v35 }
 0x601   :  { %1974 = vpow2.f32 %v756_v36  ;;  %v996_v12 = vpop.permute.xlu0 %995 }
 0x606   :  { %1773 = vmatmul.msk.bf16.vlgmr.msrb.gmra.mxu2 %vm159_vm1, %v973_v31 }
 0x607   :  { %v1975_v37 = vpop.eup %1974 }
 0x608   :  { %v761_v38 = vsel %vm159_vm1, %v1975_v37, 0.0 }
 0x609   :  { %762 = vadd.xlane.f32.xlu2 %v761_v38 }
 0x60c   :  { %v884_v39 = vpop.xlane.xlu1 %883 }
 0x60d   :  { %v888_v40 = vsub.f32 %v856_v7, %v884_v39 }
 0x60f   :  { %v890_v41 = vmul.f32 1.442695, %v888_v40 }
 0x611   :  { %1976 = vpow2.f32 %v890_v41 }
 0x617   :  { %v1977_v43 = vpop.eup %1976 }
 0x618   :  { %v894_v44 = vsel %vm159_vm1, %v1977_v43, 0.0 }
 0x619   :  { %895 = vadd.xlane.f32.xlu1 %v894_v44 }
 0x632   :  { %997 = vrot.lane.b32.xlu1 %v2184_v26, %s2060_s3 }
 0x64d   :  { %v672_v47 = vpop.f32.mrf.mxu2 }
 0x64e   :  { %v676_v48 = vpack.c.bf16 %v672_v47, %v2364_v61 }
 0x650   :  { %1762 = vmatmul.msk.bf16.vlgmr.msra.gmra.mxu3 %vm159_vm1, %v676_v48 }
 0x651   :  { %921 = vmatpush.bf16.msra.mxu3 %v912_v49 }
 0x655   :  { %v674_v50 = vpop.f32.mrf.mxu2 }
 0x669   :  { %v787_v51 = vpop.f32.mrf.mxu2 }
 0x671   :  { %v789_v53 = vpop.f32.mrf.mxu2 }
 0x679   :  { %v878_v54 = vpop.f32.mrf.mxu2 }
 0x67a   :  { %v879_v55 = vadd.f32 %v878_v54, %v2243_v11 }
 0x67c   :  { %v763_v57 = vpop.xlane.xlu2 %762  ;;  %v885_v58 = vsel %vm159_vm1, %v879_v55, -inf }
 0x67d   :  { %1978 = vrcp.f32 %v763_v57  ;;  %886 = vmax.xlane.f32.xlu0 %v885_v58 }
 0x681   :  { %v880_v59 = vpop.f32.mrf.mxu2 }
 0x683   :  { %v1979_v60 = vpop.eup %1978 }
 0x684   :  { %v767_v62 = vmul.f32 %v1979_v60, %v1975_v37 }
 0x686   :  { %v769_v61 = vpack.c.bf16 %v767_v62, %v767_v62 }
 0x688   :  { %1766 = vmatmul.msk.bf16.vlgmr.msrb.gmra.mxu3 %vm159_vm1, %v769_v61 }
 0x689   :  { %v991_v63 = vpop.f32.mrf.mxu2 }
 0x68a   :  { %v992_v0 = vadd.f32 %v991_v63, %v2228_v56 }
 0x68c   :  { %v896_v1 = vpop.xlane.xlu1 %895  ;;  %v1018_v2 = vsel %vm159_vm1, %v992_v0, -inf }
 0x68d   :  { %1980 = vrcp.f32 %v896_v1  ;;  %1019 = vmax.xlane.f32.xlu1 %v1018_v2 }
 0x691   :  { %v993_v3 = vpop.f32.mrf.mxu2 }
 0x693   :  { %v1981_v6 = vpop.eup %1980 }
 0x694   :  { %v902_v7 = vmul.f32 %v1981_v6, %v1977_v43 }
 0x696   :  { %v904_v8 = vpack.c.bf16 %v902_v7, %v902_v7 }
 0x698   :  { %1770 = vmatmul.msk.bf16.vlgmr.msra.gmra.mxu3 %vm159_vm1, %v904_v8 }
 0x6a4   :  { %v998_v9 = vpop.permute.xlu1 %997 }
 0x6a5   :  { %v1003_v10 = vsel %vm159_vm1, %v998_v9, 0 }
 0x6a6   :  { %1133 = vrot.lane.b32.xlu1 %v2184_v26, %s2062_s23  ;;  %1012 = vmatpush.bf16.xpose.msrb.mxu3 %v1003_v10 }
 0x6ad   :  { %1774 = vmatmul.msk.bf16.vlgmr.msrb.gmra.mxu3 %vm159_vm1, %v996_v12 }
 0x6ae   :  { %1063 = vrot.lane.b32.xlu1 %v2249_v18, %s2061_s2 }
 0x6d3   :  { %v693_v13 = vpop.f32.mrf.mxu3 }
 0x6d4   :  { %v2415_v14 = vadd.f32 %v693_v13, %v2375_v4  ;;  %v949_v4 = vld [vmem:[%s2650_s4 + $0x14] sm:$0xf] }
 0x6d5   :  { %v954_v27 = vsel %vm230_vm4, %v949_v4, 0 }
 0x6d6   :  { %963 = vmatpush.bf16.msra.mxu1 %v954_v27 }
 0x6db   :  { %v2426_v28 = vpop.f32.mrf.mxu3 }
 0x6f0   :  { %v887_v16 = vpop.xlane.xlu0 %886 }
 0x6f1   :  { %v889_v17 = vsub.f32 %v879_v55, %v887_v16 }
 0x6f3   :  { %v892_v19 = vmul.f32 1.442695, %v889_v17 }
 0x6f5   :  { %1982 = vpow2.f32 %v892_v19 }
 0x6fb   :  { %v1983_v22 = vpop.eup %1982 }
 0x6fc   :  { %v897_v23 = vsel %vm159_vm1, %v1983_v22, 0.0 }
 0x6fd   :  { %898 = vadd.xlane.f32.xlu2 %v897_v23 }
 0x700   :  { %v1020_v24 = vpop.xlane.xlu1 %1019 }
 0x701   :  { %v1024_v25 = vsub.f32 %v992_v0, %v1020_v24 }
 0x703   :  { %v1026_v29 = vmul.f32 1.442695, %v1024_v25 }
 0x705   :  { %1984 = vpow2.f32 %v1026_v29 }
 0x70b   :  { %v1985_v30 = vpop.eup %1984  ;;  %v808_v31 = vpop.f32.mrf.mxu3 }
 0x70c   :  { %v812_v32 = vpack.c.bf16 %v808_v31, %v787_v51  ;;  %v1030_v33 = vsel %vm159_vm1, %v1985_v30, 0.0 }
 0x70d   :  { %1031 = vadd.xlane.f32.xlu0 %v1030_v33 }
 0x70e   :  { %1767 = vmatmul.msk.bf16.vlgmr.msrb.gmra.mxu0 %vm159_vm1, %v812_v32 }
 0x713   :  { %v810_v34 = vpop.f32.mrf.mxu3 }
 0x715   :  { %927 = vrot.lane.b32.xlu2 %v2249_v18, %s2059_s17 }
 0x718   :  { %v1134_v35 = vpop.permute.xlu1 %1133 }
 0x719   :  { %v1139_v54 = vsel %vm159_vm1, %v1134_v35, 0 }
 0x71b   :  { %v923_v36 = vpop.f32.mrf.mxu3 }
 0x71d   :  { %1042 = vrot.lane.b32.xlu2 %v2234_v5, %s2061_s2 }
 0x720   :  { %v1064_v37 = vpop.permute.xlu1 %1063 }
 0x721   :  { %v1069_v38 = vsel %vm230_vm4, %v1064_v37, 0  ;;  %1110 = vrot.lane.b32.xlu0 %v2179_v21, %s2062_s23 }
 0x722   :  { %1078 = vmatpush.bf16.msrb.mxu1 %v1069_v38 }
 0x723   :  { %v925_v39 = vpop.f32.mrf.mxu3 }
 0x724   :  { %v1085_v39 = vld [vmem:[%s2650_s4 + $0x18] sm:$0xf] }
 0x725   :  { %1108 = vrot.lane.b32.xlu2 %v2179_v21, %s2063_s26 }
 0x72d   :  { %1131 = vrot.lane.b32.xlu2 %v2184_v26, %s2063_s26 }
 0x730   :  { %v1014_v40 = vpop.f32.mrf.mxu3 }
 0x731   :  { %v1015_v43 = vadd.f32 %v1014_v40, %v2243_v11  ;;  %v1090_v40 = vsel %vm230_vm4, %v1085_v39, 0 }
 0x732   :  { %1099 = vmatpush.bf16.msra.mxu2 %v1090_v40 }
 0x733   :  { %v1021_v44 = vsel %vm159_vm1, %v1015_v43, -inf }
 0x738   :  { %v1016_v41 = vpop.f32.mrf.mxu3 }
 0x74b   :  { %1022 = vmax.xlane.f32.xlu0 %v1021_v44 }
 0x770   :  { %v899_v46 = vpop.xlane.xlu2 %898 }
 0x771   :  { %1986 = vrcp.f32 %v899_v46 }
 0x777   :  { %v1987_v47 = vpop.eup %1986 }
 0x778   :  { %v903_v48 = vmul.f32 %v1987_v47, %v1983_v22  ;;  %v928_v49 = vpop.permute.xlu2 %927 }
 0x779   :  { %v933_v50 = vsel %vm230_vm4, %v928_v49, 0 }
 0x77a   :  { %v905_v51 = vpack.c.bf16 %v903_v48, %v903_v48  ;;  %942 = vmatpush.bf16.msra.mxu0 %v933_v50 }
 0x77d   :  { %1771 = vmatmul.msk.bf16.vlgmr.msra.gmra.mxu0 %vm159_vm1, %v905_v51 }
 0x780   :  { %v1043_v21 = vpop.permute.xlu2 %1042  ;;  %v1032_v26 = vpop.xlane.xlu0 %1031 }
 0x781   :  { %v1048_v53 = vsel %vm230_vm4, %v1043_v21, 0  ;;  %1988 = vrcp.f32 %v1032_v26 }
 0x782   :  { %1057 = vmatpush.bf16.msrb.mxu0 %v1048_v53 }
 0x786   :  { %1148 = vmatpush.bf16.xpose.msra.mxu0 %v1139_v54 }
 0x787   :  { %v1989_v55 = vpop.eup %1988 }
 0x788   :  { %v1038_v57 = vmul.f32 %v1989_v55, %v1985_v30  ;;  %v1109_v62 = vpop.permute.xlu2 %1108 }
 0x78a   :  { %v1040_v58 = vpack.c.bf16 %v1038_v57, %v1038_v57 }
 0x78b   :  { %v829_v59 = vpop.f32.mrf.mxu0 }
 0x78c   :  { %v834_v60 = vadd.f32 %v829_v59, %v2415_v14 }
 0x78d   :  { %1775 = vmatmul.msk.bf16.vlgmr.msrb.gmra.mxu0 %vm159_vm1, %v1040_v58 }
 0x790   :  { %v1132_v0 = vpop.permute.xlu2 %1131 }
 0x793   :  { %v1111_v61 = vpop.permute.xlu0 %1110  ;;  %v2453_v8 = vpop.f32.mrf.mxu0 }
 0x794   :  { %v1116_v63 = vsel %vm159_vm1, %v1111_v61, 0 }
 0x795   :  { %1125 = vmatpush.bf16.xpose.msra.mxu3 %v1116_v63 }
 0x79c   :  { %1778 = vmatmul.msk.bf16.vlgmr.msra.gmra.mxu3 %vm159_vm1, %v1109_v62 }
 0x79d   :  { %1779 = vmatmul.msk.bf16.vlgmr.msra.gmra.mxu0 %vm159_vm1, %v1132_v0 }
 0x7be   :  { %v1023_v1 = vpop.xlane.xlu0 %1022 }
 0x7bf   :  { %v1025_v2 = vsub.f32 %v1015_v43, %v1023_v1 }
 0x7c1   :  { %v1028_v3 = vmul.f32 1.442695, %v1025_v2 }
 0x7c3   :  { %1990 = vpow2.f32 %v1028_v3 }
 0x7c9   :  { %v1991_v6 = vpop.eup %1990 }
 0x7ca   :  { %v1033_v7 = vsel %vm159_vm1, %v1991_v6, 0.0 }
 0x7cb   :  { %1034 = vadd.xlane.f32.xlu2 %v1033_v7 }
 0x7fa   :  { %v944_v9 = vpop.f32.mrf.mxu0 }
 0x7fb   :  { %v948_v10 = vpack.c.bf16 %v944_v9, %v923_v36  ;;  %v1932_v9 = vld [vmem:[%s2651_s5] ss:$0 sm:$0xff] }
 0x7fd   :  { %1772 = vmatmul.msk.bf16.vlgmr.msra.gmra.mxu1 %vm159_vm1, %v948_v10 }
 0x802   :  { %v946_v12 = vpop.f32.mrf.mxu0 }
 0x80a   :  { %v1059_v13 = vpop.f32.mrf.mxu0 }
 0x812   :  { %v1061_v14 = vpop.f32.mrf.mxu0 }
 0x81a   :  { %v1150_v15 = vpop.f32.mrf.mxu0 }
 0x81b   :  { %v1151_v52 = vadd.f32 %v1150_v15, %v2243_v11 }
 0x81d   :  { %v1157_v16 = vsel %vm159_vm1, %v1151_v52, -inf }
 0x81e   :  { %1158 = vmax.xlane.f32.xlu1 %v1157_v16  ;;  %v2020_v16 = vld [vmem:[%s2646_s0] sm:$0xff] }
 0x81f   :  { %v1127_v17 = vpop.f32.mrf.mxu3 }
 0x820   :  { %v1128_v19 = vadd.f32 %v1127_v17, %v2228_v56 }
 0x822   :  { %v1152_v22 = vpop.f32.mrf.mxu0  ;;  %v1154_v23 = vsel %vm159_vm1, %v1128_v19, -inf }
 0x823   :  { %1155 = vmax.xlane.f32.xlu0 %v1154_v23 }
 0x827   :  { %v1129_v24 = vpop.f32.mrf.mxu3 }
 0x828   :  { %v2064_v24 = vmov 64.0  }
 0x837   :  { %1178 = vrot.lane.b32.xlu1 %v2234_v5, %s2063_s26 }
 0x83e   :  { %v1035_v4 = vpop.xlane.xlu2 %1034 }
 0x83f   :  { %1992 = vrcp.f32 %v1035_v4 }
 0x845   :  { %v1993_v25 = vpop.eup %1992 }
 0x846   :  { %v1039_v27 = vmul.f32 %v1993_v25, %v1991_v6  ;;  %v426_v6 = vadd.f32 %v2354_v42, %v2334_v20 }
 0x848   :  { %v1041_v29 = vpack.c.bf16 %v1039_v27, %v1039_v27  ;;  %v563_v7 = vadd.f32 %v2397_v45, %v426_v6 }
 0x84a   :  { %1776 = vmatmul.msk.bf16.vlgmr.msrb.gmra.mxu1 %vm159_vm1, %v1041_v29  ;;  %v699_v12 = vadd.f32 %v2426_v28, %v563_v7  ;;  %v2021_v28 = vld [vmem:[%s2646_s0 + $0x8] sm:$0xff] }
 0x84c   :  { %v835_v14 = vadd.f32 %v2453_v8, %v699_v12 }
 0x87a   :  { %v965_v11 = vpop.f32.mrf.mxu1 }
 0x87b   :  { %v970_v30 = vadd.f32 %v965_v11, %v834_v60  ;;  %v1221_v60 = vld [vmem:[%s2650_s4 + $0x1c] sm:$0xf] }
 0x87c   :  { %v1226_v62 = vsel %vm230_vm4, %v1221_v60, 0 }
 0x87d   :  { %1235 = vmatpush.bf16.msrb.mxu3 %v1226_v62 }
 0x882   :  { %v967_v44 = vpop.f32.mrf.mxu1 }
 0x891   :  { %v1159_v31 = vpop.xlane.xlu1 %1158 }
 0x892   :  { %v1161_v32 = vsub.f32 %v1151_v52, %v1159_v31  ;;  %v971_v52 = vadd.f32 %v967_v44, %v835_v14  ;;  %v1895_v44 = vld [vmem:[%s2652_s6 + $0x34] sm:$0xf] }
 0x894   :  { %v1164_v56 = vmul.f32 1.442695, %v1161_v32 }
 0x896   :  { %1994 = vpow2.f32 %v1164_v56  ;;  %v1156_v33 = vpop.xlane.xlu0 %1155 }
 0x897   :  { %v1160_v34 = vsub.f32 %v1128_v19, %v1156_v33 }
 0x899   :  { %v1162_v35 = vmul.f32 1.442695, %v1160_v34 }
 0x89b   :  { %1996 = vpow2.f32 %v1162_v35 }
 0x89c   :  { %v1995_v36 = vpop.eup %1994 }
 0x89d   :  { %v1169_v5 = vsel %vm159_vm1, %v1995_v36, 0.0 }
 0x89e   :  { %1170 = vadd.xlane.f32.xlu2 %v1169_v5 }
 0x8a1   :  { %v1997_v37 = vpop.eup %1996 }
 0x8a2   :  { %v1166_v38 = vsel %vm159_vm1, %v1997_v37, 0.0 }
 0x8a3   :  { %1167 = vadd.xlane.f32.xlu0 %v1166_v38 }
 0x8a9   :  { %v1179_v41 = vpop.permute.xlu1 %1178 }
 0x8aa   :  { %v1184_v43 = vsel %vm230_vm4, %v1179_v41, 0  ;;  %v1809_v41 = vld [vmem:[%s2652_s6 + $0x30] sm:$0xf] }
 0x8ab   :  { %1193 = vmatpush.bf16.msra.mxu1 %v1184_v43  ;;  %v1896_v43 = vld [vmem:[%s2652_s6 + $0x34] sm:$0xf0] }
 0x8b6   :  { %1199 = vrot.lane.b32.xlu2 %v2249_v18, %s2063_s26 }
 0x8c7   :  { %v1080_v46 = vpop.f32.mrf.mxu1 }
 0x8c8   :  { %v1084_v47 = vpack.c.bf16 %v1080_v46, %v1059_v13  ;;  %v1811_v46 = vld [vmem:[%s2652_s6 + $0x38] sm:$0xf0] }
 0x8ca   :  { %1777 = vmatmul.msk.bf16.vlgmr.msra.gmra.mxu2 %vm159_vm1, %v1084_v47  ;;  %v1810_v47 = vor.u32 %v1896_v43, %v1809_v41 }
 0x8cc   :  { %1409 = vmatpush.bf16.msrb.mxu0 %v1810_v47 }
 0x8cf   :  { %v1082_v48 = vpop.f32.mrf.mxu1 }
 0x8d0   :  { %v1814_v48 = vor.u32 %v1895_v44, %v1811_v46 }
 0x8d2   :  { %1423 = vmatpush.bf16.msrb.mxu1 %v1814_v48 }
 0x911   :  { %v1171_v49 = vpop.xlane.xlu2 %1170 }
 0x912   :  { %1998 = vrcp.f32 %v1171_v49  ;;  %v1801_v49 = vld [vmem:[%s2652_s6 + $0x20] sm:$0xf] }
 0x916   :  { %v1168_v50 = vpop.xlane.xlu0 %1167 }
 0x917   :  { %2000 = vrcp.f32 %v1168_v50  ;;  %v1894_v50 = vld [vmem:[%s2652_s6 + $0x24] sm:$0xf0] }
 0x918   :  { %v1999_v51 = vpop.eup %1998  ;;  %2002 = vrcp.f32 %v2064_v24 }
 0x919   :  { %v1175_v21 = vmul.f32 %v1999_v51, %v1995_v36  ;;  %v1200_v26 = vpop.permute.xlu2 %1199  ;;  %v1893_v51 = vld [vmem:[%s2652_s6 + $0x24] sm:$0xf] }
 0x91a   :  { %v1205_v53 = vsel %vm230_vm4, %v1200_v26, 0  ;;  %v1802_v26 = vor.u32 %v1894_v50, %v1801_v49 }
 0x91b   :  { %v1177_v54 = vpack.c.bf16 %v1175_v21, %v1175_v21  ;;  %1214 = vmatpush.bf16.msrb.mxu2 %v1205_v53  ;;  %v1803_v21 = vld [vmem:[%s2652_s6 + $0x28] sm:$0xf0] }
 0x91c   :  { %v1806_v53 = vor.u32 %v1893_v51, %v1803_v21  ;;  %1410 = vmatpush.bf16.msrb.mxu0 %v1802_v26 }
 0x91d   :  { %v2001_v55 = vpop.eup %2000 }
 0x91e   :  { %v1174_v57 = vmul.f32 %v2001_v55, %v1997_v37  ;;  %1781 = vmatmul.msk.bf16.vlgmr.msrb.gmra.mxu2 %vm159_vm1, %v1177_v54  ;;  %v2003_v4 = vpop.eup %2002  ;;  %v1793_v54 = vld [vmem:[%s2652_s6 + $0x10] sm:$0xf]  ;;  %v1892_v55 = vld [vmem:[%s2652_s6 + $0x14] sm:$0xf0]  ;;  %1424 = vmatpush.bf16.msrb.mxu1 %v1806_v53 }
 0x91f   :  { %v1261_v25 = vmul.f32 64.0, %v2003_v4  ;;  %vm1265_vm5 = vweird.f32 %v2003_v4 }
 0x920   :  { %v1176_v18 = vpack.c.bf16 %v1174_v57, %v1174_v57  ;;  %v1891_v57 = vld [vmem:[%s2652_s6 + $0x14] sm:$0xf] }
 0x921   :  { %v1262_v27 = vsub.f32 1.0, %v1261_v25  ;;  %v1903_v25 = vld [vmem:[%s2654_s8 + $0x30] sm:$0xff] }
 0x922   :  { %1780 = vmatmul.msk.bf16.vlgmr.msra.gmra.mxu1 %vm159_vm1, %v1176_v18  ;;  %v1795_v18 = vld [vmem:[%s2652_s6 + $0x18] sm:$0xf0] }
 0x923   :  { %v1263_v29 = vmul.f32 %v2003_v4, %v1262_v27  ;;  %v1911_v27 = vld [vmem:[%s2654_s8 + $0x70] sm:$0xff] }
 0x925   :  { %v1264_v11 = vadd.f32 %v2003_v4, %v1263_v29 }
 0x94d   :  { %v1101_v58 = vpop.f32.mrf.mxu2 }
 0x94e   :  { %v1106_v59 = vadd.f32 %v1101_v58, %v970_v30  ;;  %v2497_v30 = vsel %vm1265_vm5, %v2003_v4, %v1264_v11 }
 0x955   :  { %v1103_v61 = vpop.f32.mrf.mxu2 }
 0x956   :  { %v1107_v20 = vadd.f32 %v1103_v61, %v971_v52  ;;  %v1794_v61 = vor.u32 %v1892_v55, %v1793_v54  ;;  %v1933_v55 = vld [vmem:[%s2656_s10] ss:$0 sm:$0xff]  ;;  %s2066_s10 = smov 128  }
 0x958   :  { %1411 = vmatpush.bf16.msrb.mxu0 %v1794_v61 }
 0x99f   :  { %v1195_v63 = vpop.f32.mrf.mxu1 }
 0x9a1   :  { %v1216_v0 = vpop.f32.mrf.mxu2 }
 0x9a2   :  { %v1220_v1 = vpack.c.bf16 %v1216_v0, %v1195_v63  ;;  %v1798_v63 = vor.u32 %v1891_v57, %v1795_v18  ;;  %v1785_v0 = vld [vmem:[%s2652_s6] sm:$0xf] }
 0x9a4   :  { %1782 = vmatmul.msk.bf16.vlgmr.msrb.gmra.mxu3 %vm159_vm1, %v1220_v1  ;;  %v1890_v1 = vld [vmem:[%s2652_s6 + $0x4] sm:$0xf0]  ;;  %1425 = vmatpush.bf16.msrb.mxu1 %v1798_v63 }
 0x9a7   :  { %v1197_v2 = vpop.f32.mrf.mxu1 }
 0x9a8   :  { %v1889_v2 = vld [vmem:[%s2652_s6 + $0x4] sm:$0xf] }
 0x9a9   :  { %v1218_v3 = vpop.f32.mrf.mxu2 }
 0x9aa   :  { %v1787_v3 = vld [vmem:[%s2652_s6 + $0x8] sm:$0xf0] }
 0xa27   :  { %v1237_v10 = vpop.f32.mrf.mxu3 }
 0xa28   :  { %v1242_v13 = vadd.f32 %v1237_v10, %v1106_v59  ;;  %v1790_v10 = vor.u32 %v1889_v2, %v1787_v3  ;;  %v1899_v2 = vld [vmem:[%s2654_s8 + $0x10] sm:$0xff] }
 0xa29   :  { %v1907_v3 = vld [vmem:[%s2654_s8 + $0x50] sm:$0xff] }
 0xa2a   :  { %v1248_v15 = vadd.f32 %v1932_v9, %v1242_v13  ;;  %1426 = vmatpush.bf16.msrb.mxu1 %v1790_v10  ;;  %v1905_v10 = vld [vmem:[%s2654_s8 + $0x40] sm:$0xff] }
 0xa2c   :  { %v1250_v17 = vadd.f32 %v2020_v16, %v1248_v15 }
 0xa2e   :  { %v1254_v42 = vsel %vm106_vm0, %v1250_v17, 0.0 }
 0xa2f   :  { %1255 = vadd.xlane.f32.xlu0 %v1254_v42  ;;  %v1239_v45 = vpop.f32.mrf.mxu3 }
 0xa30   :  { %v1243_v19 = vadd.f32 %v1239_v45, %v1107_v20 }
 0xa32   :  { %v1249_v22 = vadd.f32 %v1932_v9, %v1243_v19  ;;  %v1786_v9 = vor.u32 %v1890_v1, %v1785_v0  ;;  %v1900_v1 = vld [vmem:[%s2654_s8 + $0x18] sm:$0xff] }
 0xa34   :  { %v1251_v23 = vadd.f32 %v2021_v28, %v1249_v22  ;;  %1412 = vmatpush.bf16.msrb.mxu0 %v1786_v9  ;;  %v1897_v9 = vld [vmem:[%s2654_s8] sm:$0xff] }
 0xa36   :  { %v1257_v8 = vsel %vm106_vm0, %v1251_v23, 0.0 }
 0xa37   :  { %1258 = vadd.xlane.f32.xlu0 %v1257_v8  ;;  %v1912_v8 = vld [vmem:[%s2654_s8 + $0x78] sm:$0xff] }
 0xa38   :  { %1585 = vmatpush.bf16.msra.mxu3 %v1912_v8 }
 0xa3c   :  { %1586 = vmatpush.bf16.msra.mxu3 %v1911_v27 }
 0xaa2   :  { %v1256_v31 = vpop.xlane.xlu0 %1255 }
 0xaa3   :  { %v1267_v32 = vmul.f32 %v2497_v30, %v1256_v31 }
 0xaa5   :  { %v2500_v56 = vsub.f32 %v1250_v17, %v1267_v32 }
 0xaa7   :  { %v1271_v33 = vmul.f32 %v2500_v56, %v2500_v56 }
 0xaa9   :  { %v1273_v34 = vsel %vm106_vm0, %v1271_v33, 0.0 }
 0xaaa   :  { %1274 = vadd.xlane.f32.xlu0 %v1273_v34  ;;  %v1259_v35 = vpop.xlane.xlu0 %1258  ;;  %v1902_v34 = vld [vmem:[%s2654_s8 + $0x28] sm:$0xff] }
 0xaab   :  { %v1268_v36 = vmul.f32 %v2497_v30, %v1259_v35  ;;  %v1910_v35 = vld [vmem:[%s2654_s8 + $0x68] sm:$0xff] }
 0xaac   :  { %1587 = vmatpush.bf16.msra.mxu3 %v1910_v35 }
 0xaad   :  { %v2506_v5 = vsub.f32 %v1251_v23, %v1268_v36  ;;  %v1904_v23 = vld [vmem:[%s2654_s8 + $0x38] sm:$0xff] }
 0xaae   :  { %1571 = vmatpush.bf16.msra.mxu2 %v1904_v23 }
 0xaaf   :  { %v1272_v37 = vmul.f32 %v2506_v5, %v2506_v5 }
 0xab1   :  { %v1276_v38 = vsel %vm106_vm0, %v1272_v37, 0.0 }
 0xab2   :  { %1277 = vadd.xlane.f32.xlu2 %v1276_v38  ;;  %1572 = vmatpush.bf16.msra.mxu2 %v1903_v25  ;;  %v1901_v38 = vld [vmem:[%s2654_s8 + $0x20] sm:$0xff] }
 0xab3   :  { %v1935_v25 = vld [vmem:[%s2655_s9] ss:$0 sm:$0xff] }
 0xab6   :  { %1573 = vmatpush.bf16.msra.mxu2 %v1902_v34 }
 0xaba   :  { %1574 = vmatpush.bf16.msra.mxu2 %v1901_v38 }
 0xabe   :  { %1575 = vmatpush.bf16.msra.mxu2 %v1900_v1 }
 0xac2   :  { %1576 = vmatpush.bf16.msra.mxu2 %v1899_v2 }
 0xb1d   :  { %v1275_v39 = vpop.xlane.xlu0 %1274 }
 0xb1e   :  { %v1279_v40 = vmul.f32 0.015873017, %v1275_v39  ;;  %v1909_v39 = vld [vmem:[%s2654_s8 + $0x60] sm:$0xff] }
 0xb1f   :  { %1588 = vmatpush.bf16.msra.mxu3 %v1909_v39 }
 0xb20   :  { %2004 = vrsqrt.f32 %v1279_v40  ;;  %vm1288_vm6 = vcmp.eq.f32.partialorder %v1279_v40, inf  ;;  %v1291_v17 = vand.u32 2147483648, %v1279_v40  ;;  %vm1290_vm7 = vcmp.eq.f32.partialorder %v1279_v40, 0.0 }
 0xb25   :  { %v1278_v58 = vpop.xlane.xlu2 %1277 }
 0xb26   :  { %v2005_v59 = vpop.eup %2004  ;;  %v1280_v60 = vmul.f32 0.015873017, %v1278_v58 }
 0xb27   :  { %v1282_v62 = vmul.f32 %v2005_v59, %v1279_v40 }
 0xb28   :  { %2006 = vrsqrt.f32 %v1280_v60  ;;  %vm1300_vm8 = vcmp.eq.f32.partialorder %v1280_v60, inf  ;;  %v1303_v4 = vand.u32 2147483648, %v1280_v60  ;;  %vm1302_vm9 = vcmp.eq.f32.partialorder %v1280_v60, 0.0 }
 0xb29   :  { %v1283_v6 = vmul.f32 %v2005_v59, %v1282_v62  ;;  %v1934_v62 = vld [vmem:[%s2657_s11] ss:$0 sm:$0xff] }
 0xb2b   :  { %v1284_v7 = vmul.f32 0.5, %v1283_v6  ;;  %v1898_v6 = vld [vmem:[%s2654_s8 + $0x8] sm:$0xff] }
 0xb2c   :  { %1577 = vmatpush.bf16.msra.mxu2 %v1898_v6 }
 0xb2d   :  { %v1285_v12 = vsub.f32 1.5, %v1284_v7  ;;  %v1906_v7 = vld [vmem:[%s2654_s8 + $0x48] sm:$0xff] }
 0xb2e   :  { %v2007_v13 = vpop.eup %2006 }
 0xb2f   :  { %v1286_v14 = vmul.f32 %v2005_v59, %v1285_v12  ;;  %v1294_v15 = vmul.f32 %v2007_v13, %v1280_v60  ;;  %v1356_v12 = vld [vmem:[%s2653_s7] sm:$0x3] }
 0xb30   :  { %1578 = vmatpush.bf16.msra.mxu2 %v1897_v9 }
 0xb31   :  { %v1287_v52 = vmul.f32 %v1286_v14, %v1279_v40  ;;  %v1295_v16 = vmul.f32 %v2007_v13, %v1294_v15  ;;  %v1358_v15 = vperm.slane %v1356_v12, 0 }
 0xb33   :  { %v1289_v20 = vsel %vm1288_vm6, %v1279_v40, %v1287_v52  ;;  %v1296_v42 = vmul.f32 0.5, %v1295_v16  ;;  %v1359_v52 = vperm.slane %v1356_v12, 1 }
 0xb34   :  { %v1292_v45 = vsel %vm1290_vm7, %v1291_v17, %v1289_v20 }
 0xb35   :  { %v1305_v19 = vadd.f32 1e-06, %v1292_v45  ;;  %v1297_v22 = vsub.f32 1.5, %v1296_v42 }
 0xb37   :  { %2008 = vrcp.f32 %v1305_v19  ;;  %v1298_v28 = vmul.f32 %v2007_v13, %v1297_v22  ;;  %v1318_v40 = vand.u32 2147483648, %v1305_v19  ;;  %vm1312_vm11 = vweird.f32 %v1305_v19 }
 0xb38   :  { %v1316_v43 = vand.u32 2147483647, %v1305_v19 }
 0xb39   :  { %v1299_v24 = vmul.f32 %v1298_v28, %v1280_v60  ;;  %v1319_v48 = vor.u32 1.1754944e-38, %v1318_v40 }
 0xb3a   :  { %vm1317_vm13 = vcmp.eq.f32.partialorder %v1316_v43, 8.507059e+37 }
 0xb3b   :  { %v1301_v29 = vsel %vm1300_vm8, %v1280_v60, %v1299_v24 }
 0xb3c   :  { %v1304_v11 = vsel %vm1302_vm9, %v1303_v4, %v1301_v29 }
 0xb3d   :  { %v2009_v31 = vpop.eup %2008  ;;  %v1306_v32 = vadd.f32 1e-06, %v1304_v11 }
 0xb3e   :  { %v1308_v33 = vmul.f32 %v2009_v31, %v1305_v19  ;;  %vm1313_vm10 = vweird.f32 %v2009_v31 }
 0xb3f   :  { %2010 = vrcp.f32 %v1306_v32  ;;  %vm1314_vm12 = vmor %vm1312_vm11, %vm1313_vm10  ;;  %v1333_v51 = vand.u32 2147483648, %v1306_v32  ;;  %v1331_v26 = vand.u32 2147483647, %v1306_v32  ;;  %vm1327_vm15 = vweird.f32 %v1306_v32 }
 0xb40   :  { %v1309_v36 = vsub.f32 1.0, %v1308_v33 }
 0xb41   :  { %v1334_v57 = vor.u32 1.1754944e-38, %v1333_v51  ;;  %vm1332_vm2 = vcmp.eq.f32.partialorder %v1331_v26, 8.507059e+37 }
 0xb42   :  { %v1310_v37 = vmul.f32 %v2009_v31, %v1309_v36 }
 0xb44   :  { %v1311_v41 = vadd.f32 %v2009_v31, %v1310_v37 }
 0xb45   :  { %v2011_v44 = vpop.eup %2010 }
 0xb46   :  { %v1315_v46 = vsel %vm1314_vm12, %v2009_v31, %v1311_v41  ;;  %v1323_v47 = vmul.f32 %v2011_v44, %v1306_v32  ;;  %vm1328_vm14 = vweird.f32 %v2011_v44 }
 0xb47   :  { %v1320_v50 = vsel %vm1317_vm13, %v1319_v48, %v1315_v46  ;;  %vm1329_vm1 = vmor %vm1327_vm15, %vm1328_vm14 }
 0xb48   :  { %v1324_v49 = vsub.f32 1.0, %v1323_v47  ;;  %v1321_v53 = vmul.f32 %v1320_v50, %v2500_v56 }
 0xb4a   :  { %v1325_v21 = vmul.f32 %v2011_v44, %v1324_v49  ;;  %v1340_v60 = vmul.f32 %v1933_v55, %v1321_v53 }
 0xb4c   :  { %v1326_v54 = vadd.f32 %v2011_v44, %v1325_v21  ;;  %v1345_v56 = vadd.f32 %v1934_v62, %v1340_v60 }
 0xb4e   :  { %v1330_v18 = vsel %vm1329_vm1, %v2011_v44, %v1326_v54 }
 0xb4f   :  { %v1335_v58 = vsel %vm1332_vm2, %v1334_v57, %v1330_v18 }
 0xb50   :  { %v1336_v59 = vmul.f32 %v1335_v58, %v2506_v5  ;;  %v1908_v5 = vld [vmem:[%s2654_s8 + $0x58] sm:$0xff] }
 0xb51   :  { %1589 = vmatpush.bf16.msra.mxu3 %v1908_v5 }
 0xb52   :  { %v1341_v61 = vmul.f32 %v1933_v55, %v1336_v59 }
 0xb54   :  { %v1346_v63 = vadd.f32 %v1934_v62, %v1341_v61 }
 0xb55   :  { %1590 = vmatpush.bf16.msra.mxu3 %v1907_v3 }
 0xb56   :  { %v1347_v0 = vpack.c.bf16 %v1346_v63, %v1345_v56 }
 0xb58   :  { %1815 = vmatmul.msk.bf16.vlgmr.msrb.gmra.mxu0 %vm106_vm0, %v1347_v0  ;;  %1816 = vmatmul.msk.bf16.vlgmr.msrb.gmra.mxu1 %vm106_vm0, %v1347_v0 }
 0xb59   :  { %1591 = vmatpush.bf16.msra.mxu3 %v1906_v7 }
 0xb5d   :  { %1592 = vmatpush.bf16.msra.mxu3 %v1905_v10 }
 0xbd5   :  { %v1414_v13 = vpop.f32.mrf.mxu0  ;;  %v1428_v14 = vpop.f32.mrf.mxu1 }
 0xbd6   :  { %v1415_v16 = vadd.f32 %v1414_v13, %v1358_v15  ;;  %v1429_v17 = vadd.f32 %v1428_v14, %v1359_v52 }
 0xbd8   :  { %v1433_v22 = vmax.f32 %v1415_v16, 0.0  ;;  %v1434_v28 = vmax.f32 %v1429_v17, 0.0 }
 0xbdd   :  { %v1416_v20 = vpop.f32.mrf.mxu0  ;;  %v1430_v42 = vpop.f32.mrf.mxu1 }
 0xbde   :  { %v1417_v45 = vadd.f32 %v1416_v20, %v1358_v15  ;;  %v1431_v19 = vadd.f32 %v1430_v42, %v1359_v52 }
 0xbe0   :  { %v1435_v23 = vmax.f32 %v1417_v45, 0.0  ;;  %v1436_v8 = vmax.f32 %v1431_v19, 0.0 }
 0xbe2   :  { %v1437_v24 = vpack.c.bf16 %v1435_v23, %v1433_v22  ;;  %v1438_v4 = vpack.c.bf16 %v1436_v8, %v1434_v28  ;;  %v1936_v23 = vld [vmem:[%s2658_s12] ss:$0 sm:$0xff]  ;;  %s2065_s12 = smov [#allocation2]  }
 0xbe3   :  { %s1695_s24 = sshll.u32 %s2065_s12, 4  ;;  %s1696_s24 = int_to_ptr.vmem [resolvable:$true] %s1695_s24 }
 0xbe4   :  { %1579 = vmatmul.bf16.vlgmr.msra.gmra.mxu2 %v1437_v24  ;;  %1593 = vmatmul.bf16.vlgmr.msra.gmra.mxu3 %v1438_v4 }
 0xc67   :  { %v1580_v27 = vpop.f32.mrf.mxu2  ;;  %v1594_v29 = vpop.f32.mrf.mxu3 }
 0xc68   :  { %v1581_v11 = vadd.f32 %v1935_v25, %v1580_v27 }
 0xc6a   :  { %v1595_v31 = vadd.f32 %v1594_v29, %v1581_v11 }
 0xc6c   :  { %v1599_v32 = vadd.f32 %v1595_v31, %v1345_v56 }
 0xc6e   :  { %v1603_v33 = vsel %vm106_vm0, %v1599_v32, 0.0 }
 0xc6f   :  { %v1582_v34 = vpop.f32.mrf.mxu2  ;;  %1604 = vadd.xlane.f32.xlu1 %v1603_v33  ;;  %v1596_v36 = vpop.f32.mrf.mxu3 }
 0xc70   :  { %v1583_v35 = vadd.f32 %v1935_v25, %v1582_v34  ;;  %v1937_v25 = vld [vmem:[%s2659_s13] ss:$0 sm:$0xff] }
 0xc72   :  { %v1597_v37 = vadd.f32 %v1596_v36, %v1583_v35 }
 0xc74   :  { %v1600_v38 = vadd.f32 %v1597_v37, %v1346_v63 }
 0xc76   :  { %v1606_v39 = vsel %vm106_vm0, %v1600_v38, 0.0 }
 0xc77   :  { %1607 = vadd.xlane.f32.xlu0 %v1606_v39 }
 0xce2   :  { %v1605_v40 = vpop.xlane.xlu1 %1604 }
 0xce3   :  { %v1609_v41 = vmul.f32 %v1605_v40, %v2497_v30 }
 0xce5   :  { %v1611_v43 = vsub.f32 %v1599_v32, %v1609_v41 }
 0xce7   :  { %v1613_v44 = vmul.f32 %v1611_v43, %v1611_v43 }
 0xce9   :  { %v1615_v46 = vsel %vm106_vm0, %v1613_v44, 0.0 }
 0xcea   :  { %v1608_v47 = vpop.xlane.xlu0 %1607  ;;  %1616 = vadd.xlane.f32.xlu0 %v1615_v46 }
 0xceb   :  { %v1610_v48 = vmul.f32 %v1608_v47, %v2497_v30 }
 0xced   :  { %v2628_v49 = vsub.f32 %v1600_v38, %v1610_v48 }
 0xcef   :  { %v1614_v50 = vmul.f32 %v2628_v49, %v2628_v49 }
 0xcf1   :  { %v1618_v51 = vsel %vm106_vm0, %v1614_v50, 0.0 }
 0xcf2   :  { %1619 = vadd.xlane.f32.xlu0 %v1618_v51 }
 0xd5d   :  { %v1617_v21 = vpop.xlane.xlu0 %1616 }
 0xd5e   :  { %v1621_v26 = vmul.f32 0.015873017, %v1617_v21 }
 0xd60   :  { %2012 = vrsqrt.f32 %v1621_v26  ;;  %vm1630_vm3 = vcmp.eq.f32.partialorder %v1621_v26, inf  ;;  %v1633_v63 = vand.u32 2147483648, %v1621_v26  ;;  %vm1632_vm4 = vcmp.eq.f32.partialorder %v1621_v26, 0.0 }
 0xd65   :  { %v1620_v53 = vpop.xlane.xlu0 %1619 }
 0xd66   :  { %v2013_v54 = vpop.eup %2012  ;;  %v1622_v55 = vmul.f32 0.015873017, %v1620_v53 }
 0xd67   :  { %v1624_v57 = vmul.f32 %v2013_v54, %v1621_v26 }
 0xd68   :  { %2014 = vrsqrt.f32 %v1622_v55  ;;  %vm1642_vm5 = vcmp.eq.f32.partialorder %v1622_v55, inf  ;;  %v1645_v9 = vand.u32 2147483648, %v1622_v55  ;;  %vm1644_vm6 = vcmp.eq.f32.partialorder %v1622_v55, 0.0 }
 0xd69   :  { %v1625_v18 = vmul.f32 %v2013_v54, %v1624_v57 }
 0xd6b   :  { %v1626_v58 = vmul.f32 0.5, %v1625_v18 }
 0xd6d   :  { %v1627_v59 = vsub.f32 1.5, %v1626_v58 }
 0xd6e   :  { %v2015_v30 = vpop.eup %2014 }
 0xd6f   :  { %v1628_v60 = vmul.f32 %v2013_v54, %v1627_v59  ;;  %v1636_v62 = vmul.f32 %v2015_v30, %v1622_v55 }
 0xd71   :  { %v1629_v61 = vmul.f32 %v1628_v60, %v1621_v26  ;;  %v1637_v56 = vmul.f32 %v2015_v30, %v1636_v62 }
 0xd73   :  { %v1631_v0 = vsel %vm1630_vm3, %v1621_v26, %v1629_v61  ;;  %v1638_v1 = vmul.f32 0.5, %v1637_v56 }
 0xd74   :  { %v1634_v5 = vsel %vm1632_vm4, %v1633_v63, %v1631_v0 }
 0xd75   :  { %v1647_v2 = vadd.f32 1e-06, %v1634_v5  ;;  %v1639_v3 = vsub.f32 1.5, %v1638_v1 }
 0xd77   :  { %2016 = vrcp.f32 %v1647_v2  ;;  %v1640_v6 = vmul.f32 %v2015_v30, %v1639_v3  ;;  %v1660_v16 = vand.u32 2147483648, %v1647_v2  ;;  %v1658_v20 = vand.u32 2147483647, %v1647_v2 }
 0xd78   :  { %vm1654_vm8 = vweird.f32 %v1647_v2 }
 0xd79   :  { %v1641_v7 = vmul.f32 %v1640_v6, %v1622_v55  ;;  %v1661_v19 = vor.u32 1.1754944e-38, %v1660_v16  ;;  %vm1659_vm10 = vcmp.eq.f32.partialorder %v1658_v20, 8.507059e+37 }
 0xd7b   :  { %v1643_v10 = vsel %vm1642_vm5, %v1622_v55, %v1641_v7 }
 0xd7c   :  { %v1646_v12 = vsel %vm1644_vm6, %v1645_v9, %v1643_v10 }
 0xd7d   :  { %v2017_v13 = vpop.eup %2016  ;;  %v1648_v14 = vadd.f32 1e-06, %v1646_v12 }
 0xd7e   :  { %v1650_v15 = vmul.f32 %v2017_v13, %v1647_v2  ;;  %vm1655_vm7 = vweird.f32 %v2017_v13 }
 0xd7f   :  { %2018 = vrcp.f32 %v1648_v14  ;;  %vm1656_vm9 = vmor %vm1654_vm8, %vm1655_vm7  ;;  %v1675_v27 = vand.u32 2147483648, %v1648_v14  ;;  %v1673_v11 = vand.u32 2147483647, %v1648_v14  ;;  %vm1669_vm12 = vweird.f32 %v1648_v14 }
 0xd80   :  { %v1651_v52 = vsub.f32 1.0, %v1650_v15 }
 0xd81   :  { %v1676_v34 = vor.u32 1.1754944e-38, %v1675_v27  ;;  %vm1674_vm14 = vcmp.eq.f32.partialorder %v1673_v11, 8.507059e+37 }
 0xd82   :  { %v1652_v17 = vmul.f32 %v2017_v13, %v1651_v52 }
 0xd84   :  { %v1653_v42 = vadd.f32 %v2017_v13, %v1652_v17 }
 0xd85   :  { %v2019_v45 = vpop.eup %2018 }
 0xd86   :  { %v1657_v22 = vsel %vm1656_vm9, %v2017_v13, %v1653_v42  ;;  %v1665_v28 = vmul.f32 %v2019_v45, %v1648_v14  ;;  %vm1670_vm11 = vweird.f32 %v2019_v45 }
 0xd87   :  { %v1662_v8 = vsel %vm1659_vm10, %v1661_v19, %v1657_v22  ;;  %vm1671_vm13 = vmor %vm1669_vm12, %vm1670_vm11 }
 0xd88   :  { %v1663_v24 = vmul.f32 %v1662_v8, %v1611_v43  ;;  %v1666_v4 = vsub.f32 1.0, %v1665_v28 }
 0xd8a   :  { %v1667_v29 = vmul.f32 %v2019_v45, %v1666_v4  ;;  %v1682_v31 = vmul.f32 %v1936_v23, %v1663_v24 }
 0xd8c   :  { %v1668_v32 = vadd.f32 %v2019_v45, %v1667_v29  ;;  %v1687_v33 = vadd.f32 %v1937_v25, %v1682_v31 }
 0xd8e   :  { %v1672_v35 = vsel %vm1671_vm13, %v2019_v45, %v1668_v32  ;;  %1689 = vst.msk [vmem:[#allocation2] sm:$0xff] %vm106_vm0, %v1687_v33 }
 0xd8f   :  { %v1677_v36 = vsel %vm1674_vm14, %v1676_v34, %v1672_v35 }
 0xd90   :  { %v1678_v37 = vmul.f32 %v1677_v36, %v2628_v49 }
 0xd92   :  { %v1683_v38 = vmul.f32 %v1936_v23, %v1678_v37 }
 0xd94   :  { %v1688_v39 = vadd.f32 %v1937_v25, %v1683_v38 }
 0xd96   :  { %1690 = vst.msk [vmem:[#allocation2 + $0x8] sm:$0xff] %vm106_vm0, %v1688_v39 }
 0xd97   :  { %1703 = dma.vmem_to_hbm [thread:$0]  %s1696_s24, 256, %s1698_s25, [#allocation3], %s2066_s10, %s2066_s10, %s2062_s23  }
 0xd98   :  { %2046 = dma.done.wait [#allocation3], 256  }
 0xd99   :  { %2047 = vsyncadd [#allocation3], 4294967040 }
 0xd9a   :  { %1708 = vsyncpa [#allocation3], 1 }

</bundles_post_ra>
